<compile_context>
chip_gen: v7x
topology: tpu7x:2x2x1
jax: 0.10.0
libtpu: 0.0.40
codegen_flags: <defaults>
</compile_context>

<pallas_src>
import functools
import math

import jax
import jax.numpy as jnp
from jax import lax
from jax.experimental import pallas as pl
from jax.experimental.pallas import tpu as pltpu

# Keep the pure-JAX reference matmuls at full f32 so the comparison is tight.
jax.config.update("jax_default_matmul_precision", "highest")

D_MODEL = 32          # args.d_model
D_HIDDEN = 64         # args.d_hidden
N_HEADS = 2           # args.n_heads
HEAD_DIM = D_MODEL // N_HEADS
EPS = 1e-6
INF = 1e10
PACK = 4              # tokens packed per 128-lane row in the output store


# ---------------------------------------------------------------------------
# In-kernel helpers
# ---------------------------------------------------------------------------
def _layernorm(z, gamma, beta):
    d = z.shape[-1]
    mean = jnp.mean(z, axis=-1, keepdims=True)
    diff = z - mean
    var = jnp.sum(diff * diff, axis=-1, keepdims=True) * (1.0 / (d - 1))
    std_eps = jnp.sqrt(var) + EPS
    inv = pl.reciprocal(std_eps, approx=True)        # EUP
    inv = inv * (2.0 - std_eps * inv)                 # Newton step -> ~exact
    return gamma * diff * inv + beta


def _softmax_rows(logits):
    m = jnp.max(logits, axis=-1, keepdims=True)
    e = jnp.exp(logits - m)
    s = jnp.sum(e, axis=-1, keepdims=True)
    inv = pl.reciprocal(s, approx=True)               # EUP instead of VALU divide
    inv = inv * (2.0 - s * inv)                        # Newton step
    return e * inv


def _attn_highway(x, kv, wqkvo, w1g, w2g, vec, *, causal, same_qkv):
    D, H, hd = D_MODEL, D_HIDDEN, HEAD_DIM
    b1g = vec[0:1, :H]
    bqkv = vec[1:2, :3 * D]          # [bq/sqrt(D) | bk | bv]
    b2g = vec[2:3, :D]
    bo = vec[3:4, :D]
    gamma = vec[4:5, :D]
    beta = vec[5:6, :D]

    # Highway gate: sigmoid(FeedForward(x)).
    hg = jnp.maximum(jnp.dot(x, w1g, preferred_element_type=jnp.float32) + b1g, 0.0)
    g = jax.nn.sigmoid(jnp.dot(hg, w2g, preferred_element_type=jnp.float32) + b2g)

    # Fused Q|K|V projections (1/sqrt(d_model) pre-folded into wq/bq at pack time).
    if same_qkv:
        qkv = jnp.dot(x, wqkvo[:, :3 * D], preferred_element_type=jnp.float32) + bqkv
        q, k, v = qkv[:, :D], qkv[:, D:2 * D], qkv[:, 2 * D:3 * D]
    else:
        q = jnp.dot(x, wqkvo[:, :D], preferred_element_type=jnp.float32) + bqkv[:, :D]
        kvp = jnp.dot(kv, wqkvo[:, D:3 * D],
                      preferred_element_type=jnp.float32) + bqkv[:, D:3 * D]
        k, v = kvp[:, :D], kvp[:, D:2 * D]
    wo = wqkvo[:, 3 * D:4 * D]                        # (D, D)

    Sq, Sk = x.shape[0], kv.shape[0]
    neg = None
    if causal:                                        # hoisted out of the head loop
        rows = lax.broadcasted_iota(jnp.int32, (Sq, Sk), 0)
        cols = lax.broadcasted_iota(jnp.int32, (Sq, Sk), 1)
        neg = jnp.where(cols > rows, -INF, 0.0)

    # Per head: scores / softmax / PV only; the output projection is folded into the
    # accumulation (two (Sq,hd)@(hd,D) dots; avoids a minor-dim concat).
    y = jnp.zeros((Sq, D), jnp.float32)
    for h in range(N_HEADS):                          # static unroll
        sl = slice(h * hd, (h + 1) * hd)
        s = jnp.einsum("qd,kd->qk", q[:, sl], k[:, sl],
                       preferred_element_type=jnp.float32)
        if neg is not None:
            s = s + neg
        p = _softmax_rows(s)
        ah = jnp.einsum("qk,kd->qd", p, v[:, sl], preferred_element_type=jnp.float32)
        y = y + jnp.dot(ah, wo[sl, :], preferred_element_type=jnp.float32)
    y = y + bo

    z = x * g + y * (1.0 - g)                         # dropout = eval-mode identity
    return _layernorm(z, gamma, beta)


def _ffn_highway(x, w1cat, w2blk, vecf):
    D = D_MODEL
    b1 = vecf[0:1, :2 * D_HIDDEN]                     # [b1_gate | b1_layer]
    b2 = vecf[1:2, :2 * D]                            # [b2_gate | b2_layer]
    gamma = vecf[2:3, :D]
    beta = vecf[3:4, :D]
    # Gate FFN and wrapped FFN share fused first/second matmuls (block-diag second).
    h = jnp.maximum(jnp.dot(x, w1cat, preferred_element_type=jnp.float32) + b1, 0.0)
    gy = jnp.dot(h, w2blk, preferred_element_type=jnp.float32) + b2
    g = jax.nn.sigmoid(gy[:, :D])
    y = gy[:, D:2 * D]
    z = x * g + y * (1.0 - g)                         # dropout = eval-mode identity
    return _layernorm(z, gamma, beta)


def _pack_rows(x, pack):
    # (S, D) -> (S//pack, pack*D): row r = [x[pack*r] | ... | x[pack*r+pack-1]].
    # Implemented with exact 0/1 selection/placement matmuls (MXU) so the output
    # store is lane-dense without relying on a sublane->lane vector reshape.
    if pack == 1:
        return x
    S, D = x.shape
    R = S // pack
    r_idx = lax.broadcasted_iota(jnp.int32, (R, S), 0)
    t_idx = lax.broadcasted_iota(jnp.int32, (R, S), 1)
    d_idx = lax.broadcasted_iota(jnp.int32, (D, pack * D), 0)
    l_idx = lax.broadcasted_iota(jnp.int32, (D, pack * D), 1)
    out = jnp.zeros((R, pack * D), jnp.float32)
    for j in range(pack):
        sel = (t_idx == pack * r_idx + j).astype(jnp.float32)      # pick token pack*r+j
        place = (l_idx == j * D + d_idx).astype(jnp.float32)       # drop it in lane block j
        tok = jnp.dot(sel, x, preferred_element_type=jnp.float32)
        out = out + jnp.dot(tok, place, preferred_element_type=jnp.float32)
    return out


# ---------------------------------------------------------------------------
# Fused DecoderLayer kernel (one batch element per grid step)
# ---------------------------------------------------------------------------
def decoder_layer_kernel(x_ref, enc_ref,
                         wqkvo_s_ref, w1g_s_ref, w2g_s_ref, vec_s_ref,
                         wqkvo_c_ref, w1g_c_ref, w2g_c_ref, vec_c_ref,
                         w1f_ref, w2f_ref, vecf_ref,
                         o_ref, *, pack):
    x = x_ref[0]                                      # (S, D)
    enc = enc_ref[0]                                  # (S_enc, D)

    x = _attn_highway(x, x, wqkvo_s_ref[...], w1g_s_ref[...], w2g_s_ref[...],
                      vec_s_ref[...], causal=True, same_qkv=True)
    x = _attn_highway(x, enc, wqkvo_c_ref[...], w1g_c_ref[...], w2g_c_ref[...],
                      vec_c_ref[...], causal=False, same_qkv=False)
    x = _ffn_highway(x, w1f_ref[...], w2f_ref[...], vecf_ref[...])

    o_ref[0] = _pack_rows(x, pack)                    # lane-dense store


def decoder_layer(x, encoding, packed_params):
    B, S, D = x.shape
    Se = encoding.shape[1]
    pack = PACK if S % PACK == 0 else (2 if S % 2 == 0 else 1)
    rows = S // pack

    x_spec = pl.BlockSpec((1, S, D), lambda b: (b, 0, 0))
    e_spec = pl.BlockSpec((1, Se, D), lambda b: (b, 0, 0))
    o_spec = pl.BlockSpec((1, rows, pack * D), lambda b: (b, 0, 0))
    full = lambda a: pl.BlockSpec(a.shape, lambda b, _nd=a.ndim: (0,) * _nd)

    out = pl.pallas_call(
        functools.partial(decoder_layer_kernel, pack=pack),
        out_shape=jax.ShapeDtypeStruct((B, rows, pack * D), jnp.float32),
        grid_spec=pl.GridSpec(
            grid=(B,),
            in_specs=[x_spec, e_spec] + [full(a) for a in packed_params],
            out_specs=o_spec),
        compiler_params=pltpu.CompilerParams(
            dimension_semantics=("parallel",)),       # shard batch across v7x's 2 TCs
    )(x, encoding, *packed_params)
    return out.reshape(B, S, D)


# ---------------------------------------------------------------------------
# Parameter packing (runs ONCE, outside the jitted forward)
# ---------------------------------------------------------------------------
def _row128(v):
    v = jnp.asarray(v, jnp.float32).reshape(1, -1)
    return jnp.pad(v, ((0, 0), (0, 128 - v.shape[1])))


def pack_attn_params(params):
    (w1g, b1g, w2g, b2g, wq, bq, wk, bk, wv, bv, wo, bo, gamma, beta) = params
    inv_scale = 1.0 / math.sqrt(D_MODEL)              # torch: Attention(d_key=d_model)
    wqkvo = jnp.concatenate([wq * inv_scale, wk, wv, wo], axis=1)     # (32, 128)
    vec = jnp.concatenate([
        _row128(b1g),
        _row128(jnp.concatenate([bq * inv_scale, bk, bv], axis=1)),
        _row128(b2g), _row128(bo), _row128(gamma), _row128(beta),
        jnp.zeros((2, 128), jnp.float32)], axis=0)                     # (8, 128)
    return wqkvo, w1g, w2g, vec


def pack_ffn_params(params):
    (w1g, b1g, w2g, b2g, w1l, b1l, w2l, b2l, gamma, beta) = params
    D, H = w1g.shape
    w1cat = jnp.concatenate([w1g, w1l], axis=1)                        # (32, 128)
    zHD = jnp.zeros((H, D), jnp.float32)
    w2blk = jnp.concatenate([
        jnp.concatenate([w2g, zHD], axis=1),
        jnp.concatenate([zHD, w2l], axis=1)], axis=0)                  # (128, 64)
    vecf = jnp.concatenate([
        _row128(jnp.concatenate([b1g, b1l], axis=1)),
        _row128(jnp.concatenate([b2g, b2l], axis=1)),
        _row128(gamma), _row128(beta),
        jnp.zeros((4, 128), jnp.float32)], axis=0)                     # (8, 128)
    return w1cat, w2blk, vecf


def pack_decoder_params(p_self, p_cross, p_ffn):
    return pack_attn_params(p_self) + pack_attn_params(p_cross) + pack_ffn_params(p_ffn)


# ---------------------------------------------------------------------------
# Parameter init (mirrors torch Linear: U(-1/sqrt(d_in), 1/sqrt(d_in)), bias=0)
# ---------------------------------------------------------------------------
def _linear(key, d_in, d_out):
    stdv = 1.0 / math.sqrt(d_in)
    w = jax.random.uniform(key, (d_in, d_out), jnp.float32, -stdv, stdv)
    return w, jnp.zeros((1, d_out), jnp.float32)


def init_attn_highway_params(key):
    ks = jax.random.split(key, 6)
    w1g, b1g = _linear(ks[0], D_MODEL, D_HIDDEN)
    w2g, b2g = _linear(ks[1], D_HIDDEN, D_MODEL)
    wq, bq = _linear(ks[2], D_MODEL, D_MODEL)
    wk, bk = _linear(ks[3], D_MODEL, D_MODEL)
    wv, bv = _linear(ks[4], D_MODEL, D_MODEL)
    wo, bo = _linear(ks[5], D_MODEL, D_MODEL)
    gamma = jnp.ones((1, D_MODEL), jnp.float32)
    beta = jnp.zeros((1, D_MODEL), jnp.float32)
    return (w1g, b1g, w2g, b2g, wq, bq, wk, bk, wv, bv, wo, bo, gamma, beta)


def init_ffn_highway_params(key):
    ks = jax.random.split(key, 4)
    w1g, b1g = _linear(ks[0], D_MODEL, D_HIDDEN)
    w2g, b2g = _linear(ks[1], D_HIDDEN, D_MODEL)
    w1l, b1l = _linear(ks[2], D_MODEL, D_HIDDEN)
    w2l, b2l = _linear(ks[3], D_HIDDEN, D_MODEL)
    gamma = jnp.ones((1, D_MODEL), jnp.float32)
    beta = jnp.zeros((1, D_MODEL), jnp.float32)
    return (w1g, b1g, w2g, b2g, w1l, b1l, w2l, b2l, gamma, beta)


# ---------------------------------------------------------------------------
# Pure-JAX reference
# ---------------------------------------------------------------------------
def _ffn_ref(x, w1, b1, w2, b2):
    return jnp.maximum(x @ w1 + b1, 0.0) @ w2 + b2


def _layernorm_ref(z, gamma, beta):
    mean = z.mean(-1, keepdims=True)
    var = ((z - mean) ** 2).sum(-1, keepdims=True) / (z.shape[-1] - 1)
    return gamma * (z - mean) / (jnp.sqrt(var) + EPS) + beta


def _mha_ref(q_in, kv_in, wq, bq, wk, bk, wv, bv, wo, bo, causal):
    B, Tq, D = q_in.shape
    Tk = kv_in.shape[1]
    hd = D // N_HEADS
    q = (q_in @ wq + bq).reshape(B, Tq, N_HEADS, hd).transpose(0, 2, 1, 3)
    k = (kv_in @ wk + bk).reshape(B, Tk, N_HEADS, hd).transpose(0, 2, 1, 3)
    v = (kv_in @ wv + bv).reshape(B, Tk, N_HEADS, hd).transpose(0, 2, 1, 3)
    s = jnp.einsum("bhqd,bhkd->bhqk", q, k)
    if causal:
        s = s - jnp.triu(jnp.ones((Tq, Tk), jnp.float32), 1) * INF
    p = jax.nn.softmax(s / math.sqrt(D_MODEL), axis=-1)
    o = jnp.einsum("bhqk,bhkd->bhqd", p, v).transpose(0, 2, 1, 3).reshape(B, Tq, D)
    return o @ wo + bo


def _highway_attn_ref(x, kv, params, causal):
    (w1g, b1g, w2g, b2g, wq, bq, wk, bk, wv, bv, wo, bo, gamma, beta) = params
    g = jax.nn.sigmoid(_ffn_ref(x, w1g, b1g, w2g, b2g))
    y = _mha_ref(x, kv, wq, bq, wk, bk, wv, bv, wo, bo, causal)
    return _layernorm_ref(x * g + y * (1.0 - g), gamma, beta)


def decoder_layer_ref(x, enc, p_self, p_cross, p_ffn):
    x = _highway_attn_ref(x, x, p_self, True)
    x = _highway_attn_ref(x, enc, p_cross, False)
    (w1g, b1g, w2g, b2g, w1l, b1l, w2l, b2l, gamma, beta) = p_ffn
    g = jax.nn.sigmoid(_ffn_ref(x, w1g, b1g, w2g, b2g))
    y = _ffn_ref(x, w1l, b1l, w2l, b2l)
    return _layernorm_ref(x * g + y * (1.0 - g), gamma, beta)


if __name__ == "__main__":
    key = jax.random.PRNGKey(0)
    kx, ke, k1, k2, k3 = jax.random.split(key, 5)

    B, S = 2, 8
    x = jax.random.normal(kx, (B, S, D_MODEL), jnp.float32)
    encoding = jax.random.normal(ke, (B, S, D_MODEL), jnp.float32)
    p_self = init_attn_highway_params(k1)
    p_cross = init_attn_highway_params(k2)
    p_ffn = init_ffn_highway_params(k3)

    # Pack parameters ONCE outside the jitted forward (feedback item 7).
    packed = pack_decoder_params(p_self, p_cross, p_ffn)

    fwd = jax.jit(decoder_layer)
    out = jax.block_until_ready(fwd(x, encoding, packed))

    ref = decoder_layer_ref(x, encoding, p_self, p_cross, p_ffn)
    assert out.shape == (B, S, D_MODEL)
    max_err = float(jnp.max(jnp.abs(out - ref)))
    assert jnp.allclose(out, ref, atol=2e-3, rtol=2e-3), \
        f"mismatch vs reference (max err {max_err})"

    print("KERNEL_OK")
</pallas_src>

<mosaic_0001>
module attributes {stable_mosaic.version = 11 : i64} {
  func.func @decoder_layer_kernel(%arg0: i32, %arg1: memref<1x8x32xf32, #tpu.memory_space<vmem>>, %arg2: memref<1x8x32xf32, #tpu.memory_space<vmem>>, %arg3: memref<32x128xf32, #tpu.memory_space<vmem>>, %arg4: memref<32x64xf32, #tpu.memory_space<vmem>>, %arg5: memref<64x32xf32, #tpu.memory_space<vmem>>, %arg6: memref<8x128xf32, #tpu.memory_space<vmem>>, %arg7: memref<32x128xf32, #tpu.memory_space<vmem>>, %arg8: memref<32x64xf32, #tpu.memory_space<vmem>>, %arg9: memref<64x32xf32, #tpu.memory_space<vmem>>, %arg10: memref<8x128xf32, #tpu.memory_space<vmem>>, %arg11: memref<32x128xf32, #tpu.memory_space<vmem>>, %arg12: memref<128x64xf32, #tpu.memory_space<vmem>>, %arg13: memref<8x128xf32, #tpu.memory_space<vmem>>, %arg14: memref<1x2x128xf32, #tpu.memory_space<vmem>>) attributes {dimension_semantics = [#tpu.dimension_semantics<parallel>], iteration_bounds = array<i64: 2>, scalar_prefetch = 0 : i64, scratch_operands = 0 : i64, tpu.core_type = #tpu.core_type<tc>, window_params = [{transform_indices = @transform_0, window_bounds = array<i64: 1, 8, 32>}, {transform_indices = @transform_1, window_bounds = array<i64: 1, 8, 32>}, {pipeline_mode = #tpu.pipeline_mode<synchronous>, transform_indices = @transform_2, window_bounds = array<i64: 32, 128>}, {pipeline_mode = #tpu.pipeline_mode<synchronous>, transform_indices = @transform_3, window_bounds = array<i64: 32, 64>}, {pipeline_mode = #tpu.pipeline_mode<synchronous>, transform_indices = @transform_4, window_bounds = array<i64: 64, 32>}, {pipeline_mode = #tpu.pipeline_mode<synchronous>, transform_indices = @transform_5, window_bounds = array<i64: 8, 128>}, {pipeline_mode = #tpu.pipeline_mode<synchronous>, transform_indices = @transform_6, window_bounds = array<i64: 32, 128>}, {pipeline_mode = #tpu.pipeline_mode<synchronous>, transform_indices = @transform_7, window_bounds = array<i64: 32, 64>}, {pipeline_mode = #tpu.pipeline_mode<synchronous>, transform_indices = @transform_8, window_bounds = array<i64: 64, 32>}, {pipeline_mode = #tpu.pipeline_mode<synchronous>, transform_indices = @transform_9, window_bounds = array<i64: 8, 128>}, {pipeline_mode = #tpu.pipeline_mode<synchronous>, transform_indices = @transform_10, window_bounds = array<i64: 32, 128>}, {pipeline_mode = #tpu.pipeline_mode<synchronous>, transform_indices = @transform_11, window_bounds = array<i64: 128, 64>}, {pipeline_mode = #tpu.pipeline_mode<synchronous>, transform_indices = @transform_12, window_bounds = array<i64: 8, 128>}, {transform_indices = @transform_13, window_bounds = array<i64: 1, 2, 128>}]} {
    %c0 = arith.constant 0 : index
    %c0_0 = arith.constant 0 : index
    %c0_1 = arith.constant 0 : index
    %0 = vector.load %arg1[%c0, %c0_0, %c0_1] : memref<1x8x32xf32, #tpu.memory_space<vmem>>, vector<1x8x32xf32>
    %1 = vector.shape_cast %0 : vector<1x8x32xf32> to vector<8x32xf32>
    %c0_2 = arith.constant 0 : index
    %c0_3 = arith.constant 0 : index
    %c0_4 = arith.constant 0 : index
    %2 = vector.load %arg2[%c0_2, %c0_3, %c0_4] : memref<1x8x32xf32, #tpu.memory_space<vmem>>, vector<1x8x32xf32>
    %3 = vector.shape_cast %2 : vector<1x8x32xf32> to vector<8x32xf32>
    %c0_5 = arith.constant 0 : index
    %c0_6 = arith.constant 0 : index
    %4 = vector.load %arg3[%c0_5, %c0_6] : memref<32x128xf32, #tpu.memory_space<vmem>>, vector<32x128xf32>
    %c0_7 = arith.constant 0 : index
    %c0_8 = arith.constant 0 : index
    %5 = vector.load %arg4[%c0_7, %c0_8] : memref<32x64xf32, #tpu.memory_space<vmem>>, vector<32x64xf32>
    %c0_9 = arith.constant 0 : index
    %c0_10 = arith.constant 0 : index
    %6 = vector.load %arg5[%c0_9, %c0_10] : memref<64x32xf32, #tpu.memory_space<vmem>>, vector<64x32xf32>
    %c0_11 = arith.constant 0 : index
    %c0_12 = arith.constant 0 : index
    %7 = vector.load %arg6[%c0_11, %c0_12] : memref<8x128xf32, #tpu.memory_space<vmem>>, vector<8x128xf32>
    %8 = vector.extract_strided_slice %7 {offsets = [0, 0], sizes = [1, 64], strides = [1, 1]} : vector<8x128xf32> to vector<1x64xf32>
    %9 = vector.extract_strided_slice %7 {offsets = [1, 0], sizes = [1, 96], strides = [1, 1]} : vector<8x128xf32> to vector<1x96xf32>
    %10 = vector.extract_strided_slice %7 {offsets = [2, 0], sizes = [1, 32], strides = [1, 1]} : vector<8x128xf32> to vector<1x32xf32>
    %11 = vector.extract_strided_slice %7 {offsets = [3, 0], sizes = [1, 32], strides = [1, 1]} : vector<8x128xf32> to vector<1x32xf32>
    %12 = vector.extract_strided_slice %7 {offsets = [4, 0], sizes = [1, 32], strides = [1, 1]} : vector<8x128xf32> to vector<1x32xf32>
    %13 = vector.extract_strided_slice %7 {offsets = [5, 0], sizes = [1, 32], strides = [1, 1]} : vector<8x128xf32> to vector<1x32xf32>
    %cst = arith.constant dense<0.000000e+00> : vector<8x64xf32>
    %14 = tpu.matmul %1, %5, %cst {dimension_numbers = #tpu.dot_dimension_numbers<[1], [0], [0], [1], [0, 0, 1, 1], [], []>, precision = #tpu.contract_precision<fp32>} : vector<8x32xf32>, vector<32x64xf32>, vector<8x64xf32> -> vector<8x64xf32>
    %15 = vector.broadcast %8 : vector<1x64xf32> to vector<8x64xf32>
    %16 = arith.addf %14, %15 : vector<8x64xf32>
    %cst_13 = arith.constant 0.000000e+00 : f32
    %17 = vector.broadcast %cst_13 : f32 to vector<8x64xf32>
    %18 = arith.maximumf %16, %17 : vector<8x64xf32>
    %cst_14 = arith.constant dense<0.000000e+00> : vector<8x32xf32>
    %19 = tpu.matmul %18, %6, %cst_14 {dimension_numbers = #tpu.dot_dimension_numbers<[1], [0], [0], [1], [0, 0, 1, 1], [], []>, precision = #tpu.contract_precision<fp32>} : vector<8x64xf32>, vector<64x32xf32>, vector<8x32xf32> -> vector<8x32xf32>
    %20 = vector.broadcast %10 : vector<1x32xf32> to vector<8x32xf32>
    %21 = arith.addf %19, %20 : vector<8x32xf32>
    %22 = arith.negf %21 : vector<8x32xf32>
    %23 = math.exp %22 : vector<8x32xf32>
    %cst_15 = arith.constant 1.000000e+00 : f32
    %24 = vector.broadcast %cst_15 : f32 to vector<8x32xf32>
    %25 = arith.addf %24, %23 : vector<8x32xf32>
    %26 = arith.divf %24, %25 : vector<8x32xf32>
    %27 = vector.extract_strided_slice %4 {offsets = [0, 0], sizes = [32, 96], strides = [1, 1]} : vector<32x128xf32> to vector<32x96xf32>
    %cst_16 = arith.constant dense<0.000000e+00> : vector<8x96xf32>
    %28 = tpu.matmul %1, %27, %cst_16 {dimension_numbers = #tpu.dot_dimension_numbers<[1], [0], [0], [1], [0, 0, 1, 1], [], []>, precision = #tpu.contract_precision<fp32>} : vector<8x32xf32>, vector<32x96xf32>, vector<8x96xf32> -> vector<8x96xf32>
    %29 = vector.broadcast %9 : vector<1x96xf32> to vector<8x96xf32>
    %30 = arith.addf %28, %29 : vector<8x96xf32>
    %31 = vector.extract_strided_slice %30 {offsets = [0, 0], sizes = [8, 32], strides = [1, 1]} : vector<8x96xf32> to vector<8x32xf32>
    %32 = vector.extract_strided_slice %30 {offsets = [0, 32], sizes = [8, 32], strides = [1, 1]} : vector<8x96xf32> to vector<8x32xf32>
    %33 = vector.extract_strided_slice %30 {offsets = [0, 64], sizes = [8, 32], strides = [1, 1]} : vector<8x96xf32> to vector<8x32xf32>
    %34 = vector.extract_strided_slice %4 {offsets = [0, 96], sizes = [32, 32], strides = [1, 1]} : vector<32x128xf32> to vector<32x32xf32>
    %35 = tpu.iota {dimensions = array<i32: 0>} : vector<8x8xi32>
    %36 = tpu.iota {dimensions = array<i32: 1>} : vector<8x8xi32>
    %37 = arith.cmpi sgt, %36, %35 : vector<8x8xi32>
    %cst_17 = arith.constant -1.000000e+10 : f32
    %cst_18 = arith.constant 0.000000e+00 : f32
    %38 = vector.broadcast %cst_17 : f32 to vector<8x8xf32>
    %39 = vector.broadcast %cst_18 : f32 to vector<8x8xf32>
    %40 = arith.select %37, %38, %39 : vector<8x8xi1>, vector<8x8xf32>
    %cst_19 = arith.constant 0.000000e+00 : f32
    %41 = vector.broadcast %cst_19 : f32 to vector<8x32xf32>
    %42 = vector.extract_strided_slice %31 {offsets = [0, 0], sizes = [8, 16], strides = [1, 1]} : vector<8x32xf32> to vector<8x16xf32>
    %43 = vector.extract_strided_slice %32 {offsets = [0, 0], sizes = [8, 16], strides = [1, 1]} : vector<8x32xf32> to vector<8x16xf32>
    "tpu.trace_start"() <{level = 10 : i32, message = "qd,kd->qk"}> : () -> ()
    %cst_20 = arith.constant dense<0.000000e+00> : vector<8x8xf32>
    %44 = tpu.matmul %42, %43, %cst_20 {dimension_numbers = #tpu.dot_dimension_numbers<[1], [1], [0], [0], [0, 0, 1, 0], [], []>, precision = #tpu.contract_precision<fp32>} : vector<8x16xf32>, vector<8x16xf32>, vector<8x8xf32> -> vector<8x8xf32>
    "tpu.trace_stop"() : () -> ()
    %45 = arith.addf %44, %40 : vector<8x8xf32>
    %cst_21 = arith.constant dense<0xFF800000> : vector<8xf32>
    %46 = vector.multi_reduction <maximumf>, %45, %cst_21 [1] : vector<8x8xf32> to vector<8xf32>
    %47 = vector.shape_cast %46 : vector<8xf32> to vector<8x1xf32>
    %48 = vector.broadcast %47 : vector<8x1xf32> to vector<8x8xf32>
    %49 = arith.subf %45, %48 : vector<8x8xf32>
    %50 = math.exp %49 : vector<8x8xf32>
    %cst_22 = arith.constant dense<0.000000e+00> : vector<8xf32>
    %51 = vector.multi_reduction <add>, %50, %cst_22 [1] : vector<8x8xf32> to vector<8xf32>
    %52 = vector.shape_cast %51 : vector<8xf32> to vector<8x1xf32>
    %53 = tpu.reciprocal %52 {approx = true} : vector<8x1xf32> -> vector<8x1xf32>
    %54 = arith.mulf %52, %53 : vector<8x1xf32>
    %cst_23 = arith.constant 2.000000e+00 : f32
    %55 = vector.broadcast %cst_23 : f32 to vector<8x1xf32>
    %56 = arith.subf %55, %54 : vector<8x1xf32>
    %57 = arith.mulf %53, %56 : vector<8x1xf32>
    %58 = vector.broadcast %57 : vector<8x1xf32> to vector<8x8xf32>
    %59 = arith.mulf %50, %58 : vector<8x8xf32>
    %60 = vector.extract_strided_slice %33 {offsets = [0, 0], sizes = [8, 16], strides = [1, 1]} : vector<8x32xf32> to vector<8x16xf32>
    "tpu.trace_start"() <{level = 10 : i32, message = "qk,kd->qd"}> : () -> ()
    %cst_24 = arith.constant dense<0.000000e+00> : vector<8x16xf32>
    %61 = tpu.matmul %59, %60, %cst_24 {dimension_numbers = #tpu.dot_dimension_numbers<[1], [0], [0], [1], [0, 0, 1, 1], [], []>, precision = #tpu.contract_precision<fp32>} : vector<8x8xf32>, vector<8x16xf32>, vector<8x16xf32> -> vector<8x16xf32>
    "tpu.trace_stop"() : () -> ()
    %62 = vector.extract_strided_slice %34 {offsets = [0, 0], sizes = [16, 32], strides = [1, 1]} : vector<32x32xf32> to vector<16x32xf32>
    %cst_25 = arith.constant dense<0.000000e+00> : vector<8x32xf32>
    %63 = tpu.matmul %61, %62, %cst_25 {dimension_numbers = #tpu.dot_dimension_numbers<[1], [0], [0], [1], [0, 0, 1, 1], [], []>, precision = #tpu.contract_precision<fp32>} : vector<8x16xf32>, vector<16x32xf32>, vector<8x32xf32> -> vector<8x32xf32>
    %64 = arith.addf %41, %63 : vector<8x32xf32>
    %65 = vector.extract_strided_slice %31 {offsets = [0, 16], sizes = [8, 16], strides = [1, 1]} : vector<8x32xf32> to vector<8x16xf32>
    %66 = vector.extract_strided_slice %32 {offsets = [0, 16], sizes = [8, 16], strides = [1, 1]} : vector<8x32xf32> to vector<8x16xf32>
    "tpu.trace_start"() <{level = 10 : i32, message = "qd,kd->qk"}> : () -> ()
    %cst_26 = arith.constant dense<0.000000e+00> : vector<8x8xf32>
    %67 = tpu.matmul %65, %66, %cst_26 {dimension_numbers = #tpu.dot_dimension_numbers<[1], [1], [0], [0], [0, 0, 1, 0], [], []>, precision = #tpu.contract_precision<fp32>} : vector<8x16xf32>, vector<8x16xf32>, vector<8x8xf32> -> vector<8x8xf32>
    "tpu.trace_stop"() : () -> ()
    %68 = arith.addf %67, %40 : vector<8x8xf32>
    %cst_27 = arith.constant dense<0xFF800000> : vector<8xf32>
    %69 = vector.multi_reduction <maximumf>, %68, %cst_27 [1] : vector<8x8xf32> to vector<8xf32>
    %70 = vector.shape_cast %69 : vector<8xf32> to vector<8x1xf32>
    %71 = vector.broadcast %70 : vector<8x1xf32> to vector<8x8xf32>
    %72 = arith.subf %68, %71 : vector<8x8xf32>
    %73 = math.exp %72 : vector<8x8xf32>
    %cst_28 = arith.constant dense<0.000000e+00> : vector<8xf32>
    %74 = vector.multi_reduction <add>, %73, %cst_28 [1] : vector<8x8xf32> to vector<8xf32>
    %75 = vector.shape_cast %74 : vector<8xf32> to vector<8x1xf32>
    %76 = tpu.reciprocal %75 {approx = true} : vector<8x1xf32> -> vector<8x1xf32>
    %77 = arith.mulf %75, %76 : vector<8x1xf32>
    %cst_29 = arith.constant 2.000000e+00 : f32
    %78 = vector.broadcast %cst_29 : f32 to vector<8x1xf32>
    %79 = arith.subf %78, %77 : vector<8x1xf32>
    %80 = arith.mulf %76, %79 : vector<8x1xf32>
    %81 = vector.broadcast %80 : vector<8x1xf32> to vector<8x8xf32>
    %82 = arith.mulf %73, %81 : vector<8x8xf32>
    %83 = vector.extract_strided_slice %33 {offsets = [0, 16], sizes = [8, 16], strides = [1, 1]} : vector<8x32xf32> to vector<8x16xf32>
    "tpu.trace_start"() <{level = 10 : i32, message = "qk,kd->qd"}> : () -> ()
    %cst_30 = arith.constant dense<0.000000e+00> : vector<8x16xf32>
    %84 = tpu.matmul %82, %83, %cst_30 {dimension_numbers = #tpu.dot_dimension_numbers<[1], [0], [0], [1], [0, 0, 1, 1], [], []>, precision = #tpu.contract_precision<fp32>} : vector<8x8xf32>, vector<8x16xf32>, vector<8x16xf32> -> vector<8x16xf32>
    "tpu.trace_stop"() : () -> ()
    %85 = vector.extract_strided_slice %34 {offsets = [16, 0], sizes = [16, 32], strides = [1, 1]} : vector<32x32xf32> to vector<16x32xf32>
    %cst_31 = arith.constant dense<0.000000e+00> : vector<8x32xf32>
    %86 = tpu.matmul %84, %85, %cst_31 {dimension_numbers = #tpu.dot_dimension_numbers<[1], [0], [0], [1], [0, 0, 1, 1], [], []>, precision = #tpu.contract_precision<fp32>} : vector<8x16xf32>, vector<16x32xf32>, vector<8x32xf32> -> vector<8x32xf32>
    %87 = arith.addf %64, %86 : vector<8x32xf32>
    %88 = vector.broadcast %11 : vector<1x32xf32> to vector<8x32xf32>
    %89 = arith.addf %87, %88 : vector<8x32xf32>
    %90 = arith.mulf %1, %26 : vector<8x32xf32>
    %cst_32 = arith.constant 1.000000e+00 : f32
    %91 = vector.broadcast %cst_32 : f32 to vector<8x32xf32>
    %92 = arith.subf %91, %26 : vector<8x32xf32>
    %93 = arith.mulf %89, %92 : vector<8x32xf32>
    %94 = arith.addf %90, %93 : vector<8x32xf32>
    %cst_33 = arith.constant dense<0.000000e+00> : vector<8xf32>
    %95 = vector.multi_reduction <add>, %94, %cst_33 [1] : vector<8x32xf32> to vector<8xf32>
    %96 = vector.shape_cast %95 : vector<8xf32> to vector<8x1xf32>
    %cst_34 = arith.constant 3.200000e+01 : f32
    %97 = vector.broadcast %cst_34 : f32 to vector<8x1xf32>
    %98 = arith.divf %96, %97 : vector<8x1xf32>
    %99 = vector.broadcast %98 : vector<8x1xf32> to vector<8x32xf32>
    %100 = arith.subf %94, %99 : vector<8x32xf32>
    %101 = arith.mulf %100, %100 : vector<8x32xf32>
    %cst_35 = arith.constant dense<0.000000e+00> : vector<8xf32>
    %102 = vector.multi_reduction <add>, %101, %cst_35 [1] : vector<8x32xf32> to vector<8xf32>
    %103 = vector.shape_cast %102 : vector<8xf32> to vector<8x1xf32>
    %cst_36 = arith.constant 0.0322580636 : f32
    %104 = vector.broadcast %cst_36 : f32 to vector<8x1xf32>
    %105 = arith.mulf %103, %104 : vector<8x1xf32>
    %106 = math.sqrt %105 : vector<8x1xf32>
    %cst_37 = arith.constant 9.99999997E-7 : f32
    %107 = vector.broadcast %cst_37 : f32 to vector<8x1xf32>
    %108 = arith.addf %106, %107 : vector<8x1xf32>
    %109 = tpu.reciprocal %108 {approx = true} : vector<8x1xf32> -> vector<8x1xf32>
    %110 = arith.mulf %108, %109 : vector<8x1xf32>
    %cst_38 = arith.constant 2.000000e+00 : f32
    %111 = vector.broadcast %cst_38 : f32 to vector<8x1xf32>
    %112 = arith.subf %111, %110 : vector<8x1xf32>
    %113 = arith.mulf %109, %112 : vector<8x1xf32>
    %114 = vector.broadcast %12 : vector<1x32xf32> to vector<8x32xf32>
    %115 = arith.mulf %114, %100 : vector<8x32xf32>
    %116 = vector.broadcast %113 : vector<8x1xf32> to vector<8x32xf32>
    %117 = arith.mulf %115, %116 : vector<8x32xf32>
    %118 = vector.broadcast %13 : vector<1x32xf32> to vector<8x32xf32>
    %119 = arith.addf %117, %118 : vector<8x32xf32>
    %c0_39 = arith.constant 0 : index
    %c0_40 = arith.constant 0 : index
    %120 = vector.load %arg7[%c0_39, %c0_40] : memref<32x128xf32, #tpu.memory_space<vmem>>, vector<32x128xf32>
    %c0_41 = arith.constant 0 : index
    %c0_42 = arith.constant 0 : index
    %121 = vector.load %arg8[%c0_41, %c0_42] : memref<32x64xf32, #tpu.memory_space<vmem>>, vector<32x64xf32>
    %c0_43 = arith.constant 0 : index
    %c0_44 = arith.constant 0 : index
    %122 = vector.load %arg9[%c0_43, %c0_44] : memref<64x32xf32, #tpu.memory_space<vmem>>, vector<64x32xf32>
    %c0_45 = arith.constant 0 : index
    %c0_46 = arith.constant 0 : index
    %123 = vector.load %arg10[%c0_45, %c0_46] : memref<8x128xf32, #tpu.memory_space<vmem>>, vector<8x128xf32>
    %124 = vector.extract_strided_slice %123 {offsets = [0, 0], sizes = [1, 64], strides = [1, 1]} : vector<8x128xf32> to vector<1x64xf32>
    %125 = vector.extract_strided_slice %123 {offsets = [1, 0], sizes = [1, 96], strides = [1, 1]} : vector<8x128xf32> to vector<1x96xf32>
    %126 = vector.extract_strided_slice %123 {offsets = [2, 0], sizes = [1, 32], strides = [1, 1]} : vector<8x128xf32> to vector<1x32xf32>
    %127 = vector.extract_strided_slice %123 {offsets = [3, 0], sizes = [1, 32], strides = [1, 1]} : vector<8x128xf32> to vector<1x32xf32>
    %128 = vector.extract_strided_slice %123 {offsets = [4, 0], sizes = [1, 32], strides = [1, 1]} : vector<8x128xf32> to vector<1x32xf32>
    %129 = vector.extract_strided_slice %123 {offsets = [5, 0], sizes = [1, 32], strides = [1, 1]} : vector<8x128xf32> to vector<1x32xf32>
    %cst_47 = arith.constant dense<0.000000e+00> : vector<8x64xf32>
    %130 = tpu.matmul %119, %121, %cst_47 {dimension_numbers = #tpu.dot_dimension_numbers<[1], [0], [0], [1], [0, 0, 1, 1], [], []>, precision = #tpu.contract_precision<fp32>} : vector<8x32xf32>, vector<32x64xf32>, vector<8x64xf32> -> vector<8x64xf32>
    %131 = vector.broadcast %124 : vector<1x64xf32> to vector<8x64xf32>
    %132 = arith.addf %130, %131 : vector<8x64xf32>
    %cst_48 = arith.constant 0.000000e+00 : f32
    %133 = vector.broadcast %cst_48 : f32 to vector<8x64xf32>
    %134 = arith.maximumf %132, %133 : vector<8x64xf32>
    %cst_49 = arith.constant dense<0.000000e+00> : vector<8x32xf32>
    %135 = tpu.matmul %134, %122, %cst_49 {dimension_numbers = #tpu.dot_dimension_numbers<[1], [0], [0], [1], [0, 0, 1, 1], [], []>, precision = #tpu.contract_precision<fp32>} : vector<8x64xf32>, vector<64x32xf32>, vector<8x32xf32> -> vector<8x32xf32>
    %136 = vector.broadcast %126 : vector<1x32xf32> to vector<8x32xf32>
    %137 = arith.addf %135, %136 : vector<8x32xf32>
    %138 = arith.negf %137 : vector<8x32xf32>
    %139 = math.exp %138 : vector<8x32xf32>
    %cst_50 = arith.constant 1.000000e+00 : f32
    %140 = vector.broadcast %cst_50 : f32 to vector<8x32xf32>
    %141 = arith.addf %140, %139 : vector<8x32xf32>
    %142 = arith.divf %140, %141 : vector<8x32xf32>
    %143 = vector.extract_strided_slice %120 {offsets = [0, 0], sizes = [32, 32], strides = [1, 1]} : vector<32x128xf32> to vector<32x32xf32>
    %cst_51 = arith.constant dense<0.000000e+00> : vector<8x32xf32>
    %144 = tpu.matmul %119, %143, %cst_51 {dimension_numbers = #tpu.dot_dimension_numbers<[1], [0], [0], [1], [0, 0, 1, 1], [], []>, precision = #tpu.contract_precision<fp32>} : vector<8x32xf32>, vector<32x32xf32>, vector<8x32xf32> -> vector<8x32xf32>
    %145 = vector.extract_strided_slice %125 {offsets = [0, 0], sizes = [1, 32], strides = [1, 1]} : vector<1x96xf32> to vector<1x32xf32>
    %146 = vector.broadcast %145 : vector<1x32xf32> to vector<8x32xf32>
    %147 = arith.addf %144, %146 : vector<8x32xf32>
    %148 = vector.extract_strided_slice %120 {offsets = [0, 32], sizes = [32, 64], strides = [1, 1]} : vector<32x128xf32> to vector<32x64xf32>
    %cst_52 = arith.constant dense<0.000000e+00> : vector<8x64xf32>
    %149 = tpu.matmul %3, %148, %cst_52 {dimension_numbers = #tpu.dot_dimension_numbers<[1], [0], [0], [1], [0, 0, 1, 1], [], []>, precision = #tpu.contract_precision<fp32>} : vector<8x32xf32>, vector<32x64xf32>, vector<8x64xf32> -> vector<8x64xf32>
    %150 = vector.extract_strided_slice %125 {offsets = [0, 32], sizes = [1, 64], strides = [1, 1]} : vector<1x96xf32> to vector<1x64xf32>
    %151 = vector.broadcast %150 : vector<1x64xf32> to vector<8x64xf32>
    %152 = arith.addf %149, %151 : vector<8x64xf32>
    %153 = vector.extract_strided_slice %152 {offsets = [0, 0], sizes = [8, 32], strides = [1, 1]} : vector<8x64xf32> to vector<8x32xf32>
    %154 = vector.extract_strided_slice %152 {offsets = [0, 32], sizes = [8, 32], strides = [1, 1]} : vector<8x64xf32> to vector<8x32xf32>
    %155 = vector.extract_strided_slice %120 {offsets = [0, 96], sizes = [32, 32], strides = [1, 1]} : vector<32x128xf32> to vector<32x32xf32>
    %cst_53 = arith.constant 0.000000e+00 : f32
    %156 = vector.broadcast %cst_53 : f32 to vector<8x32xf32>
    %157 = vector.extract_strided_slice %147 {offsets = [0, 0], sizes = [8, 16], strides = [1, 1]} : vector<8x32xf32> to vector<8x16xf32>
    %158 = vector.extract_strided_slice %153 {offsets = [0, 0], sizes = [8, 16], strides = [1, 1]} : vector<8x32xf32> to vector<8x16xf32>
    "tpu.trace_start"() <{level = 10 : i32, message = "qd,kd->qk"}> : () -> ()
    %cst_54 = arith.constant dense<0.000000e+00> : vector<8x8xf32>
    %159 = tpu.matmul %157, %158, %cst_54 {dimension_numbers = #tpu.dot_dimension_numbers<[1], [1], [0], [0], [0, 0, 1, 0], [], []>, precision = #tpu.contract_precision<fp32>} : vector<8x16xf32>, vector<8x16xf32>, vector<8x8xf32> -> vector<8x8xf32>
    "tpu.trace_stop"() : () -> ()
    %cst_55 = arith.constant dense<0xFF800000> : vector<8xf32>
    %160 = vector.multi_reduction <maximumf>, %159, %cst_55 [1] : vector<8x8xf32> to vector<8xf32>
    %161 = vector.shape_cast %160 : vector<8xf32> to vector<8x1xf32>
    %162 = vector.broadcast %161 : vector<8x1xf32> to vector<8x8xf32>
    %163 = arith.subf %159, %162 : vector<8x8xf32>
    %164 = math.exp %163 : vector<8x8xf32>
    %cst_56 = arith.constant dense<0.000000e+00> : vector<8xf32>
    %165 = vector.multi_reduction <add>, %164, %cst_56 [1] : vector<8x8xf32> to vector<8xf32>
    %166 = vector.shape_cast %165 : vector<8xf32> to vector<8x1xf32>
    %167 = tpu.reciprocal %166 {approx = true} : vector<8x1xf32> -> vector<8x1xf32>
    %168 = arith.mulf %166, %167 : vector<8x1xf32>
    %cst_57 = arith.constant 2.000000e+00 : f32
    %169 = vector.broadcast %cst_57 : f32 to vector<8x1xf32>
    %170 = arith.subf %169, %168 : vector<8x1xf32>
    %171 = arith.mulf %167, %170 : vector<8x1xf32>
    %172 = vector.broadcast %171 : vector<8x1xf32> to vector<8x8xf32>
    %173 = arith.mulf %164, %172 : vector<8x8xf32>
    %174 = vector.extract_strided_slice %154 {offsets = [0, 0], sizes = [8, 16], strides = [1, 1]} : vector<8x32xf32> to vector<8x16xf32>
    "tpu.trace_start"() <{level = 10 : i32, message = "qk,kd->qd"}> : () -> ()
    %cst_58 = arith.constant dense<0.000000e+00> : vector<8x16xf32>
    %175 = tpu.matmul %173, %174, %cst_58 {dimension_numbers = #tpu.dot_dimension_numbers<[1], [0], [0], [1], [0, 0, 1, 1], [], []>, precision = #tpu.contract_precision<fp32>} : vector<8x8xf32>, vector<8x16xf32>, vector<8x16xf32> -> vector<8x16xf32>
    "tpu.trace_stop"() : () -> ()
    %176 = vector.extract_strided_slice %155 {offsets = [0, 0], sizes = [16, 32], strides = [1, 1]} : vector<32x32xf32> to vector<16x32xf32>
    %cst_59 = arith.constant dense<0.000000e+00> : vector<8x32xf32>
    %177 = tpu.matmul %175, %176, %cst_59 {dimension_numbers = #tpu.dot_dimension_numbers<[1], [0], [0], [1], [0, 0, 1, 1], [], []>, precision = #tpu.contract_precision<fp32>} : vector<8x16xf32>, vector<16x32xf32>, vector<8x32xf32> -> vector<8x32xf32>
    %178 = arith.addf %156, %177 : vector<8x32xf32>
    %179 = vector.extract_strided_slice %147 {offsets = [0, 16], sizes = [8, 16], strides = [1, 1]} : vector<8x32xf32> to vector<8x16xf32>
    %180 = vector.extract_strided_slice %153 {offsets = [0, 16], sizes = [8, 16], strides = [1, 1]} : vector<8x32xf32> to vector<8x16xf32>
    "tpu.trace_start"() <{level = 10 : i32, message = "qd,kd->qk"}> : () -> ()
    %cst_60 = arith.constant dense<0.000000e+00> : vector<8x8xf32>
    %181 = tpu.matmul %179, %180, %cst_60 {dimension_numbers = #tpu.dot_dimension_numbers<[1], [1], [0], [0], [0, 0, 1, 0], [], []>, precision = #tpu.contract_precision<fp32>} : vector<8x16xf32>, vector<8x16xf32>, vector<8x8xf32> -> vector<8x8xf32>
    "tpu.trace_stop"() : () -> ()
    %cst_61 = arith.constant dense<0xFF800000> : vector<8xf32>
    %182 = vector.multi_reduction <maximumf>, %181, %cst_61 [1] : vector<8x8xf32> to vector<8xf32>
    %183 = vector.shape_cast %182 : vector<8xf32> to vector<8x1xf32>
    %184 = vector.broadcast %183 : vector<8x1xf32> to vector<8x8xf32>
    %185 = arith.subf %181, %184 : vector<8x8xf32>
    %186 = math.exp %185 : vector<8x8xf32>
    %cst_62 = arith.constant dense<0.000000e+00> : vector<8xf32>
    %187 = vector.multi_reduction <add>, %186, %cst_62 [1] : vector<8x8xf32> to vector<8xf32>
    %188 = vector.shape_cast %187 : vector<8xf32> to vector<8x1xf32>
    %189 = tpu.reciprocal %188 {approx = true} : vector<8x1xf32> -> vector<8x1xf32>
    %190 = arith.mulf %188, %189 : vector<8x1xf32>
    %cst_63 = arith.constant 2.000000e+00 : f32
    %191 = vector.broadcast %cst_63 : f32 to vector<8x1xf32>
    %192 = arith.subf %191, %190 : vector<8x1xf32>
    %193 = arith.mulf %189, %192 : vector<8x1xf32>
    %194 = vector.broadcast %193 : vector<8x1xf32> to vector<8x8xf32>
    %195 = arith.mulf %186, %194 : vector<8x8xf32>
    %196 = vector.extract_strided_slice %154 {offsets = [0, 16], sizes = [8, 16], strides = [1, 1]} : vector<8x32xf32> to vector<8x16xf32>
    "tpu.trace_start"() <{level = 10 : i32, message = "qk,kd->qd"}> : () -> ()
    %cst_64 = arith.constant dense<0.000000e+00> : vector<8x16xf32>
    %197 = tpu.matmul %195, %196, %cst_64 {dimension_numbers = #tpu.dot_dimension_numbers<[1], [0], [0], [1], [0, 0, 1, 1], [], []>, precision = #tpu.contract_precision<fp32>} : vector<8x8xf32>, vector<8x16xf32>, vector<8x16xf32> -> vector<8x16xf32>
    "tpu.trace_stop"() : () -> ()
    %198 = vector.extract_strided_slice %155 {offsets = [16, 0], sizes = [16, 32], strides = [1, 1]} : vector<32x32xf32> to vector<16x32xf32>
    %cst_65 = arith.constant dense<0.000000e+00> : vector<8x32xf32>
    %199 = tpu.matmul %197, %198, %cst_65 {dimension_numbers = #tpu.dot_dimension_numbers<[1], [0], [0], [1], [0, 0, 1, 1], [], []>, precision = #tpu.contract_precision<fp32>} : vector<8x16xf32>, vector<16x32xf32>, vector<8x32xf32> -> vector<8x32xf32>
    %200 = arith.addf %178, %199 : vector<8x32xf32>
    %201 = vector.broadcast %127 : vector<1x32xf32> to vector<8x32xf32>
    %202 = arith.addf %200, %201 : vector<8x32xf32>
    %203 = arith.mulf %119, %142 : vector<8x32xf32>
    %cst_66 = arith.constant 1.000000e+00 : f32
    %204 = vector.broadcast %cst_66 : f32 to vector<8x32xf32>
    %205 = arith.subf %204, %142 : vector<8x32xf32>
    %206 = arith.mulf %202, %205 : vector<8x32xf32>
    %207 = arith.addf %203, %206 : vector<8x32xf32>
    %cst_67 = arith.constant dense<0.000000e+00> : vector<8xf32>
    %208 = vector.multi_reduction <add>, %207, %cst_67 [1] : vector<8x32xf32> to vector<8xf32>
    %209 = vector.shape_cast %208 : vector<8xf32> to vector<8x1xf32>
    %cst_68 = arith.constant 3.200000e+01 : f32
    %210 = vector.broadcast %cst_68 : f32 to vector<8x1xf32>
    %211 = arith.divf %209, %210 : vector<8x1xf32>
    %212 = vector.broadcast %211 : vector<8x1xf32> to vector<8x32xf32>
    %213 = arith.subf %207, %212 : vector<8x32xf32>
    %214 = arith.mulf %213, %213 : vector<8x32xf32>
    %cst_69 = arith.constant dense<0.000000e+00> : vector<8xf32>
    %215 = vector.multi_reduction <add>, %214, %cst_69 [1] : vector<8x32xf32> to vector<8xf32>
    %216 = vector.shape_cast %215 : vector<8xf32> to vector<8x1xf32>
    %cst_70 = arith.constant 0.0322580636 : f32
    %217 = vector.broadcast %cst_70 : f32 to vector<8x1xf32>
    %218 = arith.mulf %216, %217 : vector<8x1xf32>
    %219 = math.sqrt %218 : vector<8x1xf32>
    %cst_71 = arith.constant 9.99999997E-7 : f32
    %220 = vector.broadcast %cst_71 : f32 to vector<8x1xf32>
    %221 = arith.addf %219, %220 : vector<8x1xf32>
    %222 = tpu.reciprocal %221 {approx = true} : vector<8x1xf32> -> vector<8x1xf32>
    %223 = arith.mulf %221, %222 : vector<8x1xf32>
    %cst_72 = arith.constant 2.000000e+00 : f32
    %224 = vector.broadcast %cst_72 : f32 to vector<8x1xf32>
    %225 = arith.subf %224, %223 : vector<8x1xf32>
    %226 = arith.mulf %222, %225 : vector<8x1xf32>
    %227 = vector.broadcast %128 : vector<1x32xf32> to vector<8x32xf32>
    %228 = arith.mulf %227, %213 : vector<8x32xf32>
    %229 = vector.broadcast %226 : vector<8x1xf32> to vector<8x32xf32>
    %230 = arith.mulf %228, %229 : vector<8x32xf32>
    %231 = vector.broadcast %129 : vector<1x32xf32> to vector<8x32xf32>
    %232 = arith.addf %230, %231 : vector<8x32xf32>
    %c0_73 = arith.constant 0 : index
    %c0_74 = arith.constant 0 : index
    %233 = vector.load %arg11[%c0_73, %c0_74] : memref<32x128xf32, #tpu.memory_space<vmem>>, vector<32x128xf32>
    %c0_75 = arith.constant 0 : index
    %c0_76 = arith.constant 0 : index
    %234 = vector.load %arg12[%c0_75, %c0_76] : memref<128x64xf32, #tpu.memory_space<vmem>>, vector<128x64xf32>
    %c0_77 = arith.constant 0 : index
    %c0_78 = arith.constant 0 : index
    %235 = vector.load %arg13[%c0_77, %c0_78] : memref<8x128xf32, #tpu.memory_space<vmem>>, vector<8x128xf32>
    %236 = vector.extract_strided_slice %235 {offsets = [0, 0], sizes = [1, 128], strides = [1, 1]} : vector<8x128xf32> to vector<1x128xf32>
    %237 = vector.extract_strided_slice %235 {offsets = [1, 0], sizes = [1, 64], strides = [1, 1]} : vector<8x128xf32> to vector<1x64xf32>
    %238 = vector.extract_strided_slice %235 {offsets = [2, 0], sizes = [1, 32], strides = [1, 1]} : vector<8x128xf32> to vector<1x32xf32>
    %239 = vector.extract_strided_slice %235 {offsets = [3, 0], sizes = [1, 32], strides = [1, 1]} : vector<8x128xf32> to vector<1x32xf32>
    %cst_79 = arith.constant dense<0.000000e+00> : vector<8x128xf32>
    %240 = tpu.matmul %232, %233, %cst_79 {dimension_numbers = #tpu.dot_dimension_numbers<[1], [0], [0], [1], [0, 0, 1, 1], [], []>, precision = #tpu.contract_precision<fp32>} : vector<8x32xf32>, vector<32x128xf32>, vector<8x128xf32> -> vector<8x128xf32>
    %241 = vector.broadcast %236 : vector<1x128xf32> to vector<8x128xf32>
    %242 = arith.addf %240, %241 : vector<8x128xf32>
    %cst_80 = arith.constant 0.000000e+00 : f32
    %243 = vector.broadcast %cst_80 : f32 to vector<8x128xf32>
    %244 = arith.maximumf %242, %243 : vector<8x128xf32>
    %cst_81 = arith.constant dense<0.000000e+00> : vector<8x64xf32>
    %245 = tpu.matmul %244, %234, %cst_81 {dimension_numbers = #tpu.dot_dimension_numbers<[1], [0], [0], [1], [0, 0, 1, 1], [], []>, precision = #tpu.contract_precision<fp32>} : vector<8x128xf32>, vector<128x64xf32>, vector<8x64xf32> -> vector<8x64xf32>
    %246 = vector.broadcast %237 : vector<1x64xf32> to vector<8x64xf32>
    %247 = arith.addf %245, %246 : vector<8x64xf32>
    %248 = vector.extract_strided_slice %247 {offsets = [0, 0], sizes = [8, 32], strides = [1, 1]} : vector<8x64xf32> to vector<8x32xf32>
    %249 = arith.negf %248 : vector<8x32xf32>
    %250 = math.exp %249 : vector<8x32xf32>
    %cst_82 = arith.constant 1.000000e+00 : f32
    %251 = vector.broadcast %cst_82 : f32 to vector<8x32xf32>
    %252 = arith.addf %251, %250 : vector<8x32xf32>
    %253 = arith.divf %251, %252 : vector<8x32xf32>
    %254 = vector.extract_strided_slice %247 {offsets = [0, 32], sizes = [8, 32], strides = [1, 1]} : vector<8x64xf32> to vector<8x32xf32>
    %255 = arith.mulf %232, %253 : vector<8x32xf32>
    %cst_83 = arith.constant 1.000000e+00 : f32
    %256 = vector.broadcast %cst_83 : f32 to vector<8x32xf32>
    %257 = arith.subf %256, %253 : vector<8x32xf32>
    %258 = arith.mulf %254, %257 : vector<8x32xf32>
    %259 = arith.addf %255, %258 : vector<8x32xf32>
    %cst_84 = arith.constant dense<0.000000e+00> : vector<8xf32>
    %260 = vector.multi_reduction <add>, %259, %cst_84 [1] : vector<8x32xf32> to vector<8xf32>
    %261 = vector.shape_cast %260 : vector<8xf32> to vector<8x1xf32>
    %cst_85 = arith.constant 3.200000e+01 : f32
    %262 = vector.broadcast %cst_85 : f32 to vector<8x1xf32>
    %263 = arith.divf %261, %262 : vector<8x1xf32>
    %264 = vector.broadcast %263 : vector<8x1xf32> to vector<8x32xf32>
    %265 = arith.subf %259, %264 : vector<8x32xf32>
    %266 = arith.mulf %265, %265 : vector<8x32xf32>
    %cst_86 = arith.constant dense<0.000000e+00> : vector<8xf32>
    %267 = vector.multi_reduction <add>, %266, %cst_86 [1] : vector<8x32xf32> to vector<8xf32>
    %268 = vector.shape_cast %267 : vector<8xf32> to vector<8x1xf32>
    %cst_87 = arith.constant 0.0322580636 : f32
    %269 = vector.broadcast %cst_87 : f32 to vector<8x1xf32>
    %270 = arith.mulf %268, %269 : vector<8x1xf32>
    %271 = math.sqrt %270 : vector<8x1xf32>
    %cst_88 = arith.constant 9.99999997E-7 : f32
    %272 = vector.broadcast %cst_88 : f32 to vector<8x1xf32>
    %273 = arith.addf %271, %272 : vector<8x1xf32>
    %274 = tpu.reciprocal %273 {approx = true} : vector<8x1xf32> -> vector<8x1xf32>
    %275 = arith.mulf %273, %274 : vector<8x1xf32>
    %cst_89 = arith.constant 2.000000e+00 : f32
    %276 = vector.broadcast %cst_89 : f32 to vector<8x1xf32>
    %277 = arith.subf %276, %275 : vector<8x1xf32>
    %278 = arith.mulf %274, %277 : vector<8x1xf32>
    %279 = vector.broadcast %238 : vector<1x32xf32> to vector<8x32xf32>
    %280 = arith.mulf %279, %265 : vector<8x32xf32>
    %281 = vector.broadcast %278 : vector<8x1xf32> to vector<8x32xf32>
    %282 = arith.mulf %280, %281 : vector<8x32xf32>
    %283 = vector.broadcast %239 : vector<1x32xf32> to vector<8x32xf32>
    %284 = arith.addf %282, %283 : vector<8x32xf32>
    %285 = tpu.iota {dimensions = array<i32: 0>} : vector<2x8xi32>
    %286 = tpu.iota {dimensions = array<i32: 1>} : vector<2x8xi32>
    %287 = tpu.iota {dimensions = array<i32: 0>} : vector<32x128xi32>
    %288 = tpu.iota {dimensions = array<i32: 1>} : vector<32x128xi32>
    %cst_90 = arith.constant 0.000000e+00 : f32
    %289 = vector.broadcast %cst_90 : f32 to vector<2x128xf32>
    %c4_i32 = arith.constant 4 : i32
    %290 = vector.broadcast %c4_i32 : i32 to vector<2x8xi32>
    %291 = arith.muli %290, %285 : vector<2x8xi32>
    %c0_i32 = arith.constant 0 : i32
    %292 = vector.broadcast %c0_i32 : i32 to vector<2x8xi32>
    %293 = arith.addi %291, %292 : vector<2x8xi32>
    %294 = arith.cmpi eq, %286, %293 : vector<2x8xi32>
    %295 = arith.extui %294 : vector<2x8xi1> to vector<2x8xi32>
    %296 = arith.sitofp %295 : vector<2x8xi32> to vector<2x8xf32>
    %c0_i32_91 = arith.constant 0 : i32
    %297 = vector.broadcast %c0_i32_91 : i32 to vector<32x128xi32>
    %298 = arith.addi %297, %287 : vector<32x128xi32>
    %299 = arith.cmpi eq, %288, %298 : vector<32x128xi32>
    %300 = arith.extui %299 : vector<32x128xi1> to vector<32x128xi32>
    %301 = arith.sitofp %300 : vector<32x128xi32> to vector<32x128xf32>
    %cst_92 = arith.constant dense<0.000000e+00> : vector<2x32xf32>
    %302 = tpu.matmul %296, %284, %cst_92 {dimension_numbers = #tpu.dot_dimension_numbers<[1], [0], [0], [1], [0, 0, 1, 1], [], []>, precision = #tpu.contract_precision<fp32>} : vector<2x8xf32>, vector<8x32xf32>, vector<2x32xf32> -> vector<2x32xf32>
    %cst_93 = arith.constant dense<0.000000e+00> : vector<2x128xf32>
    %303 = tpu.matmul %302, %301, %cst_93 {dimension_numbers = #tpu.dot_dimension_numbers<[1], [0], [0], [1], [0, 0, 1, 1], [], []>, precision = #tpu.contract_precision<fp32>} : vector<2x32xf32>, vector<32x128xf32>, vector<2x128xf32> -> vector<2x128xf32>
    %304 = arith.addf %289, %303 : vector<2x128xf32>
    %c4_i32_94 = arith.constant 4 : i32
    %305 = vector.broadcast %c4_i32_94 : i32 to vector<2x8xi32>
    %306 = arith.muli %305, %285 : vector<2x8xi32>
    %c1_i32 = arith.constant 1 : i32
    %307 = vector.broadcast %c1_i32 : i32 to vector<2x8xi32>
    %308 = arith.addi %306, %307 : vector<2x8xi32>
    %309 = arith.cmpi eq, %286, %308 : vector<2x8xi32>
    %310 = arith.extui %309 : vector<2x8xi1> to vector<2x8xi32>
    %311 = arith.sitofp %310 : vector<2x8xi32> to vector<2x8xf32>
    %c32_i32 = arith.constant 32 : i32
    %312 = vector.broadcast %c32_i32 : i32 to vector<32x128xi32>
    %313 = arith.addi %312, %287 : vector<32x128xi32>
    %314 = arith.cmpi eq, %288, %313 : vector<32x128xi32>
    %315 = arith.extui %314 : vector<32x128xi1> to vector<32x128xi32>
    %316 = arith.sitofp %315 : vector<32x128xi32> to vector<32x128xf32>
    %cst_95 = arith.constant dense<0.000000e+00> : vector<2x32xf32>
    %317 = tpu.matmul %311, %284, %cst_95 {dimension_numbers = #tpu.dot_dimension_numbers<[1], [0], [0], [1], [0, 0, 1, 1], [], []>, precision = #tpu.contract_precision<fp32>} : vector<2x8xf32>, vector<8x32xf32>, vector<2x32xf32> -> vector<2x32xf32>
    %cst_96 = arith.constant dense<0.000000e+00> : vector<2x128xf32>
    %318 = tpu.matmul %317, %316, %cst_96 {dimension_numbers = #tpu.dot_dimension_numbers<[1], [0], [0], [1], [0, 0, 1, 1], [], []>, precision = #tpu.contract_precision<fp32>} : vector<2x32xf32>, vector<32x128xf32>, vector<2x128xf32> -> vector<2x128xf32>
    %319 = arith.addf %304, %318 : vector<2x128xf32>
    %c4_i32_97 = arith.constant 4 : i32
    %320 = vector.broadcast %c4_i32_97 : i32 to vector<2x8xi32>
    %321 = arith.muli %320, %285 : vector<2x8xi32>
    %c2_i32 = arith.constant 2 : i32
    %322 = vector.broadcast %c2_i32 : i32 to vector<2x8xi32>
    %323 = arith.addi %321, %322 : vector<2x8xi32>
    %324 = arith.cmpi eq, %286, %323 : vector<2x8xi32>
    %325 = arith.extui %324 : vector<2x8xi1> to vector<2x8xi32>
    %326 = arith.sitofp %325 : vector<2x8xi32> to vector<2x8xf32>
    %c64_i32 = arith.constant 64 : i32
    %327 = vector.broadcast %c64_i32 : i32 to vector<32x128xi32>
    %328 = arith.addi %327, %287 : vector<32x128xi32>
    %329 = arith.cmpi eq, %288, %328 : vector<32x128xi32>
    %330 = arith.extui %329 : vector<32x128xi1> to vector<32x128xi32>
    %331 = arith.sitofp %330 : vector<32x128xi32> to vector<32x128xf32>
    %cst_98 = arith.constant dense<0.000000e+00> : vector<2x32xf32>
    %332 = tpu.matmul %326, %284, %cst_98 {dimension_numbers = #tpu.dot_dimension_numbers<[1], [0], [0], [1], [0, 0, 1, 1], [], []>, precision = #tpu.contract_precision<fp32>} : vector<2x8xf32>, vector<8x32xf32>, vector<2x32xf32> -> vector<2x32xf32>
    %cst_99 = arith.constant dense<0.000000e+00> : vector<2x128xf32>
    %333 = tpu.matmul %332, %331, %cst_99 {dimension_numbers = #tpu.dot_dimension_numbers<[1], [0], [0], [1], [0, 0, 1, 1], [], []>, precision = #tpu.contract_precision<fp32>} : vector<2x32xf32>, vector<32x128xf32>, vector<2x128xf32> -> vector<2x128xf32>
    %334 = arith.addf %319, %333 : vector<2x128xf32>
    %c4_i32_100 = arith.constant 4 : i32
    %335 = vector.broadcast %c4_i32_100 : i32 to vector<2x8xi32>
    %336 = arith.muli %335, %285 : vector<2x8xi32>
    %c3_i32 = arith.constant 3 : i32
    %337 = vector.broadcast %c3_i32 : i32 to vector<2x8xi32>
    %338 = arith.addi %336, %337 : vector<2x8xi32>
    %339 = arith.cmpi eq, %286, %338 : vector<2x8xi32>
    %340 = arith.extui %339 : vector<2x8xi1> to vector<2x8xi32>
    %341 = arith.sitofp %340 : vector<2x8xi32> to vector<2x8xf32>
    %c96_i32 = arith.constant 96 : i32
    %342 = vector.broadcast %c96_i32 : i32 to vector<32x128xi32>
    %343 = arith.addi %342, %287 : vector<32x128xi32>
    %344 = arith.cmpi eq, %288, %343 : vector<32x128xi32>
    %345 = arith.extui %344 : vector<32x128xi1> to vector<32x128xi32>
    %346 = arith.sitofp %345 : vector<32x128xi32> to vector<32x128xf32>
    %cst_101 = arith.constant dense<0.000000e+00> : vector<2x32xf32>
    %347 = tpu.matmul %341, %284, %cst_101 {dimension_numbers = #tpu.dot_dimension_numbers<[1], [0], [0], [1], [0, 0, 1, 1], [], []>, precision = #tpu.contract_precision<fp32>} : vector<2x8xf32>, vector<8x32xf32>, vector<2x32xf32> -> vector<2x32xf32>
    %cst_102 = arith.constant dense<0.000000e+00> : vector<2x128xf32>
    %348 = tpu.matmul %347, %346, %cst_102 {dimension_numbers = #tpu.dot_dimension_numbers<[1], [0], [0], [1], [0, 0, 1, 1], [], []>, precision = #tpu.contract_precision<fp32>} : vector<2x32xf32>, vector<32x128xf32>, vector<2x128xf32> -> vector<2x128xf32>
    %349 = arith.addf %334, %348 : vector<2x128xf32>
    %c0_103 = arith.constant 0 : index
    %c0_104 = arith.constant 0 : index
    %c0_105 = arith.constant 0 : index
    %350 = vector.load %arg14[%c0_103, %c0_104, %c0_105] : memref<1x2x128xf32, #tpu.memory_space<vmem>>, vector<1x2x128xf32>
    %351 = vector.shape_cast %350 : vector<1x2x128xf32> to vector<2x128xf32>
    %352 = vector.shape_cast %349 : vector<2x128xf32> to vector<1x2x128xf32>
    tpu.vector_store %arg14[%c0_103, %c0_104, %c0_105], %352 {strides = array<i32>} : memref<1x2x128xf32, #tpu.memory_space<vmem>>, vector<1x2x128xf32>,
    return
  }
  func.func @transform_0(%arg0: i32) -> (i32, i32, i32) {
    %c0_i32 = arith.constant 0 : i32
    %c0_i32_0 = arith.constant 0 : i32
    %c0_i32_1 = arith.constant 0 : i32
    return %arg0, %c0_i32, %c0_i32_0 : i32, i32, i32
  }
  func.func @transform_1(%arg0: i32) -> (i32, i32, i32) {
    %c0_i32 = arith.constant 0 : i32
    %c0_i32_0 = arith.constant 0 : i32
    %c0_i32_1 = arith.constant 0 : i32
    return %arg0, %c0_i32, %c0_i32_0 : i32, i32, i32
  }
  func.func @transform_2(%arg0: i32) -> (i32, i32) {
    %c0_i32 = arith.constant 0 : i32
    %c0_i32_0 = arith.constant 0 : i32
    %c0_i32_1 = arith.constant 0 : i32
    return %c0_i32, %c0_i32_0 : i32, i32
  }
  func.func @transform_3(%arg0: i32) -> (i32, i32) {
    %c0_i32 = arith.constant 0 : i32
    %c0_i32_0 = arith.constant 0 : i32
    %c0_i32_1 = arith.constant 0 : i32
    return %c0_i32, %c0_i32_0 : i32, i32
  }
  func.func @transform_4(%arg0: i32) -> (i32, i32) {
    %c0_i32 = arith.constant 0 : i32
    %c0_i32_0 = arith.constant 0 : i32
    %c0_i32_1 = arith.constant 0 : i32
    return %c0_i32, %c0_i32_0 : i32, i32
  }
  func.func @transform_5(%arg0: i32) -> (i32, i32) {
    %c0_i32 = arith.constant 0 : i32
    %c0_i32_0 = arith.constant 0 : i32
    %c0_i32_1 = arith.constant 0 : i32
    return %c0_i32, %c0_i32_0 : i32, i32
  }
  func.func @transform_6(%arg0: i32) -> (i32, i32) {
    %c0_i32 = arith.constant 0 : i32
    %c0_i32_0 = arith.constant 0 : i32
    %c0_i32_1 = arith.constant 0 : i32
    return %c0_i32, %c0_i32_0 : i32, i32
  }
  func.func @transform_7(%arg0: i32) -> (i32, i32) {
    %c0_i32 = arith.constant 0 : i32
    %c0_i32_0 = arith.constant 0 : i32
    %c0_i32_1 = arith.constant 0 : i32
    return %c0_i32, %c0_i32_0 : i32, i32
  }
  func.func @transform_8(%arg0: i32) -> (i32, i32) {
    %c0_i32 = arith.constant 0 : i32
    %c0_i32_0 = arith.constant 0 : i32
    %c0_i32_1 = arith.constant 0 : i32
    return %c0_i32, %c0_i32_0 : i32, i32
  }
  func.func @transform_9(%arg0: i32) -> (i32, i32) {
    %c0_i32 = arith.constant 0 : i32
    %c0_i32_0 = arith.constant 0 : i32
    %c0_i32_1 = arith.constant 0 : i32
    return %c0_i32, %c0_i32_0 : i32, i32
  }
  func.func @transform_10(%arg0: i32) -> (i32, i32) {
    %c0_i32 = arith.constant 0 : i32
    %c0_i32_0 = arith.constant 0 : i32
    %c0_i32_1 = arith.constant 0 : i32
    return %c0_i32, %c0_i32_0 : i32, i32
  }
  func.func @transform_11(%arg0: i32) -> (i32, i32) {
    %c0_i32 = arith.constant 0 : i32
    %c0_i32_0 = arith.constant 0 : i32
    %c0_i32_1 = arith.constant 0 : i32
    return %c0_i32, %c0_i32_0 : i32, i32
  }
  func.func @transform_12(%arg0: i32) -> (i32, i32) {
    %c0_i32 = arith.constant 0 : i32
    %c0_i32_0 = arith.constant 0 : i32
    %c0_i32_1 = arith.constant 0 : i32
    return %c0_i32, %c0_i32_0 : i32, i32
  }
  func.func @transform_13(%arg0: i32) -> (i32, i32, i32) {
    %c0_i32 = arith.constant 0 : i32
    %c0_i32_0 = arith.constant 0 : i32
    %c0_i32_1 = arith.constant 0 : i32
    return %arg0, %c0_i32, %c0_i32_0 : i32, i32, i32
  }
}

</mosaic_0001>

<bundles_post_ra>
// kernel: decoder_layer.1
= control target key start
LH: loop header
LB: loop body
LE: loop exit
PB: predicated region body
PF: predicated region fallthrough
CT: control target
= control target key end

     0   :  { %s18395_s25 = smov 0   ;;  %s20321_s0 = inlined_call_operand.vmem [shape: f32[2,8,32], index: 0, kind: input, shape index: {}]   ;;  %s20322_s1 = inlined_call_operand.vmem [shape: f32[2,8,32], index: 1, kind: input, shape index: {}]   ;;  %s20323_s2 = inlined_call_operand.vmem [shape: f32[32,128], index: 2, kind: input, shape index: {}]   ;;  %s20324_s3 = inlined_call_operand.vmem [shape: f32[32,64], index: 3, kind: input, shape index: {}]   ;;  %s20325_s4 = inlined_call_operand.vmem [shape: f32[64,32], index: 4, kind: input, shape index: {}]   ;;  %s20326_s5 = inlined_call_operand.vmem [shape: f32[8,128], index: 5, kind: input, shape index: {}]   ;;  %s20327_s6 = inlined_call_operand.vmem [shape: f32[32,128], index: 6, kind: input, shape index: {}]   ;;  %s20328_s7 = inlined_call_operand.vmem [shape: f32[32,64], index: 7, kind: input, shape index: {}]   ;;  %s20329_s8 = inlined_call_operand.vmem [shape: f32[64,32], index: 8, kind: input, shape index: {}]   ;;  %s20330_s9 = inlined_call_operand.vmem [shape: f32[8,128], index: 9, kind: input, shape index: {}]   ;;  %s20331_s10 = inlined_call_operand.vmem [shape: f32[32,128], index: 10, kind: input, shape index: {}]   ;;  %s20332_s11 = inlined_call_operand.vmem [shape: f32[128,64], index: 11, kind: input, shape index: {}]   ;;  %s20333_s12 = inlined_call_operand.vmem [shape: f32[8,128], index: 12, kind: input, shape index: {}]   ;;  %s20334_s13 = inlined_call_operand.vmem [shape: f32[2,2,128], index: 13, kind: output, shape index: {}]  }
   0x1 LB: > { %s14814_s26 = sadd.s32 4294967295, %s18313_s25   ;;  %p14818_p0 = scmp.ge.s32.totalorder %s18313_s25, 1  ;;  %s18313_s25 = sphi %s18395_s25, %s23_s25  }
   0x2   : > { %p395_p1 = scmp.lt.s32.totalorder %s18313_s25, 3 }
   0x4   : > { %p396_p2 = pnand %p14818_p0, %p395_p1 }
   0x5   : > { %v18406_v0 = vld [vmem:[%s20323_s2] sm:$0xff] (!%p396_p2)  ;;  %v18411_v1 = vld [vmem:[%s20323_s2 + $0x8] sm:$0xff] (!%p396_p2)  ;;  %v18416_v2 = vld [vmem:[%s20323_s2 + $0x10] sm:$0xff] (!%p396_p2)  ;;  %v18315_v3 = vmov (!%p396_p2), 0.0|0.0   ;;  %vm18316_vm0 = vmmov (!%p396_p2), 0   ;;  %v18317_v8 = vmov (!%p396_p2), 0.0   ;;  %v472_v41 = vlaneseq (!%p396_p2) }
   0x6   : > { %399 = sbr.rel (%p396_p2) target bundleno = 5982 (0x175e), region = 72  ;;  %17367 = vmatprep.subr.bf16.mxu0 (!%p396_p2), %v18315_v3  ;;  %v1522_v4 = vand.u32 (!%p396_p2), 4294901760, %v18406_v0  ;;  %v1525_v5 = vand.u32 (!%p396_p2), 4294901760, %v18411_v1  ;;  %v18424_v6 = vld [vmem:[%s20323_s2 + $0x18] sm:$0xff] (!%p396_p2)  ;;  %v1528_v7 = vand.u32 (!%p396_p2), 4294901760, %v18416_v2  ;;  %15821 = vmatprep.mubr.msk.f32.mxu0 (!%p396_p2), %vm18316_vm0, %v18317_v8  ;;  %p441_p3 = scmp.lt.s32.totalorder (!%p396_p2), %s14814_s26, 1 }
   0x7   : > { %v1531_v9 = vand.u32 (!%p396_p2), 4294901760, %v18424_v6  ;;  %17259 = vmatprep.subr.bf16.mxu1 (!%p396_p2), %v18315_v3  ;;  %15641 = vmatprep.mubr.msk.f32.mxu1 (!%p396_p2), %vm18316_vm0, %v18317_v8  ;;  %vm476_vm1 = vcmask (!%p396_p2), 261120   ;;  %v18497_v42 = vshrl.u32 (!%p396_p2), %v472_v41, 7  ;;  %v18505_v44 = vld [vmem:[%s20326_s5] sm:$0xff] (!%p396_p2)  ;;  %s18318_s24 = smov (!%p396_p2), 80   ;;  %s18319_s27 = smov (!%p396_p2), 96  }
   0x8   : > { %v18433_v10 = vpack.c.bf16 (!%p396_p2), %v1525_v5, %v1522_v4  ;;  %v1602_v11 = vsub.f32 (!%p396_p2), %v18406_v0, %v1522_v4  ;;  %v1609_v12 = vsub.f32 (!%p396_p2), %v18411_v1, %v1525_v5  ;;  %v1616_v13 = vsub.f32 (!%p396_p2), %v18416_v2, %v1528_v7  ;;  %s18320_s28 = smov (!%p396_p2), 112   ;;  %v459_v49 = vld [vmem:[%s20324_s3] sm:$0xff] (!%p396_p2)  ;;  %v460_v50 = vld [vmem:[%s20324_s3 + $0x8] sm:$0xff] (!%p396_p2)  ;;  %v461_v56 = vld [vmem:[%s20324_s3 + $0x10] sm:$0xff] (!%p396_p2)  ;;  %s18321_s16 = smov (!%p396_p2), 64  }
   0x9   : > { %v1623_v14 = vsub.f32 (!%p396_p2), %v18424_v6, %v1531_v9  ;;  %v17371_v15 = vpack.c.bf16 (!%p396_p2), %v1531_v9, %v1528_v7  ;;  %v18500_v43 = vsub.s32 (!%p396_p2), 1, %v18497_v42  ;;  %v481_v51 = vand.u32 (!%p396_p2), 4294901760, %v459_v49  ;;  %v462_v57 = vld [vmem:[%s20324_s3 + $0x18] sm:$0xff] (!%p396_p2)  ;;  %s18322_s17 = smov (!%p396_p2), 48   ;;  %s18323_s19 = smov (!%p396_p2), 32  }
   0xa   : > { %17369 = vmatpush3.bf16.msra.mxu0 (!%p396_p2), %v18433_v10  ;;  %v1603_v16 = vand.u32 (!%p396_p2), 4294901760, %v1602_v11  ;;  %v1610_v17 = vand.u32 (!%p396_p2), 4294901760, %v1609_v12  ;;  %v1617_v19 = vand.u32 (!%p396_p2), 4294901760, %v1616_v13  ;;  %v17380_v37 = vpack.c.bf16 (!%p396_p2), %v1609_v12, %v1602_v11 }
   0xb   : > { %17370 = vmatprep.subr.bf16.mxu0 (!%p396_p2), %v18315_v3  ;;  %v1624_v23 = vand.u32 (!%p396_p2), 4294901760, %v1623_v14  ;;  %v17383_v38 = vpack.c.bf16 (!%p396_p2), %v1623_v14, %v1616_v13  ;;  %v1520_v45 = vrot.slane (!%p396_p2), %v18505_v44, %v18500_v43  ;;  %v484_v52 = vand.u32 (!%p396_p2), 4294901760, %v460_v50 }
   0xc   : > { %v1604_v21 = vsub.f32 (!%p396_p2), %v1602_v11, %v1603_v16  ;;  %v1611_v22 = vsub.f32 (!%p396_p2), %v1609_v12, %v1610_v17  ;;  %v1618_v28 = vsub.f32 (!%p396_p2), %v1616_v13, %v1617_v19  ;;  %v17392_v39 = vpack.c.bf16 (!%p396_p2), %v1610_v17, %v1603_v16 }
   0xd   : > { %s20376_s26 = smov (!%p441_p3, %s14814_s26), 1  ;;  %v1625_v29 = vsub.f32 %v1623_v14, %v1624_v23  ;;  %v17395_v40 = vpack.c.bf16 %v1624_v23, %v1617_v19  ;;  %v17260_v53 = vpack.c.bf16 %v484_v52, %v481_v51  ;;  %v561_v54 = vsub.f32 %v459_v49, %v481_v51 }
   0xe   : > { %s14819_s18 = sshll.u32 %s20376_s26, 3  ;;  %17372 = vmatpush3.bf16.msra.mxu0 %v17371_v15  ;;  %v1605_v26 = vand.u32 4294901760, %v1604_v21  ;;  %v1612_v27 = vand.u32 4294901760, %v1611_v22  ;;  %v1619_v33 = vand.u32 4294901760, %v1618_v28  ;;  %v568_v55 = vsub.f32 %v460_v50, %v484_v52 }
   0xf   : > { %s18449_s21 = scalar_lea.vmem %s20321_s0, %s14819_s18  ;;  %17373 = vmatprep.subr.bf16.mxu0 %v18315_v3  ;;  %v1626_v34 = vand.u32 4294901760, %v1625_v29  ;;  %17261 = vmatpush3.bf16.msra.mxu1 %v17260_v53  ;;  %v487_v58 = vand.u32 4294901760, %v461_v56  ;;  %v490_v59 = vand.u32 4294901760, %v462_v57  ;;  %v562_v60 = vand.u32 4294901760, %v561_v54  ;;  %s448_s23 = scalar_lea.vmem %s20322_s1, %s14819_s18 }
  0x10   : > { %v453_v18 = vld [vmem:[%s18449_s21] sm:$0xff]  ;;  %v17374_v32 = vpack.c.bf16 %v1612_v27, %v1605_v26  ;;  %v569_v61 = vand.u32 4294901760, %v568_v55  ;;  %17262 = vmatprep.subr.bf16.mxu1 %v18315_v3  ;;  %v17272_v19 = vpack.c.bf16 %v568_v55, %v561_v54  ;;  %vm2015_vm2 = vcmask 130048  }
  0x11   : > { %v478_v20 = vsel %vm476_vm1, %v453_v18, 0  ;;  %v17377_v36 = vpack.c.bf16 %v1626_v34, %v1619_v33  ;;  %v17263_v62 = vpack.c.bf16 %v490_v59, %v487_v58  ;;  %v575_v63 = vsub.f32 %v461_v56, %v487_v58  ;;  %v464_v56 = vld [vmem:[%s20325_s4 + $0x8] sm:$0xff] }
  0x12   : > { %v18453_v24 = vand.u32 4294901760, %v478_v20  ;;  %v582_v4 = vsub.f32 %v462_v57, %v490_v59  ;;  %v563_v5 = vsub.f32 %v561_v54, %v562_v60  ;;  %v570_v7 = vsub.f32 %v568_v55, %v569_v61  ;;  %v463_v55 = vld [vmem:[%s20325_s4] sm:$0xff]  ;;  %v465_v57 = vld [vmem:[%s20325_s4 + $0x10] sm:$0xff] }
  0x13   : > { %17264 = vmatpush3.bf16.msra.mxu1 %v17263_v62  ;;  %v17284_v21 = vpack.c.bf16 %v569_v61, %v562_v60  ;;  %v975_v58 = vand.u32 4294901760, %v463_v55  ;;  %v978_v59 = vand.u32 4294901760, %v464_v56  ;;  %v466_v60 = vld [vmem:[%s20325_s4 + $0x18] sm:$0xff]  ;;  %v981_v61 = vand.u32 4294901760, %v465_v57 }
  0x14   : > { %v18457_v25 = vsub.f32 %v478_v20, %v18453_v24  ;;  %v564_v9 = vand.u32 4294901760, %v563_v5  ;;  %v583_v11 = vand.u32 4294901760, %v582_v4  ;;  %17265 = vmatprep.subr.bf16.mxu1 %v18315_v3  ;;  %v571_v12 = vand.u32 4294901760, %v570_v7 }
  0x15   : > { %v17275_v20 = vpack.c.bf16 %v582_v4, %v575_v63  ;;  %v18619_v5 = vsub.s32 0, %v18497_v42  ;;  %v18621_v7 = vpack.c.bf16 %v978_v59, %v975_v58  ;;  %vm970_vm3 = vcmask 523264  }
  0x16   : > { %v18460_v30 = vand.u32 4294901760, %v18457_v25  ;;  %v584_v14 = vsub.f32 %v582_v4, %v583_v11  ;;  %v468_v4 = vld [vmem:[%s20325_s4 + $0x28] sm:$0xff]  ;;  %vm2466_vm5 = vcmask 64512  }
  0x18   : > { %v552_v31 = vsub.f32 %v18457_v25, %v18460_v30  ;;  %v585_v17 = vand.u32 4294901760, %v584_v14  ;;  %v475_v14 = vrot.slane %v18505_v44, %v18619_v5 }
  0x1a   : > { %v18464_v35 = vand.u32 4294901760, %v552_v31 }
  0x1c   : > { %15822 = vmatmul.mubr.f32.vlgmr.msra.gmra.mrb[0].mxu0 %v18464_v35  ;;  %15642 = vmatmul.mubr.f32.vlgmr.msra.gmra.mrb[0].mxu1 %v18464_v35 }
  0x1d   : > { %17375 = vmatpush3.bf16.msra.mxu0 %v17374_v32  ;;  %15832 = vmatprep.mubr.msk.f32.mxu0 %vm18316_vm0, %v18317_v8 }
  0x1e   : > { %17376 = vmatprep.subr.bf16.mxu0 %v18315_v3  ;;  %15652 = vmatprep.mubr.msk.f32.mxu1 %vm18316_vm0, %v18317_v8 }
  0x21   : > { %17378 = vmatpush3.bf16.msra.mxu0 %v17377_v36 }
  0x22   : > { %17379 = vmatprep.subr.bf16.mxu0 %v18315_v3 }
  0x24   : > { %15833 = vmatmul.mubr.f32.vlgmr.msra.gmra.mrb[0].mxu0 %v18453_v24 }
  0x25   : > { %17381 = vmatpush3.bf16.msra.mxu0 %v17380_v37  ;;  %15843 = vmatprep.mubr.msk.f32.mxu0 %vm18316_vm0, %v18317_v8 }
  0x26   : > { %17382 = vmatprep.subr.bf16.mxu0 %v18315_v3 }
  0x29   : > { %17384 = vmatpush3.bf16.msra.mxu0 %v17383_v38 }
  0x2a   : > { %17385 = vmatprep.subr.bf16.mxu0 %v18315_v3 }
  0x2c   : > { %15844 = vmatmul.mubr.f32.vlgmr.msra.gmra.mrb[0].mxu0 %v18457_v25 }
  0x2d   : > { %17387 = vmatpush3.bf16.msra.mxu0 %v18433_v10  ;;  %15854 = vmatprep.mubr.msk.f32.mxu0 %vm18316_vm0, %v18317_v8 }
  0x2e   : > { %17388 = vmatprep.subr.bf16.mxu0 %v18315_v3 }
  0x31   : > { %17390 = vmatpush3.bf16.msra.mxu0 %v17371_v15 }
  0x32   : > { %17391 = vmatprep.subr.bf16.mxu0 %v18315_v3 }
  0x34   : > { %15855 = vmatmul.mubr.f32.vlgmr.msra.gmra.mrb[0].mxu0 %v18460_v30 }
  0x35   : > { %17393 = vmatpush3.bf16.msra.mxu0 %v17392_v39  ;;  %15865 = vmatprep.mubr.msk.f32.mxu0 %vm18316_vm0, %v18317_v8 }
  0x36   : > { %17394 = vmatprep.subr.bf16.mxu0 %v18315_v3 }
  0x39   : > { %17396 = vmatpush3.bf16.msra.mxu0 %v17395_v40 }
  0x3a   : > { %17397 = vmatprep.subr.bf16.mxu0 %v18315_v3 }
  0x3c   : > { %15866 = vmatmul.mubr.f32.vlgmr.msra.gmra.mrb[0].mxu0 %v18453_v24 }
  0x3d   : > { %17399 = vmatpush3.bf16.msra.mxu0 %v18433_v10  ;;  %15876 = vmatprep.mubr.msk.f32.mxu0 %vm18316_vm0, %v18317_v8  ;;  %v576_v10 = vand.u32 4294901760, %v575_v63 }
  0x3e   : > { %17400 = vmatprep.subr.bf16.mxu0 %v18315_v3 }
  0x3f   : > { %v577_v13 = vsub.f32 %v575_v63, %v576_v10  ;;  %v17287_v22 = vpack.c.bf16 %v583_v11, %v576_v10  ;;  %v467_v63 = vld [vmem:[%s20325_s4 + $0x20] sm:$0xff]  ;;  %v990_v11 = vand.u32 4294901760, %v468_v4 }
  0x40   : > { %v987_v10 = vand.u32 4294901760, %v467_v63 }
  0x41   : > { %17402 = vmatpush3.bf16.msra.mxu0 %v17371_v15  ;;  %v17266_v15 = vpack.c.bf16 %v571_v12, %v564_v9  ;;  %v578_v16 = vand.u32 4294901760, %v577_v13  ;;  %v469_v12 = vld [vmem:[%s20325_s4 + $0x30] sm:$0xff]  ;;  %v470_v13 = vld [vmem:[%s20325_s4 + $0x38] sm:$0xff] }
  0x42   : > { %15879 = vmatprep.subr.mxu0 %v18317_v8 }
  0x43   : > { %17267 = vmatpush3.bf16.msra.mxu1 %v17266_v15  ;;  %v17269_v18 = vpack.c.bf16 %v585_v17, %v578_v16  ;;  %v18635_v15 = vsub.f32 %v463_v55, %v975_v58  ;;  %v18637_v16 = vsub.f32 %v464_v56, %v978_v59  ;;  %v18640_v17 = vpack.c.bf16 %v990_v11, %v987_v10 }
  0x44   : > { %15877 = vmatmul.mubr.f32.vlgmr.msra.gmra.mrb[0].mxu0 %v18453_v24  ;;  %17268 = vmatprep.subr.bf16.mxu1 %v18315_v3 }
  0x45   : > { %15881 = vmatprep.mubr.msk.f32.mxu0 %vm18316_vm0, %v18317_v8  ;;  %v1060_v44 = vand.u32 4294901760, %v18635_v15 }
  0x47   : > { %17270 = vmatpush3.bf16.msra.mxu1 %v17269_v18  ;;  %v993_v18 = vand.u32 4294901760, %v469_v12 }
  0x48   : > { %17271 = vmatprep.subr.bf16.mxu1 %v18315_v3 }
  0x4a   : > { %15653 = vmatmul.mubr.f32.vlgmr.msra.gmra.mrb[0].mxu1 %v18453_v24 }
  0x4b   : > { %17273 = vmatpush3.bf16.msra.mxu1 %v17272_v19  ;;  %15663 = vmatprep.mubr.msk.f32.mxu1 %vm18316_vm0, %v18317_v8  ;;  %v996_v19 = vand.u32 4294901760, %v470_v13 }
  0x4c   : > { %17274 = vmatprep.subr.bf16.mxu1 %v18315_v3 }
  0x4f   : > { %17276 = vmatpush3.bf16.msra.mxu1 %v17275_v20 }
  0x50   : > { %17277 = vmatprep.subr.bf16.mxu1 %v18315_v3 }
  0x52   : > { %15664 = vmatmul.mubr.f32.vlgmr.msra.gmra.mrb[0].mxu1 %v18457_v25 }
  0x53   : > { %17279 = vmatpush3.bf16.msra.mxu1 %v17260_v53  ;;  %15674 = vmatprep.mubr.msk.f32.mxu1 %vm18316_vm0, %v18317_v8 }
  0x54   : > { %17280 = vmatprep.subr.bf16.mxu1 %v18315_v3 }
  0x57   : > { %17282 = vmatpush3.bf16.msra.mxu1 %v17263_v62 }
  0x58   : > { %17283 = vmatprep.subr.bf16.mxu1 %v18315_v3 }
  0x5a   : > { %15675 = vmatmul.mubr.f32.vlgmr.msra.gmra.mrb[0].mxu1 %v18460_v30 }
  0x5b   : > { %17285 = vmatpush3.bf16.msra.mxu1 %v17284_v21  ;;  %15685 = vmatprep.mubr.msk.f32.mxu1 %vm18316_vm0, %v18317_v8  ;;  %v18642_v21 = vsub.f32 %v465_v57, %v981_v61 }
  0x5c   : > { %17286 = vmatprep.subr.bf16.mxu1 %v18315_v3 }
  0x5f   : > { %17288 = vmatpush3.bf16.msra.mxu1 %v17287_v22 }
  0x60   : > { %17289 = vmatprep.subr.bf16.mxu1 %v18315_v3 }
  0x62   : > { %15686 = vmatmul.mubr.f32.vlgmr.msra.gmra.mrb[0].mxu1 %v18453_v24 }
  0x63   : > { %17291 = vmatpush3.bf16.msra.mxu1 %v17260_v53  ;;  %15696 = vmatprep.mubr.msk.f32.mxu1 %vm18316_vm0, %v18317_v8 }
  0x64   : > { %17292 = vmatprep.subr.bf16.mxu1 %v18315_v3 }
  0x67   : > { %17294 = vmatpush3.bf16.msra.mxu1 %v17263_v62  ;;  %v984_v62 = vand.u32 4294901760, %v466_v60 }
  0x68   : > { %17295 = vmatprep.subr.bf16.mxu1 %v18315_v3 }
  0x69   : > { %v18624_v9 = vpack.c.bf16 %v984_v62, %v981_v61 }
  0x6a   : > { %15697 = vmatmul.mubr.f32.vlgmr.msra.gmra.mrb[0].mxu1 %v18453_v24 }
  0x6b   : > { %15715 = vmatprep.mubr.msk.f32.mxu1 %vm18316_vm0, %v18317_v8  ;;  %17297 = vmatpush3.bf16.msra.mxu1 %v18621_v7 }
  0x6c   : > { %17298 = vmatprep.subr.bf16.mxu1 %v18315_v3 }
  0x6f   : > { %17300 = vmatpush3.bf16.msra.mxu1 %v18624_v9 }
  0x70   : > { %17301 = vmatprep.subr.bf16.mxu1 %v18315_v3 }
  0x73   : > { %17303 = vmatpush3.bf16.msra.mxu1 %v18640_v17 }
  0x74   : > { %17304 = vmatprep.subr.bf16.mxu1 %v18315_v3 }
 0x117   : > { %v2002_v46 = vpop.f32.mrb[0].mxu0 }
 0x118   : > { %v18509_v47 = vadd.f32 %v2002_v46, %v1520_v45  ;;  %v15878_v48 = vpop.f32.mrb[1].mxu0 }
 0x11a   : > { %2935 = vrot.lane.b32.xlu1 %v18509_v47, %s18318_s24  ;;  %2013 = vrot.lane.b32.xlu0 %v18509_v47, %s18319_s27  ;;  %v2016_v23 = vsel %vm2015_vm2, %v18509_v47, 0 }
 0x11b   : > { %v2086_v25 = vand.u32 4294901760, %v2016_v23 }
 0x11d   : > { %v2087_v26 = vsub.f32 %v2016_v23, %v2086_v25  ;;  %v18645_v23 = vsub.f32 %v466_v60, %v984_v62 }
 0x11e   : > { %2933 = vrot.lane.b32.xlu0 %v18509_v47, %s18320_s28 }
 0x11f   : > { %v2088_v27 = vand.u32 4294901760, %v2087_v26 }
 0x121   : > { %v2089_v30 = vsub.f32 %v2087_v26, %v2088_v27 }
 0x123   : > { %v2090_v33 = vand.u32 4294901760, %v2089_v30  ;;  %v18654_v30 = vsub.f32 %v468_v4, %v990_v11 }
 0x13d   : > { %v961_v20 = vpop.f32.mrb[0].mxu1 }
 0x13e   : > { %v17979_v22 = vadd.f32 %v961_v20, %v475_v14  ;;  %v17320_v14 = vpack.c.bf16 %v18637_v16, %v18635_v15 }
 0x18c   : > { %v2014_v28 = vpop.permute.xlu0 %2013  ;;  %v2936_v37 = vpop.permute.xlu1 %2935 }
 0x18d   : > { %v2018_v29 = vsel %vm2015_vm2, %v2014_v28, 0  ;;  %v2939_v39 = vsel %vm2015_vm2, %v2936_v37, 0  ;;  %v18650_v28 = vsub.f32 %v467_v63, %v987_v10 }
 0x18e   : > { %v2021_v31 = vand.u32 4294901760, %v2018_v29  ;;  %v2942_v45 = vand.u32 4294901760, %v2939_v39 }
 0x190   : > { %v2098_v32 = vsub.f32 %v2018_v29, %v2021_v31  ;;  %15880 = vmatpush3.xpose.msra.mxu0 %v2021_v31  ;;  %v2934_v36 = vpop.permute.xlu0 %2933  ;;  %v3019_v48 = vsub.f32 %v2939_v39, %v2942_v45  ;;  %v18652_v29 = vpack.c.bf16 %v996_v19, %v993_v18  ;;  %v18675_v39 = vsub.f32 %v470_v13, %v996_v19 }
 0x191   : > { %15884 = vmatprep.subr.mxu0 %v18317_v8  ;;  %v2937_v38 = vsel %vm2015_vm2, %v2934_v36, 0  ;;  %v1088_v36 = vand.u32 4294901760, %v18650_v28  ;;  %v17326_v19 = vpack.c.bf16 %v18654_v30, %v18650_v28 }
 0x192   : > { %v2099_v24 = vand.u32 4294901760, %v2098_v32  ;;  %v3007_v40 = vand.u32 4294901760, %v2937_v38  ;;  %v3020_v50 = vand.u32 4294901760, %v3019_v48  ;;  %17306 = vmatpush3.bf16.msra.mxu1 %v18652_v29 }
 0x193   : > { %15882 = vmatmul.mubr.f32.vlgmr.msra.gmra.mrb[2].mxu0 %v2090_v33  ;;  %v1061_v33 = vsub.f32 %v18635_v15, %v1060_v44  ;;  %17307 = vmatprep.subr.bf16.mxu1 %v18315_v3 }
 0x194   : > { %v2100_v34 = vsub.f32 %v2098_v32, %v2099_v24  ;;  %15886 = vmatprep.mubr.msk.f32.mxu0 %vm18316_vm0, %v18317_v8  ;;  %v3008_v46 = vsub.f32 %v2937_v38, %v3007_v40  ;;  %v3021_v52 = vsub.f32 %v3019_v48, %v3020_v50  ;;  %v18673_v38 = vsub.f32 %v469_v12, %v993_v18 }
 0x195   : > { %v17323_v18 = vpack.c.bf16 %v18645_v23, %v18642_v21 }
 0x196   : > { %v2101_v35 = vand.u32 4294901760, %v2100_v34  ;;  %v3009_v49 = vand.u32 4294901760, %v3008_v46  ;;  %v3022_v54 = vand.u32 4294901760, %v3021_v52  ;;  %v1081_v34 = vand.u32 4294901760, %v18645_v23 }
 0x197   : > { %v1089_v52 = vsub.f32 %v18650_v28, %v1088_v36  ;;  %v17329_v20 = vpack.c.bf16 %v18675_v39, %v18673_v38 }
 0x198   : > { %15885 = vmatpush3.xpose.msra.mxu0 %v2101_v35  ;;  %v3010_v51 = vsub.f32 %v3008_v46, %v3009_v49 }
 0x199   : > { %15889 = vmatprep.subr.mxu0 %v18317_v8  ;;  %v1090_v60 = vand.u32 4294901760, %v1089_v52 }
 0x19a   : > { %v3011_v53 = vand.u32 4294901760, %v3010_v51 }
 0x19b   : > { %15887 = vmatmul.mubr.f32.vlgmr.msra.gmra.mrb[2].mxu0 %v2086_v25 }
 0x19c   : > { %15890 = vmatpush3.xpose.msra.mxu0 %v2098_v32  ;;  %15891 = vmatprep.mubr.msk.f32.mxu0 %vm18316_vm0, %v18317_v8 }
 0x19d   : > { %15894 = vmatprep.subr.mxu0 %v18317_v8 }
 0x1a3   : > { %15892 = vmatmul.mubr.f32.vlgmr.msra.gmra.mrb[2].mxu0 %v2087_v26  ;;  %v15698_v26 = vpop.f32.mrb[1].mxu1 }
 0x1a4   : > { %15895 = vmatpush3.xpose.msra.mxu0 %v2021_v31  ;;  %15896 = vmatprep.mubr.msk.f32.mxu0 %vm18316_vm0, %v18317_v8 }
 0x1a5   : > { %15899 = vmatprep.subr.mxu0 %v18317_v8 }
 0x1ab   : > { %15897 = vmatmul.mubr.f32.vlgmr.msra.gmra.mrb[2].mxu0 %v2088_v27  ;;  %v965_v27 = vmax.f32 %v17979_v22, 0.0  ;;  %v18732_v22 = vand.u32 127, %v472_v41 }
 0x1ac   : > { %15900 = vmatpush3.xpose.msra.mxu0 %v2099_v24  ;;  %15901 = vmatprep.mubr.msk.f32.mxu0 %vm18316_vm0, %v18317_v8 }
 0x1ad   : > { %15904 = vmatprep.subr.mxu0 %v18317_v8  ;;  %v972_v32 = vsel %vm970_vm3, %v965_v27, 0  ;;  %vm2010_vm4 = vcmp.gt.s32.totalorder %v18732_v22, %v18497_v42 }
 0x1ae   : > { %v18666_v35 = vand.u32 4294901760, %v972_v32  ;;  %v2011_v15 = vsel %vm2010_vm4, -1e+10, %v18317_v8 }
 0x1b0   : > { %v18671_v37 = vsub.f32 %v972_v32, %v18666_v35 }
 0x1b3   : > { %15902 = vmatmul.mubr.f32.vlgmr.msra.gmra.mrb[2].mxu0 %v2086_v25 }
 0x1b4   : > { %15905 = vmatpush3.xpose.msra.mxu0 %v2021_v31  ;;  %15906 = vmatprep.mubr.msk.f32.mxu0 %vm18316_vm0, %v18317_v8  ;;  %v1074_v31 = vand.u32 4294901760, %v18642_v21 }
 0x1b5   : > { %15939 = vmatprep.subr.mxu0 %v18317_v8 }
 0x1b6   : > { %v17347_v41 = vpack.c.bf16 %v1081_v34, %v1074_v31 }
 0x1bb   : > { %15907 = vmatmul.mubr.f32.vlgmr.msra.gmra.mrb[2].mxu0 %v2086_v25  ;;  %v1067_v25 = vand.u32 4294901760, %v18637_v16 }
 0x1bc   : > { %15940 = vmatpush3.xpose.msra.mxu0 %v2942_v45  ;;  %15941 = vmatprep.mubr.msk.f32.mxu0 %vm18316_vm0, %v18317_v8 }
 0x1bd   : > { %15944 = vmatprep.subr.mxu0 %v18317_v8  ;;  %v1068_v24 = vsub.f32 %v18637_v16, %v1067_v25  ;;  %v17344_v26 = vpack.c.bf16 %v1067_v25, %v1060_v44 }
 0x1bf   : > { %15942 = vmatmul.mubr.f32.vlgmr.msra.gmra.mrb[4].mxu0 %v3011_v53  ;;  %v1102_v53 = vand.u32 4294901760, %v18673_v38 }
 0x1c0   : > { %15945 = vmatpush3.xpose.msra.mxu0 %v3022_v54  ;;  %15946 = vmatprep.mubr.msk.f32.mxu0 %vm18316_vm0, %v18317_v8  ;;  %v1109_v54 = vand.u32 4294901760, %v18675_v39 }
 0x1c1   : > { %15949 = vmatprep.subr.mxu0 %v18317_v8  ;;  %v1103_v63 = vsub.f32 %v18673_v38, %v1102_v53 }
 0x1c2   : > { %v1110_v4 = vsub.f32 %v18675_v39, %v1109_v54  ;;  %v17353_v27 = vpack.c.bf16 %v1109_v54, %v1102_v53 }
 0x1c3   : > { %v1104_v11 = vand.u32 4294901760, %v1103_v63 }
 0x1c4   : > { %v1111_v12 = vand.u32 4294901760, %v1110_v4 }
 0x1c6   : > { %v17317_v13 = vpack.c.bf16 %v1111_v12, %v1104_v11 }
 0x1c7   : > { %15947 = vmatmul.mubr.f32.vlgmr.msra.gmra.mrb[4].mxu0 %v3007_v40 }
 0x1c8   : > { %15950 = vmatpush3.xpose.msra.mxu0 %v3019_v48  ;;  %15951 = vmatprep.mubr.msk.f32.mxu0 %vm18316_vm0, %v18317_v8  ;;  %v1082_v48 = vsub.f32 %v18645_v23, %v1081_v34 }
 0x1c9   : > { %15954 = vmatprep.subr.mxu0 %v18317_v8 }
 0x1ca   : > { %v1083_v57 = vand.u32 4294901760, %v1082_v48 }
 0x1cf   : > { %15952 = vmatmul.mubr.f32.vlgmr.msra.gmra.mrb[4].mxu0 %v3008_v46  ;;  %v1069_v46 = vand.u32 4294901760, %v1068_v24 }
 0x1d0   : > { %15955 = vmatpush3.xpose.msra.mxu0 %v2942_v45  ;;  %15956 = vmatprep.mubr.msk.f32.mxu0 %vm18316_vm0, %v18317_v8 }
 0x1d1   : > { %15959 = vmatprep.subr.mxu0 %v18317_v8 }
 0x1d7   : > { %15957 = vmatmul.mubr.f32.vlgmr.msra.gmra.mrb[4].mxu0 %v3009_v49  ;;  %v1095_v49 = vand.u32 4294901760, %v18654_v30 }
 0x1d8   : > { %15960 = vmatpush3.xpose.msra.mxu0 %v3020_v50  ;;  %15961 = vmatprep.mubr.msk.f32.mxu0 %vm18316_vm0, %v18317_v8  ;;  %v1049_v50 = vand.u32 4294901760, %v18671_v37 }
 0x1d9   : > { %15964 = vmatprep.subr.mxu0 %v18317_v8  ;;  %v1096_v58 = vsub.f32 %v18654_v30, %v1095_v49  ;;  %v17350_v16 = vpack.c.bf16 %v1095_v49, %v1088_v36 }
 0x1da   : > { %v1050_v51 = vsub.f32 %v18671_v37, %v1049_v50 }
 0x1db   : > { %v1097_v62 = vand.u32 4294901760, %v1096_v58 }
 0x1dc   : > { %v1051_v59 = vand.u32 4294901760, %v1050_v51 }
 0x1dd   : > { %v17314_v10 = vpack.c.bf16 %v1097_v62, %v1090_v60 }
 0x1de   : > { %15716 = vmatmul.mubr.f32.vlgmr.msra.gmra.mrb[2].mxu1 %v1051_v59 }
 0x1df   : > { %15962 = vmatmul.mubr.f32.vlgmr.msra.gmra.mrb[4].mxu0 %v3007_v40  ;;  %15734 = vmatprep.mubr.msk.f32.mxu1 %vm18316_vm0, %v18317_v8 }
 0x1e0   : > { %15965 = vmatpush3.xpose.msra.mxu0 %v2942_v45  ;;  %15966 = vmatprep.mubr.msk.f32.mxu0 %vm18316_vm0, %v18317_v8  ;;  %v1062_v45 = vand.u32 4294901760, %v1061_v33 }
 0x1e1   : > { %17403 = vmatprep.subr.bf16.mxu0 %v18315_v3 }
 0x1e2   : > { %v17308_v55 = vpack.c.bf16 %v1069_v46, %v1062_v45 }
 0x1e4   : > { %17309 = vmatpush3.bf16.msra.mxu1 %v17308_v55 }
 0x1e5   : > { %17310 = vmatprep.subr.bf16.mxu1 %v18315_v3 }
 0x1e7   : > { %15967 = vmatmul.mubr.f32.vlgmr.msra.gmra.mrb[4].mxu0 %v3007_v40  ;;  %v1075_v40 = vsub.f32 %v18642_v21, %v1074_v31 }
 0x1e8   : > { %16003 = vmatprep.mubr.msk.f32.mxu0 %vm18316_vm0, %v18317_v8 }
 0x1e9   : > { %v1076_v56 = vand.u32 4294901760, %v1075_v40 }
 0x1eb   : > { %v17311_v61 = vpack.c.bf16 %v1083_v57, %v1076_v56 }
 0x1ed   : > { %17312 = vmatpush3.bf16.msra.mxu1 %v17311_v61 }
 0x1ee   : > { %17313 = vmatprep.subr.bf16.mxu1 %v18315_v3 }
 0x1f1   : > { %17315 = vmatpush3.bf16.msra.mxu1 %v17314_v10 }
 0x1f2   : > { %17316 = vmatprep.subr.bf16.mxu1 %v18315_v3 }
 0x1f5   : > { %17318 = vmatpush3.bf16.msra.mxu1 %v17317_v13 }
 0x1f6   : > { %17319 = vmatprep.subr.bf16.mxu1 %v18315_v3 }
 0x1f8   : > { %15735 = vmatmul.mubr.f32.vlgmr.msra.gmra.mrb[2].mxu1 %v18666_v35 }
 0x1f9   : > { %17321 = vmatpush3.bf16.msra.mxu1 %v17320_v14  ;;  %15753 = vmatprep.mubr.msk.f32.mxu1 %vm18316_vm0, %v18317_v8 }
 0x1fa   : > { %17322 = vmatprep.subr.bf16.mxu1 %v18315_v3 }
 0x1fd   : > { %17324 = vmatpush3.bf16.msra.mxu1 %v17323_v18 }
 0x1fe   : > { %17325 = vmatprep.subr.bf16.mxu1 %v18315_v3 }
 0x201   : > { %17327 = vmatpush3.bf16.msra.mxu1 %v17326_v19 }
 0x202   : > { %17328 = vmatprep.subr.bf16.mxu1 %v18315_v3 }
 0x205   : > { %17330 = vmatpush3.bf16.msra.mxu1 %v17329_v20 }
 0x206   : > { %17331 = vmatprep.subr.bf16.mxu1 %v18315_v3 }
 0x208   : > { %15754 = vmatmul.mubr.f32.vlgmr.msra.gmra.mrb[2].mxu1 %v18671_v37 }
 0x209   : > { %17333 = vmatpush3.bf16.msra.mxu1 %v18621_v7  ;;  %15772 = vmatprep.mubr.msk.f32.mxu1 %vm18316_vm0, %v18317_v8 }
 0x20a   : > { %17334 = vmatprep.subr.bf16.mxu1 %v18315_v3 }
 0x20d   : > { %17336 = vmatpush3.bf16.msra.mxu1 %v18624_v9 }
 0x20e   : > { %17337 = vmatprep.subr.bf16.mxu1 %v18315_v3 }
 0x211   : > { %17339 = vmatpush3.bf16.msra.mxu1 %v18640_v17 }
 0x212   : > { %17340 = vmatprep.subr.bf16.mxu1 %v18315_v3 }
 0x215   : > { %17342 = vmatpush3.bf16.msra.mxu1 %v18652_v29 }
 0x216   : > { %17343 = vmatprep.subr.bf16.mxu1 %v18315_v3 }
 0x218   : > { %15773 = vmatmul.mubr.f32.vlgmr.msra.gmra.mrb[2].mxu1 %v1049_v50 }
 0x219   : > { %17345 = vmatpush3.bf16.msra.mxu1 %v17344_v26  ;;  %15791 = vmatprep.mubr.msk.f32.mxu1 %vm18316_vm0, %v18317_v8 }
 0x21a   : > { %17346 = vmatprep.subr.bf16.mxu1 %v18315_v3 }
 0x21d   : > { %17348 = vmatpush3.bf16.msra.mxu1 %v17347_v41 }
 0x21e   : > { %17349 = vmatprep.subr.bf16.mxu1 %v18315_v3 }
 0x221   : > { %17351 = vmatpush3.bf16.msra.mxu1 %v17350_v16 }
 0x222   : > { %17352 = vmatprep.subr.bf16.mxu1 %v18315_v3 }
 0x225   : > { %17354 = vmatpush3.bf16.msra.mxu1 %v17353_v27 }
 0x226   : > { %17355 = vmatprep.subr.bf16.mxu1 %v18315_v3 }
 0x228   : > { %15792 = vmatmul.mubr.f32.vlgmr.msra.gmra.mrb[2].mxu1 %v18666_v35 }
 0x229   : > { %17357 = vmatpush3.bf16.msra.mxu1 %v18621_v7  ;;  %15810 = vmatprep.mubr.msk.f32.mxu1 %vm18316_vm0, %v18317_v8 }
 0x22a   : > { %17358 = vmatprep.subr.bf16.mxu1 %v18315_v3 }
 0x22d   : > { %17360 = vmatpush3.bf16.msra.mxu1 %v18624_v9 }
 0x22e   : > { %17361 = vmatprep.subr.bf16.mxu1 %v18315_v3 }
 0x231   : > { %17363 = vmatpush3.bf16.msra.mxu1 %v18640_v17 }
 0x232   : > { %17364 = vmatprep.subr.bf16.mxu1 %v18315_v3 }
 0x235   : > { %17366 = vmatpush3.bf16.msra.mxu1 %v18652_v29 }
 0x236   : > { %15909 = vmatprep.subr.mxu1 %v18317_v8 }
 0x238   : > { %15811 = vmatmul.mubr.f32.vlgmr.msra.gmra.mrb[2].mxu1 %v18666_v35 }
 0x239   : > { %15911 = vmatprep.mubr.msk.f32.mxu1 %vm18316_vm0, %v18317_v8 }
 0x28e   : > { %v2462_v44 = vpop.f32.mrb[2].mxu0 }
 0x28f   : > { %v17982_v21 = vadd.f32 %v2462_v44, %v2011_v15  ;;  %v15908_v23 = vpop.f32.mrb[3].mxu0 }
 0x291   : > { %v2467_v25 = vsel %vm2466_vm5, %v17982_v21, -inf }
 0x292   : > { %2468 = vmax.xlane.f32.xlu1 %v2467_v25 }
 0x2a3   : > { %2481 = vrot.lane.b32.xlu1 %v18509_v47, %s18321_s16 }
 0x2a7   : > { %3855 = vrot.lane.b32.xlu1 %v18416_v2, %s18323_s19 }
 0x2ab   : > { %3857 = vrot.lane.b32.xlu1 %v18424_v6, %s18323_s19 }
 0x2af   : > { %4325 = vrot.lane.b32.xlu1 %v18406_v0, %s18323_s19 }
 0x2ba   : > { %v3383_v7 = vpop.f32.mrb[4].mxu0 }
 0x2bb   : > { %v17983_v9 = vadd.f32 %v3383_v7, %v2011_v15  ;;  %v15968_v28 = vpop.f32.mrb[5].mxu0 }
 0x2bd   : > { %v3387_v30 = vsel %vm2466_vm5, %v17983_v9, -inf }
 0x2be   : > { %3388 = vmax.xlane.f32.xlu0 %v3387_v30 }
 0x30b   : > { %v18785_v40 = vpop.f32.mrb[2].mxu1 }
 0x30c   : > { %v15812_v45 = vpop.f32.mrb[3].mxu1 }
 0x31f   : > { %v2469_v17 = vpop.xlane.xlu1 %2468 }
 0x320   : > { %v2470_v31 = vsub.f32 %v17982_v21, %v2469_v17 }
 0x322   : > { %v2471_v32 = vmul.f32 1.442695, %v2470_v31 }
 0x323   : > { %v2482_v33 = vpop.permute.xlu1 %2481 }
 0x324   : > { %18264 = vpow2.f32 %v2471_v32  ;;  %v18778_v24 = vand.u32 4294901760, %v2482_v33 }
 0x326   : > { %15910 = vmatpush3.msra.mxu1 %v18778_v24  ;;  %v2565_v51 = vsub.f32 %v2482_v33, %v18778_v24 }
 0x327   : > { %15914 = vmatprep.subr.mxu1 %v18317_v8  ;;  %v3856_v16 = vpop.permute.xlu1 %3855 }
 0x328   : > { %v2566_v54 = vand.u32 4294901760, %v2565_v51  ;;  %v3865_v44 = vand.u32 4294901760, %v3856_v16 }
 0x32a   : > { %v2567_v56 = vsub.f32 %v2565_v51, %v2566_v54  ;;  %v3943_v25 = vsub.f32 %v3856_v16, %v3865_v44 }
 0x32b   : > { %v3858_v21 = vpop.permute.xlu1 %3857 }
 0x32c   : > { %v2568_v58 = vand.u32 4294901760, %v2567_v56  ;;  %v3868_v23 = vand.u32 4294901760, %v3858_v21  ;;  %v3944_v28 = vand.u32 4294901760, %v3943_v25 }
 0x32e   : > { %v18265_v29 = vpop.eup %18264  ;;  %v17404_v27 = vpack.c.bf16 %v3868_v23, %v3865_v44  ;;  %v3950_v7 = vsub.f32 %v3858_v21, %v3868_v23  ;;  %v3945_v17 = vsub.f32 %v3943_v25, %v3944_v28 }
 0x32f   : > { %v2473_v34 = vsel %vm2466_vm5, %v18265_v29, 0.0 }
 0x330   : > { %2474 = vadd.xlane.f32.xlu0 %v2473_v34  ;;  %17405 = vmatpush3.bf16.msra.mxu0 %v17404_v27  ;;  %v3951_v30 = vand.u32 4294901760, %v3950_v7  ;;  %v3946_v32 = vand.u32 4294901760, %v3945_v17 }
 0x331   : > { %17409 = vmatprep.subr.bf16.mxu0 %v18315_v3 }
 0x332   : > { %v3952_v31 = vsub.f32 %v3950_v7, %v3951_v30 }
 0x334   : > { %v3953_v33 = vand.u32 4294901760, %v3952_v31 }
 0x34b   : > { %v3389_v35 = vpop.xlane.xlu0 %3388 }
 0x34c   : > { %v3390_v36 = vsub.f32 %v17983_v9, %v3389_v35  ;;  %v17410_v9 = vpack.c.bf16 %v3950_v7, %v3943_v25 }
 0x34e   : > { %v3391_v37 = vmul.f32 1.442695, %v3390_v36  ;;  %v4326_v36 = vpop.permute.xlu1 %4325 }
 0x350   : > { %18266 = vpow2.f32 %v3391_v37 }
 0x35a   : > { %v18267_v38 = vpop.eup %18266 }
 0x35b   : > { %v3393_v39 = vsel %vm2466_vm5, %v18267_v38, 0.0 }
 0x35c   : > { %3394 = vadd.xlane.f32.xlu0 %v3393_v39 }
 0x372   : > { %3401 = vrot.lane.b32.xlu0 %v18509_v47, %s18322_s17 }
 0x376   : > { %4327 = vrot.lane.b32.xlu0 %v18411_v1, %s18323_s19 }
 0x3bd   : > { %v2475_v46 = vpop.xlane.xlu0 %2474 }
 0x3be   : > { %18268 = vrcp.f32 %v2475_v46 }
 0x3c8   : > { %v18269_v48 = vpop.eup %18268 }
 0x3c9   : > { %v2477_v47 = vmul.f32 %v18269_v48, %v2475_v46 }
 0x3cb   : > { %v2478_v49 = vsub.f32 2.0, %v2477_v47 }
 0x3cd   : > { %v2479_v50 = vmul.f32 %v18269_v48, %v2478_v49 }
 0x3cf   : > { %v2480_v52 = vmul.f32 %v18265_v29, %v2479_v50  ;;  %v17416_v29 = vpack.c.bf16 %v3951_v30, %v3944_v28 }
 0x3d1   : > { %v2485_v2 = vsel %vm2466_vm5, %v2480_v52, 0 }
 0x3d2   : > { %v2553_v53 = vand.u32 4294901760, %v2485_v2 }
 0x3d4   : > { %v2554_v1 = vsub.f32 %v2485_v2, %v2553_v53 }
 0x3d6   : > { %v2555_v55 = vand.u32 4294901760, %v2554_v1 }
 0x3d8   : > { %v2556_v6 = vsub.f32 %v2554_v1, %v2555_v55 }
 0x3da   : > { %v2557_v57 = vand.u32 4294901760, %v2556_v6 }
 0x3dc   : > { %15912 = vmatmul.mubr.f32.vlgmr.msra.gmra.mrb[4].mxu1 %v2557_v57 }
 0x3dd   : > { %15915 = vmatpush3.msra.mxu1 %v2568_v58  ;;  %15916 = vmatprep.mubr.msk.f32.mxu1 %vm18316_vm0, %v18317_v8 }
 0x3de   : > { %15919 = vmatprep.subr.mxu1 %v18317_v8 }
 0x3e4   : > { %15917 = vmatmul.mubr.f32.vlgmr.msra.gmra.mrb[4].mxu1 %v2553_v53 }
 0x3e5   : > { %15920 = vmatpush3.msra.mxu1 %v2565_v51  ;;  %15921 = vmatprep.mubr.msk.f32.mxu1 %vm18316_vm0, %v18317_v8 }
 0x3e6   : > { %15924 = vmatprep.subr.mxu1 %v18317_v8 }
 0x3e9   : > { %v3395_v0 = vpop.xlane.xlu0 %3394 }
 0x3ea   : > { %18270 = vrcp.f32 %v3395_v0 }
 0x3ec   : > { %15922 = vmatmul.mubr.f32.vlgmr.msra.gmra.mrb[4].mxu1 %v2554_v1 }
 0x3ed   : > { %15925 = vmatpush3.msra.mxu1 %v18778_v24  ;;  %15926 = vmatprep.mubr.msk.f32.mxu1 %vm18316_vm0, %v18317_v8  ;;  %v3402_v60 = vpop.permute.xlu0 %3401 }
 0x3ee   : > { %15929 = vmatprep.subr.mxu1 %v18317_v8  ;;  %v3408_v63 = vand.u32 4294901760, %v3402_v60 }
 0x3f0   : > { %v3485_v11 = vsub.f32 %v3402_v60, %v3408_v63 }
 0x3f1   : > { %v4328_v37 = vpop.permute.xlu0 %4327 }
 0x3f2   : > { %v3486_v14 = vand.u32 4294901760, %v3485_v11  ;;  %v4338_v39 = vand.u32 4294901760, %v4328_v37 }
 0x3f4   : > { %v18271_v59 = vpop.eup %18270  ;;  %15927 = vmatmul.mubr.f32.vlgmr.msra.gmra.mrb[4].mxu1 %v2555_v55  ;;  %v3487_v20 = vsub.f32 %v3485_v11, %v3486_v14  ;;  %v18839_v46 = vsub.f32 %v4328_v37, %v4338_v39 }
 0x3f5   : > { %v3397_v61 = vmul.f32 %v18271_v59, %v3395_v0  ;;  %15930 = vmatpush3.msra.mxu1 %v2566_v54  ;;  %15931 = vmatprep.mubr.msk.f32.mxu1 %vm18316_vm0, %v18317_v8 }
 0x3f6   : > { %15934 = vmatprep.subr.mxu1 %v18317_v8  ;;  %v3488_v15 = vand.u32 4294901760, %v3487_v20  ;;  %v4421_v47 = vand.u32 4294901760, %v18839_v46 }
 0x3f7   : > { %v3398_v62 = vsub.f32 2.0, %v3397_v61 }
 0x3f8   : > { %v4422_v51 = vsub.f32 %v18839_v46, %v4421_v47 }
 0x3f9   : > { %v3399_v4 = vmul.f32 %v18271_v59, %v3398_v62 }
 0x3fa   : > { %v4423_v56 = vand.u32 4294901760, %v4422_v51 }
 0x3fb   : > { %v3400_v10 = vmul.f32 %v18267_v38, %v3399_v4  ;;  %v4335_v38 = vand.u32 4294901760, %v4326_v36 }
 0x3fc   : > { %15932 = vmatmul.mubr.f32.vlgmr.msra.gmra.mrb[4].mxu1 %v2553_v53 }
 0x3fd   : > { %v3405_v12 = vsel %vm2466_vm5, %v3400_v10, 0  ;;  %15935 = vmatpush3.msra.mxu1 %v18778_v24  ;;  %15936 = vmatprep.mubr.msk.f32.mxu1 %vm18316_vm0, %v18317_v8  ;;  %v17407_v24 = vpack.c.bf16 %v3953_v33, %v3946_v32  ;;  %v18837_v45 = vsub.f32 %v4326_v36, %v4335_v38  ;;  %v17422_v61 = vpack.c.bf16 %v4338_v39, %v4335_v38 }
 0x3fe   : > { %v3473_v13 = vand.u32 4294901760, %v3405_v12  ;;  %15969 = vmatprep.subr.mxu1 %v18317_v8 }
 0x3ff   : > { %v4414_v48 = vand.u32 4294901760, %v18837_v45  ;;  %v17428_v10 = vpack.c.bf16 %v18839_v46, %v18837_v45 }
 0x400   : > { %v3474_v18 = vsub.f32 %v3405_v12, %v3473_v13  ;;  %v18884_v12 = vsub.s32 2, %v18497_v42 }
 0x401   : > { %v4415_v50 = vsub.f32 %v18837_v45, %v4414_v48 }
 0x402   : > { %v3475_v19 = vand.u32 4294901760, %v3474_v18 }
 0x403   : > { %v4416_v55 = vand.u32 4294901760, %v4415_v50  ;;  %v18895_v50 = vsub.s32 3, %v18497_v42 }
 0x404   : > { %15937 = vmatmul.mubr.f32.vlgmr.msra.gmra.mrb[4].mxu1 %v2553_v53  ;;  %v3476_v26 = vsub.f32 %v3474_v18, %v3475_v19 }
 0x405   : > { %15970 = vmatpush3.msra.mxu1 %v3408_v63  ;;  %15971 = vmatprep.mubr.msk.f32.mxu1 %vm18316_vm0, %v18317_v8  ;;  %v17425_v0 = vpack.c.bf16 %v4423_v56, %v4416_v55 }
 0x406   : > { %15974 = vmatprep.subr.mxu1 %v18317_v8  ;;  %v3477_v41 = vand.u32 4294901760, %v3476_v26 }
 0x408   : > { %15972 = vmatmul.mubr.f32.vlgmr.msra.gmra.mrb[6].mxu1 %v3477_v41 }
 0x409   : > { %15975 = vmatpush3.msra.mxu1 %v3488_v15  ;;  %15976 = vmatprep.mubr.msk.f32.mxu1 %vm18316_vm0, %v18317_v8 }
 0x40a   : > { %15979 = vmatprep.subr.mxu1 %v18317_v8 }
 0x410   : > { %15977 = vmatmul.mubr.f32.vlgmr.msra.gmra.mrb[6].mxu1 %v3473_v13 }
 0x411   : > { %15980 = vmatpush3.msra.mxu1 %v3485_v11  ;;  %15981 = vmatprep.mubr.msk.f32.mxu1 %vm18316_vm0, %v18317_v8  ;;  %v17434_v11 = vpack.c.bf16 %v4421_v47, %v4414_v48 }
 0x412   : > { %15984 = vmatprep.subr.mxu1 %v18317_v8 }
 0x418   : > { %15982 = vmatmul.mubr.f32.vlgmr.msra.gmra.mrb[6].mxu1 %v3474_v18 }
 0x419   : > { %15985 = vmatpush3.msra.mxu1 %v3408_v63  ;;  %15986 = vmatprep.mubr.msk.f32.mxu1 %vm18316_vm0, %v18317_v8 }
 0x41a   : > { %15989 = vmatprep.subr.mxu1 %v18317_v8 }
 0x420   : > { %15987 = vmatmul.mubr.f32.vlgmr.msra.gmra.mrb[6].mxu1 %v3475_v19 }
 0x421   : > { %15990 = vmatpush3.msra.mxu1 %v3486_v14  ;;  %15991 = vmatprep.mubr.msk.f32.mxu1 %vm18316_vm0, %v18317_v8 }
 0x422   : > { %15994 = vmatprep.subr.mxu1 %v18317_v8 }
 0x428   : > { %15992 = vmatmul.mubr.f32.vlgmr.msra.gmra.mrb[6].mxu1 %v3473_v13 }
 0x429   : > { %15995 = vmatpush3.msra.mxu1 %v3408_v63  ;;  %15996 = vmatprep.mubr.msk.f32.mxu1 %vm18316_vm0, %v18317_v8 }
 0x42a   : > { %17406 = vmatprep.subr.bf16.mxu1 %v18315_v3 }
 0x430   : > { %15997 = vmatmul.mubr.f32.vlgmr.msra.gmra.mrb[6].mxu1 %v3473_v13  ;;  %v18889_v13 = vld [vmem:[%s20326_s5] sm:$0xff] }
 0x431   : > { %16010 = vmatprep.mubr.msk.f32.mxu1 %vm18316_vm0, %v18317_v8  ;;  %17408 = vmatpush3.bf16.msra.mxu1 %v17407_v24  ;;  %v969_v14 = vrot.slane %v18889_v13, %v18884_v12 }
 0x432   : > { %17412 = vmatprep.subr.bf16.mxu1 %v18315_v3 }
 0x433   : > { %v17980_v18 = vadd.f32 %v18785_v40, %v969_v14  ;;  %v18914_v14 = vld [vmem:[%s20327_s6] sm:$0xff] }
 0x435   : > { %v14822_v19 = vmul.f32 -1.442695, %v17980_v18  ;;  %v18923_v18 = vld [vmem:[%s20327_s6 + $0x10] sm:$0xff] }
 0x437   : > { %18272 = vpow2.f32 %v14822_v19  ;;  %v18928_v19 = vld [vmem:[%s20327_s6 + $0x18] sm:$0xff] }
 0x4d7   : > { %v2929_v34 = vpop.f32.mrb[4].mxu1 }
 0x4d8   : > { %v15938_v35 = vpop.f32.mrb[5].mxu1  ;;  %v4332_v54 = vsel %vm2015_vm2, %v2929_v34, 0 }
 0x4d9   : > { %v4401_v6 = vand.u32 4294901760, %v4332_v54 }
 0x4db   : > { %v4402_v59 = vsub.f32 %v4332_v54, %v4401_v6 }
 0x4dd   : > { %v4403_v62 = vand.u32 4294901760, %v4402_v59 }
 0x4df   : > { %v4404_v63 = vsub.f32 %v4402_v59, %v4403_v62 }
 0x4e1   : > { %v4405_v4 = vand.u32 4294901760, %v4404_v63 }
 0x503   : > { %v3849_v49 = vpop.f32.mrb[6].mxu1 }
 0x504   : > { %v3862_v52 = vsel %vm2015_vm2, %v3849_v49, 0  ;;  %v15998_v2 = vpop.f32.mrb[7].mxu1 }
 0x505   : > { %v3931_v53 = vand.u32 4294901760, %v3862_v52 }
 0x507   : > { %v3932_v1 = vsub.f32 %v3862_v52, %v3931_v53  ;;  %16011 = vmatmul.mubr.f32.vlgmr.msra.gmra.mrb[8].mxu1 %v3931_v53 }
 0x508   : > { %17414 = vmatpush3.bf16.msra.mxu1 %v17404_v27  ;;  %16024 = vmatprep.mubr.msk.f32.mxu1 %vm18316_vm0, %v18317_v8 }
 0x509   : > { %v3933_v57 = vand.u32 4294901760, %v3932_v1  ;;  %17418 = vmatprep.subr.bf16.mxu1 %v18315_v3 }
 0x50b   : > { %v3934_v58 = vsub.f32 %v3932_v1, %v3933_v57  ;;  %16025 = vmatmul.mubr.f32.vlgmr.msra.gmra.mrb[10].mxu1 %v3933_v57  ;;  %v18305_v57 = vld [vmem:[%s18449_s21] sm:$0xff] }
 0x50c   : > { %17420 = vmatpush3.bf16.msra.mxu1 %v17404_v27  ;;  %16038 = vmatprep.mubr.msk.f32.mxu1 %vm18316_vm0, %v18317_v8 }
 0x50d   : > { %v3935_v60 = vand.u32 4294901760, %v3934_v58  ;;  %17424 = vmatprep.subr.bf16.mxu1 %v18315_v3 }
 0x50f   : > { %16004 = vmatmul.mubr.f32.vlgmr.msra.gmra.mrb[6].mxu0 %v3935_v60  ;;  %16039 = vmatmul.mubr.f32.vlgmr.msra.gmra.mrb[12].mxu1 %v3931_v53 }
 0x510   : > { %17411 = vmatpush3.bf16.msra.mxu0 %v17410_v9  ;;  %17426 = vmatpush3.bf16.msra.mxu1 %v17425_v0  ;;  %v18273_v9 = vpop.eup %18272 }
 0x511   : > { %16017 = vmatprep.mubr.msk.f32.mxu0 %vm18316_vm0, %v18317_v8  ;;  %17415 = vmatprep.subr.bf16.mxu0 %v18315_v3  ;;  %v1514_v32 = vadd.f32 1.0, %v18273_v9 }
 0x512   : > { %16052 = vmatprep.mubr.msk.f32.mxu1 %vm18316_vm0, %v18317_v8  ;;  %17430 = vmatprep.subr.bf16.mxu1 %v18315_v3 }
 0x513   : > { %16018 = vmatmul.mubr.f32.vlgmr.msra.gmra.mrb[8].mxu0 %v3932_v1  ;;  %16053 = vmatmul.mubr.f32.vlgmr.msra.gmra.mrb[14].mxu1 %v4401_v6  ;;  %18274 = vrcp.f32 %v1514_v32 }
 0x514   : > { %17417 = vmatpush3.bf16.msra.mxu0 %v17416_v29  ;;  %17432 = vmatpush3.bf16.msra.mxu1 %v17422_v61 }
 0x515   : > { %16031 = vmatprep.mubr.msk.f32.mxu0 %vm18316_vm0, %v18317_v8  ;;  %17421 = vmatprep.subr.bf16.mxu0 %v18315_v3 }
 0x516   : > { %16066 = vmatprep.mubr.msk.f32.mxu1 %vm18316_vm0, %v18317_v8  ;;  %17436 = vmatprep.subr.bf16.mxu1 %v18315_v3 }
 0x517   : > { %16032 = vmatmul.mubr.f32.vlgmr.msra.gmra.mrb[10].mxu0 %v3931_v53  ;;  %16067 = vmatmul.mubr.f32.vlgmr.msra.gmra.mrb[16].mxu1 %v4403_v62  ;;  %v4796_v53 = vrot.slane %v18889_v13, %v18895_v50 }
 0x518   : > { %17423 = vmatpush3.bf16.msra.mxu0 %v17422_v61  ;;  %17438 = vmatpush3.bf16.msra.mxu1 %v17422_v61 }
 0x519   : > { %16045 = vmatprep.mubr.msk.f32.mxu0 %vm18316_vm0, %v18317_v8  ;;  %17427 = vmatprep.subr.bf16.mxu0 %v18315_v3 }
 0x51a   : > { %16080 = vmatprep.mubr.msk.f32.mxu1 %vm18316_vm0, %v18317_v8  ;;  %17475 = vmatprep.subr.bf16.mxu1 %v18315_v3 }
 0x51b   : > { %16046 = vmatmul.mubr.f32.vlgmr.msra.gmra.mrb[12].mxu0 %v4405_v4  ;;  %16081 = vmatmul.mubr.f32.vlgmr.msra.gmra.mrb[18].mxu1 %v4401_v6 }
 0x51c   : > { %17429 = vmatpush3.bf16.msra.mxu0 %v17428_v10  ;;  %16059 = vmatprep.mubr.msk.f32.mxu0 %vm18316_vm0, %v18317_v8 }
 0x51d   : > { %17433 = vmatprep.subr.bf16.mxu0 %v18315_v3  ;;  %16165 = vmatprep.mubr.msk.f32.mxu1 %vm18316_vm0, %v18317_v8  ;;  %v18275_v1 = vpop.eup %18274 }
 0x51e   : > { %v4798_v58 = vmul.f32 %v18305_v57, %v18275_v1 }
 0x51f   : > { %16060 = vmatmul.mubr.f32.vlgmr.msra.gmra.mrb[14].mxu0 %v4402_v59 }
 0x520   : > { %17435 = vmatpush3.bf16.msra.mxu0 %v17434_v11  ;;  %16073 = vmatprep.mubr.msk.f32.mxu0 %vm18316_vm0, %v18317_v8  ;;  %v18909_v11 = vld [vmem:[%s20327_s6 + $0x8] sm:$0xff] }
 0x521   : > { %17439 = vmatprep.subr.bf16.mxu0 %v18315_v3 }
 0x523   : > { %16074 = vmatmul.mubr.f32.vlgmr.msra.gmra.mrb[16].mxu0 %v4401_v6  ;;  %v4799_v6 = vsub.f32 1.0, %v18275_v1 }
 0x524   : > { %16091 = vmatprep.mubr.msk.f32.mxu0 %vm18316_vm0, %v18317_v8 }
 0x5da   : > { %v4018_v20 = vpop.f32.mrb[8].mxu1 }
 0x5db   : > { %v16012_v26 = vpop.f32.mrb[9].mxu1 }
 0x5dc   : > { %v4841_v26 = vld [vmem:[%s20328_s7 + $0x8] sm:$0xff] }
 0x5de   : > { %v4169_v41 = vpop.f32.mrb[10].mxu1 }
 0x5df   : > { %v16026_v15 = vpop.f32.mrb[11].mxu1 }
 0x5e0   : > { %v4864_v15 = vand.u32 4294901760, %v4841_v26 }
 0x5e2   : > { %v3937_v16 = vpop.f32.mrb[6].mxu0  ;;  %v4319_v44 = vpop.f32.mrb[12].mxu1 }
 0x5e3   : > { %v4019_v21 = vadd.f32 %v4018_v20, %v3937_v16  ;;  %v16005_v23 = vpop.f32.mrb[7].mxu0  ;;  %v16040_v25 = vpop.f32.mrb[13].mxu1  ;;  %v4840_v20 = vld [vmem:[%s20328_s7] sm:$0xff]  ;;  %v4842_v16 = vld [vmem:[%s20328_s7 + $0x10] sm:$0xff] }
 0x5e4   : > { %v18950_v25 = vsub.f32 %v4841_v26, %v4864_v15 }
 0x5e6   : > { %v4094_v27 = vpop.f32.mrb[8].mxu0  ;;  %v4488_v7 = vpop.f32.mrb[14].mxu1 }
 0x5e7   : > { %v4095_v28 = vadd.f32 %v4094_v27, %v4019_v21  ;;  %v16019_v30 = vpop.f32.mrb[9].mxu0  ;;  %v16054_v17 = vpop.f32.mrb[15].mxu1  ;;  %v4867_v27 = vand.u32 4294901760, %v4842_v16 }
 0x5e9   : > { %v4170_v31 = vadd.f32 %v4169_v41, %v4095_v28  ;;  %v4861_v41 = vand.u32 4294901760, %v4840_v20  ;;  %v18953_v9 = vsub.f32 %v4842_v16, %v4867_v27 }
 0x5ea   : > { %v4246_v40 = vpop.f32.mrb[10].mxu0  ;;  %v4639_v33 = vpop.f32.mrb[16].mxu1 }
 0x5eb   : > { %v4247_v24 = vadd.f32 %v4246_v40, %v4170_v31  ;;  %v16033_v29 = vpop.f32.mrb[11].mxu0  ;;  %v16068_v34 = vpop.f32.mrb[17].mxu1  ;;  %v18946_v21 = vpack.c.bf16 %v4864_v15, %v4861_v41  ;;  %v18948_v23 = vsub.f32 %v4840_v20, %v4861_v41  ;;  %v4949_v31 = vand.u32 4294901760, %v18950_v25 }
 0x5ec   : > { %v4956_v29 = vand.u32 4294901760, %v18953_v9 }
 0x5ed   : > { %v4320_v35 = vadd.f32 %v4319_v44, %v4247_v24  ;;  %v4843_v44 = vld [vmem:[%s20328_s7 + $0x18] sm:$0xff]  ;;  %17441 = vmatpush3.bf16.msra.mxu0 %v18946_v21  ;;  %v4942_v17 = vand.u32 4294901760, %v18948_v23  ;;  %v4950_v40 = vsub.f32 %v18950_v25, %v4949_v31 }
 0x5ee   : > { %v4407_v36 = vpop.f32.mrb[12].mxu0  ;;  %v4789_v37 = vpop.f32.mrb[18].mxu1  ;;  %17442 = vmatprep.subr.bf16.mxu0 %v18315_v3 }
 0x5ef   : > { %v4408_v38 = vadd.f32 %v4407_v36, %v4320_v35  ;;  %v16047_v39 = vpop.f32.mrb[13].mxu0  ;;  %v16082_v45 = vpop.f32.mrb[19].mxu1  ;;  %v4943_v32 = vsub.f32 %v18948_v23, %v4942_v17  ;;  %v4951_v24 = vand.u32 4294901760, %v4950_v40  ;;  %v4957_v36 = vsub.f32 %v18953_v9, %v4956_v29 }
 0x5f1   : > { %v4489_v46 = vadd.f32 %v4488_v7, %v4408_v38  ;;  %v4870_v7 = vand.u32 4294901760, %v4843_v44  ;;  %v4958_v38 = vand.u32 4294901760, %v4957_v36 }
 0x5f2   : > { %v4564_v48 = vpop.f32.mrb[14].mxu0 }
 0x5f3   : > { %v4565_v47 = vadd.f32 %v4564_v48, %v4489_v46  ;;  %v16061_v49 = vpop.f32.mrb[15].mxu0  ;;  %v18956_v28 = vpack.c.bf16 %v4870_v7, %v4867_v27  ;;  %v18958_v30 = vsub.f32 %v4843_v44, %v4870_v7  ;;  %v17452_v46 = vpack.c.bf16 %v18950_v25, %v18948_v23 }
 0x5f4   : > { %v5904_v25 = vand.u32 4294901760, %v18909_v11  ;;  %v5901_v27 = vand.u32 4294901760, %v18914_v14 }
 0x5f5   : > { %v4640_v51 = vadd.f32 %v4639_v33, %v4565_v47  ;;  %17444 = vmatpush3.bf16.msra.mxu0 %v18956_v28  ;;  %v4944_v33 = vand.u32 4294901760, %v4943_v32  ;;  %v4963_v34 = vand.u32 4294901760, %v18958_v30  ;;  %v17455_v48 = vpack.c.bf16 %v18958_v30, %v18953_v9 }
 0x5f6   : > { %v4716_v52 = vpop.f32.mrb[16].mxu0  ;;  %17445 = vmatprep.subr.bf16.mxu0 %v18315_v3  ;;  %v17464_v47 = vpack.c.bf16 %v4949_v31, %v4942_v17  ;;  %v5988_v7 = vsub.f32 %v18909_v11, %v5904_v25  ;;  %v5981_v9 = vsub.f32 %v18914_v14, %v5901_v27  ;;  %v5910_v17 = vand.u32 4294901760, %v18928_v19 }
 0x5f7   : > { %v4717_v2 = vadd.f32 %v4716_v52, %v4640_v51  ;;  %v16075_v54 = vpop.f32.mrb[17].mxu0  ;;  %v17446_v35 = vpack.c.bf16 %v4951_v24, %v4944_v33  ;;  %v17467_v49 = vpack.c.bf16 %v4963_v34, %v4956_v29  ;;  %v19042_v24 = vpack.c.bf16 %v5904_v25, %v5901_v27 }
 0x5f8   : > { %v6002_v32 = vsub.f32 %v18928_v19, %v5910_v17  ;;  %v5982_v40 = vand.u32 4294901760, %v5981_v9  ;;  %v5989_v33 = vand.u32 4294901760, %v5988_v7 }
 0x5f9   : > { %v4790_v55 = vadd.f32 %v4789_v37, %v4717_v2  ;;  %v4964_v37 = vsub.f32 %v18958_v30, %v4963_v34  ;;  %v5907_v30 = vand.u32 4294901760, %v18923_v18 }
 0x5fa   : > { %v5983_v29 = vsub.f32 %v5981_v9, %v5982_v40  ;;  %v5990_v34 = vsub.f32 %v5988_v7, %v5989_v33  ;;  %v6003_v36 = vand.u32 4294901760, %v6002_v32 }
 0x5fb   : > { %v4797_v56 = vadd.f32 %v4796_v53, %v4790_v55  ;;  %v4965_v39 = vand.u32 4294901760, %v4964_v37  ;;  %v5995_v31 = vsub.f32 %v18923_v18, %v5907_v30 }
 0x5fc   : > { %v5984_v37 = vand.u32 4294901760, %v5983_v29 }
 0x5fd   : > { %v4800_v0 = vmul.f32 %v4799_v6, %v4797_v56  ;;  %v17449_v45 = vpack.c.bf16 %v4965_v39, %v4958_v38  ;;  %v4827_v6 = vsub.s32 4, %v18497_v42  ;;  %v5991_v38 = vand.u32 4294901760, %v5990_v34 }
 0x5ff   : > { %v4801_v59 = vadd.f32 %v4800_v0, %v4798_v58  ;;  %v4833_v58 = vsub.s32 5, %v18497_v42  ;;  %v4828_v0 = vrot.slane %v18889_v13, %v4827_v6 }
 0x601   : > { %v4802_v60 = vsel %vm476_vm1, %v4801_v59, 0.0 }
 0x602   : > { %4803 = vadd.xlane.f32.xlu1 %v4802_v60 }
 0x613   : > { %6391 = vrot.lane.b32.xlu1 %v18909_v11, %s18319_s27 }
 0x617   : > { %6393 = vrot.lane.b32.xlu1 %v18923_v18, %s18319_s27 }
 0x68f   : > { %v4804_v61 = vpop.xlane.xlu1 %4803 }
 0x690   : > { %v4806_v62 = vmul.f32 0.03125, %v4804_v61  ;;  %v4834_v61 = vrot.slane %v18889_v13, %v4833_v58 }
 0x692   : > { %v18901_v63 = vsub.f32 %v4801_v59, %v4806_v62 }
 0x694   : > { %v4808_v4 = vmul.f32 %v18901_v63, %v18901_v63  ;;  %v4829_v62 = vmul.f32 %v4828_v0, %v18901_v63  ;;  %v19005_v63 = vld [vmem:[%s20330_s9] sm:$0xff] }
 0x695   : > { %v19011_v23 = vrot.slane %v19005_v63, %v18500_v43 }
 0x696   : > { %v4809_v10 = vsel %vm476_vm1, %v4808_v4, 0.0 }
 0x697   : > { %4810 = vadd.xlane.f32.xlu0 %v4809_v10  ;;  %6402 = vrot.lane.b32.xlu1 %v19011_v23, %s18319_s27 }
 0x6ad   : > { %6389 = vrot.lane.b32.xlu0 %v18914_v14, %s18319_s27 }
 0x6b1   : > { %6395 = vrot.lane.b32.xlu0 %v18928_v19, %s18319_s27 }
 0x724   : > { %v4811_v51 = vpop.xlane.xlu0 %4810 }
 0x725   : > { %v4812_v52 = vmul.f32 0.032258064, %v4811_v51  ;;  %v17563_v51 = vpack.c.bf16 %v6002_v32, %v5995_v31 }
 0x727   : > { %18276 = vrsqrt.f32 %v4812_v52  ;;  %vm4815_vm6 = vcmp.eq.f32.partialorder %v4812_v52, inf  ;;  %v4818_v54 = vand.u32 2147483648, %v4812_v52  ;;  %vm4817_vm7 = vcmp.eq.f32.partialorder %v4812_v52, 0.0 }
 0x731   : > { %v18277_v2 = vpop.eup %18276 }
 0x732   : > { %v4814_v53 = vmul.f32 %v18277_v2, %v4812_v52  ;;  %v6390_v2 = vpop.permute.xlu0 %6389 }
 0x734   : > { %v4816_v1 = vsel %vm4815_vm6, %v4812_v52, %v4814_v53  ;;  %v17572_v52 = vpack.c.bf16 %v5989_v33, %v5982_v40  ;;  %v6392_v53 = vpop.permute.xlu1 %6391 }
 0x735   : > { %v4819_v55 = vsel %vm4817_vm7, %v4818_v54, %v4816_v1  ;;  %v454_v54 = vld [vmem:[%s448_s23] sm:$0xff] }
 0x736   : > { %v4820_v56 = vadd.f32 1e-06, %v4819_v55  ;;  %v6406_v55 = vsel %vm476_vm1, %v454_v54, 0  ;;  %v6396_v0 = vpop.permute.xlu0 %6395 }
 0x738   : > { %18278 = vrcp.f32 %v4820_v56 }
 0x742   : > { %v18279_v57 = vpop.eup %18278 }
 0x743   : > { %v4822_v59 = vmul.f32 %v18279_v57, %v4820_v56  ;;  %v6409_v56 = vand.u32 4294901760, %v6390_v2 }
 0x745   : > { %v4823_v60 = vsub.f32 2.0, %v4822_v59  ;;  %v6394_v59 = vpop.permute.xlu1 %6393 }
 0x747   : > { %v4824_v4 = vmul.f32 %v18279_v57, %v4823_v60  ;;  %v6412_v57 = vand.u32 4294901760, %v6392_v53  ;;  %v19081_v60 = vand.u32 4294901760, %v6406_v55 }
 0x749   : > { %v4830_v10 = vmul.f32 %v4829_v62, %v4824_v4  ;;  %v6496_v62 = vsub.f32 %v6392_v53, %v6412_v57  ;;  %v6418_v4 = vand.u32 4294901760, %v6396_v0  ;;  %v19090_v27 = vpack.c.bf16 %v6412_v57, %v6409_v56 }
 0x74b   : > { %v18983_v20 = vadd.f32 %v4834_v61, %v4830_v10  ;;  %v6489_v61 = vsub.f32 %v6390_v2, %v6409_v56  ;;  %v6415_v10 = vand.u32 4294901760, %v6394_v59 }
 0x74d   : > { %v4858_v26 = vsel %vm476_vm1, %v18983_v20, 0 }
 0x74e   : > { %v18987_v41 = vand.u32 4294901760, %v4858_v26 }
 0x750   : > { %v18990_v15 = vsub.f32 %v4858_v26, %v18987_v41  ;;  %v6478_v26 = vsub.f32 %v6406_v55, %v19081_v60  ;;  %v4849_v55 = vld [vmem:[%s20329_s8 + $0x28] sm:$0xff] }
 0x751   : > { %v5369_v57 = vand.u32 4294901760, %v4849_v55 }
 0x752   : > { %v18993_v16 = vand.u32 4294901760, %v18990_v15  ;;  %v6479_v25 = vand.u32 4294901760, %v6478_v26 }
 0x754   : > { %v4932_v13 = vsub.f32 %v18990_v15, %v18993_v16 }
 0x756   : > { %v4933_v44 = vand.u32 4294901760, %v4932_v13  ;;  %v6510_v13 = vsub.f32 %v6396_v0, %v6418_v4 }
 0x758   : > { %16092 = vmatmul.mubr.f32.vlgmr.msra.gmra.mrb[18].mxu0 %v4933_v44 }
 0x759   : > { %17447 = vmatpush3.bf16.msra.mxu0 %v17446_v35  ;;  %16102 = vmatprep.mubr.msk.f32.mxu0 %vm18316_vm0, %v18317_v8  ;;  %v5996_v35 = vand.u32 4294901760, %v5995_v31 }
 0x75a   : > { %17448 = vmatprep.subr.bf16.mxu0 %v18315_v3 }
 0x75b   : > { %v5997_v39 = vsub.f32 %v5995_v31, %v5996_v35  ;;  %v17575_v1 = vpack.c.bf16 %v6003_v36, %v5996_v35  ;;  %v6480_v31 = vsub.f32 %v6478_v26, %v6479_v25 }
 0x75d   : > { %17450 = vmatpush3.bf16.msra.mxu0 %v17449_v45  ;;  %v6004_v45 = vsub.f32 %v6002_v32, %v6003_v36  ;;  %v19095_v32 = vpack.c.bf16 %v6418_v4, %v6415_v10  ;;  %v6481_v34 = vand.u32 4294901760, %v6480_v31  ;;  %v4851_v4 = vld [vmem:[%s20329_s8 + $0x38] sm:$0xff] }
 0x75e   : > { %17451 = vmatprep.subr.bf16.mxu0 %v18315_v3 }
 0x760   : > { %16103 = vmatmul.mubr.f32.vlgmr.msra.gmra.mrb[18].mxu0 %v18987_v41 }
 0x761   : > { %17453 = vmatpush3.bf16.msra.mxu0 %v17452_v46  ;;  %16113 = vmatprep.mubr.msk.f32.mxu0 %vm18316_vm0, %v18317_v8  ;;  %v5998_v46 = vand.u32 4294901760, %v5997_v39 }
 0x762   : > { %17454 = vmatprep.subr.bf16.mxu0 %v18315_v3 }
 0x765   : > { %17456 = vmatpush3.bf16.msra.mxu0 %v17455_v48  ;;  %v6005_v48 = vand.u32 4294901760, %v6004_v45  ;;  %v4844_v45 = vld [vmem:[%s20329_s8] sm:$0xff] }
 0x766   : > { %17457 = vmatprep.subr.bf16.mxu0 %v18315_v3 }
 0x768   : > { %16114 = vmatmul.mubr.f32.vlgmr.msra.gmra.mrb[18].mxu0 %v18990_v15 }
 0x769   : > { %17459 = vmatpush3.bf16.msra.mxu0 %v18946_v21  ;;  %16124 = vmatprep.mubr.msk.f32.mxu0 %vm18316_vm0, %v18317_v8 }
 0x76a   : > { %17460 = vmatprep.subr.bf16.mxu0 %v18315_v3 }
 0x76d   : > { %17462 = vmatpush3.bf16.msra.mxu0 %v18956_v28 }
 0x76e   : > { %17463 = vmatprep.subr.bf16.mxu0 %v18315_v3 }
 0x770   : > { %16125 = vmatmul.mubr.f32.vlgmr.msra.gmra.mrb[18].mxu0 %v18993_v16 }
 0x771   : > { %17465 = vmatpush3.bf16.msra.mxu0 %v17464_v47  ;;  %16135 = vmatprep.mubr.msk.f32.mxu0 %vm18316_vm0, %v18317_v8  ;;  %v17557_v47 = vpack.c.bf16 %v6005_v48, %v5998_v46  ;;  %v5354_v46 = vand.u32 4294901760, %v4844_v45 }
 0x772   : > { %17466 = vmatprep.subr.bf16.mxu0 %v18315_v3 }
 0x773   : > { %v19152_v0 = vsub.f32 %v4844_v45, %v5354_v46 }
 0x775   : > { %17468 = vmatpush3.bf16.msra.mxu0 %v17467_v49  ;;  %v17560_v49 = vpack.c.bf16 %v5988_v7, %v5981_v9 }
 0x776   : > { %17469 = vmatprep.subr.bf16.mxu0 %v18315_v3 }
 0x778   : > { %16136 = vmatmul.mubr.f32.vlgmr.msra.gmra.mrb[18].mxu0 %v18987_v41 }
 0x779   : > { %17471 = vmatpush3.bf16.msra.mxu0 %v18946_v21  ;;  %16146 = vmatprep.mubr.msk.f32.mxu0 %vm18316_vm0, %v18317_v8  ;;  %v19047_v21 = vpack.c.bf16 %v5910_v17, %v5907_v30  ;;  %v6511_v30 = vand.u32 4294901760, %v6510_v13 }
 0x77a   : > { %17472 = vmatprep.subr.bf16.mxu0 %v18315_v3 }
 0x77d   : > { %17474 = vmatpush3.bf16.msra.mxu0 %v18956_v28  ;;  %v17554_v28 = vpack.c.bf16 %v5991_v38, %v5984_v37  ;;  %v17596_v37 = vpack.c.bf16 %v6496_v62, %v6489_v61 }
 0x77e   : > { %17547 = vmatprep.subr.bf16.mxu0 %v18315_v3 }
 0x780   : > { %16147 = vmatmul.mubr.f32.vlgmr.msra.gmra.mrb[18].mxu0 %v18987_v41 }
 0x781   : > { %17549 = vmatpush3.bf16.msra.mxu0 %v19042_v24  ;;  %16271 = vmatprep.mubr.msk.f32.mxu0 %vm18316_vm0, %v18317_v8 }
 0x782   : > { %17550 = vmatprep.subr.bf16.mxu0 %v18315_v3 }
 0x785   : > { %17552 = vmatpush3.bf16.msra.mxu0 %v19047_v21 }
 0x786   : > { %17553 = vmatprep.subr.bf16.mxu0 %v18315_v3 }
 0x788   : > { %16272 = vmatmul.mubr.f32.vlgmr.msra.gmra.mrb[20].mxu0 %v4933_v44  ;;  %v6503_v44 = vsub.f32 %v6394_v59, %v6415_v10 }
 0x789   : > { %17555 = vmatpush3.bf16.msra.mxu0 %v17554_v28  ;;  %16282 = vmatprep.mubr.msk.f32.mxu0 %vm18316_vm0, %v18317_v8  ;;  %v4845_v28 = vld [vmem:[%s20329_s8 + $0x8] sm:$0xff] }
 0x78a   : > { %17556 = vmatprep.subr.bf16.mxu0 %v18315_v3  ;;  %v6504_v17 = vand.u32 4294901760, %v6503_v44  ;;  %v17599_v38 = vpack.c.bf16 %v6510_v13, %v6503_v44  ;;  %v5357_v48 = vand.u32 4294901760, %v4845_v28 }
 0x78c   : > { %v6505_v29 = vsub.f32 %v6503_v44, %v6504_v17  ;;  %v19154_v59 = vsub.f32 %v4845_v28, %v5357_v48 }
 0x78d   : > { %17558 = vmatpush3.bf16.msra.mxu0 %v17557_v47  ;;  %v19127_v47 = vpack.c.bf16 %v5357_v48, %v5354_v46 }
 0x78e   : > { %17559 = vmatprep.subr.bf16.mxu0 %v18315_v3  ;;  %v6506_v35 = vand.u32 4294901760, %v6505_v29 }
 0x78f   : > { %17477 = vmatpush3.bf16.msra.mxu1 %v19127_v47 }
 0x790   : > { %16283 = vmatmul.mubr.f32.vlgmr.msra.gmra.mrb[20].mxu0 %v18987_v41  ;;  %17478 = vmatprep.subr.bf16.mxu1 %v18315_v3 }
 0x791   : > { %17561 = vmatpush3.bf16.msra.mxu0 %v17560_v49  ;;  %16293 = vmatprep.mubr.msk.f32.mxu0 %vm18316_vm0, %v18317_v8  ;;  %v17611_v49 = vpack.c.bf16 %v6511_v30, %v6504_v17 }
 0x792   : > { %17562 = vmatprep.subr.bf16.mxu0 %v18315_v3 }
 0x795   : > { %17564 = vmatpush3.bf16.msra.mxu0 %v17563_v51  ;;  %v4846_v51 = vld [vmem:[%s20329_s8 + $0x10] sm:$0xff] }
 0x796   : > { %17565 = vmatprep.subr.bf16.mxu0 %v18315_v3  ;;  %v5360_v2 = vand.u32 4294901760, %v4846_v51 }
 0x798   : > { %16294 = vmatmul.mubr.f32.vlgmr.msra.gmra.mrb[20].mxu0 %v18990_v15  ;;  %v6490_v15 = vand.u32 4294901760, %v6489_v61 }
 0x799   : > { %17567 = vmatpush3.bf16.msra.mxu0 %v19042_v24  ;;  %16304 = vmatprep.mubr.msk.f32.mxu0 %vm18316_vm0, %v18317_v8 }
 0x79a   : > { %17568 = vmatprep.subr.bf16.mxu0 %v18315_v3  ;;  %v6491_v7 = vsub.f32 %v6489_v61, %v6490_v15 }
 0x79c   : > { %v6492_v40 = vand.u32 4294901760, %v6491_v7 }
 0x79d   : > { %17570 = vmatpush3.bf16.msra.mxu0 %v19047_v21 }
 0x79e   : > { %17571 = vmatprep.subr.bf16.mxu0 %v18315_v3 }
 0x7a0   : > { %16305 = vmatmul.mubr.f32.vlgmr.msra.gmra.mrb[20].mxu0 %v18993_v16  ;;  %v6497_v16 = vand.u32 4294901760, %v6496_v62 }
 0x7a1   : > { %17573 = vmatpush3.bf16.msra.mxu0 %v17572_v52  ;;  %16315 = vmatprep.mubr.msk.f32.mxu0 %vm18316_vm0, %v18317_v8  ;;  %v4847_v52 = vld [vmem:[%s20329_s8 + $0x18] sm:$0xff] }
 0x7a2   : > { %17574 = vmatprep.subr.bf16.mxu0 %v18315_v3  ;;  %v6498_v9 = vsub.f32 %v6496_v62, %v6497_v16  ;;  %v17608_v39 = vpack.c.bf16 %v6497_v16, %v6490_v15  ;;  %v5363_v53 = vand.u32 4294901760, %v4847_v52  ;;  %v4850_v62 = vld [vmem:[%s20329_s8 + $0x30] sm:$0xff]  ;;  %v5439_v15 = vand.u32 4294901760, %v19152_v0 }
 0x7a3   : > { %v5372_v10 = vand.u32 4294901760, %v4850_v62  ;;  %v5446_v16 = vand.u32 4294901760, %v19154_v59 }
 0x7a4   : > { %v6499_v33 = vand.u32 4294901760, %v6498_v9  ;;  %v19138_v54 = vpack.c.bf16 %v5363_v53, %v5360_v2  ;;  %v19171_v44 = vsub.f32 %v4847_v52, %v5363_v53  ;;  %v5440_v17 = vsub.f32 %v19152_v0, %v5439_v15 }
 0x7a5   : > { %17576 = vmatpush3.bf16.msra.mxu0 %v17575_v1  ;;  %v4848_v1 = vld [vmem:[%s20329_s8 + $0x20] sm:$0xff]  ;;  %v19180_v9 = vsub.f32 %v4850_v62, %v5372_v10  ;;  %v5447_v31 = vsub.f32 %v19154_v59, %v5446_v16 }
 0x7a6   : > { %17577 = vmatprep.subr.bf16.mxu0 %v18315_v3  ;;  %v17590_v36 = vpack.c.bf16 %v6499_v33, %v6492_v40  ;;  %17480 = vmatpush3.bf16.msra.mxu1 %v19138_v54  ;;  %v5366_v56 = vand.u32 4294901760, %v4848_v1  ;;  %v5460_v33 = vand.u32 4294901760, %v19171_v44 }
 0x7a7   : > { %17481 = vmatprep.subr.bf16.mxu1 %v18315_v3  ;;  %v5481_v46 = vand.u32 4294901760, %v19180_v9 }
 0x7a8   : > { %16316 = vmatmul.mubr.f32.vlgmr.msra.gmra.mrb[20].mxu0 %v18987_v41  ;;  %v19157_v61 = vpack.c.bf16 %v5369_v57, %v5366_v56 }
 0x7a9   : > { %17579 = vmatpush3.bf16.msra.mxu0 %v19042_v24  ;;  %16326 = vmatprep.mubr.msk.f32.mxu0 %vm18316_vm0, %v18317_v8  ;;  %v6512_v24 = vsub.f32 %v6510_v13, %v6511_v30  ;;  %v19169_v13 = vsub.f32 %v4846_v51, %v5360_v2  ;;  %v5482_v51 = vsub.f32 %v19180_v9, %v5481_v46 }
 0x7aa   : > { %17580 = vmatprep.subr.bf16.mxu0 %v18315_v3  ;;  %17483 = vmatpush3.bf16.msra.mxu1 %v19157_v61 }
 0x7ab   : > { %17484 = vmatprep.subr.bf16.mxu1 %v18315_v3  ;;  %v5453_v40 = vand.u32 4294901760, %v19169_v13  ;;  %v5483_v2 = vand.u32 4294901760, %v5482_v51 }
 0x7ad   : > { %17582 = vmatpush3.bf16.msra.mxu0 %v19047_v21  ;;  %v5454_v29 = vsub.f32 %v19169_v13, %v5453_v40 }
 0x7ae   : > { %17583 = vmatprep.subr.bf16.mxu0 %v18315_v3 }
 0x7b0   : > { %16327 = vmatmul.mubr.f32.vlgmr.msra.gmra.mrb[20].mxu0 %v18987_v41  ;;  %v6513_v41 = vand.u32 4294901760, %v6512_v24  ;;  %v5448_v24 = vand.u32 4294901760, %v5447_v31  ;;  %v4856_v31 = vrot.slane %v19005_v63, %v18619_v5 }
 0x7b1   : > { %17585 = vmatpush3.bf16.msra.mxu0 %v19090_v27  ;;  %16337 = vmatprep.mubr.msk.f32.mxu0 %vm18316_vm0, %v18317_v8 }
 0x7b2   : > { %17586 = vmatprep.subr.bf16.mxu0 %v18315_v3  ;;  %v17593_v21 = vpack.c.bf16 %v6513_v41, %v6506_v35  ;;  %v5455_v35 = vand.u32 4294901760, %v5454_v29 }
 0x7b5   : > { %17588 = vmatpush3.bf16.msra.mxu0 %v19095_v32 }
 0x7b6   : > { %17589 = vmatprep.subr.bf16.mxu0 %v18315_v3 }
 0x7b8   : > { %16338 = vmatmul.mubr.f32.vlgmr.msra.gmra.mrb[22].mxu0 %v6481_v34  ;;  %v5461_v34 = vsub.f32 %v19171_v44, %v5460_v33 }
 0x7b9   : > { %17591 = vmatpush3.bf16.msra.mxu0 %v17590_v36  ;;  %16348 = vmatprep.mubr.msk.f32.mxu0 %vm18316_vm0, %v18317_v8 }
 0x7ba   : > { %17592 = vmatprep.subr.bf16.mxu0 %v18315_v3 }
 0x7bd   : > { %17594 = vmatpush3.bf16.msra.mxu0 %v17593_v21 }
 0x7be   : > { %17595 = vmatprep.subr.bf16.mxu0 %v18315_v3 }
 0x7c0   : > { %16349 = vmatmul.mubr.f32.vlgmr.msra.gmra.mrb[22].mxu0 %v19081_v60 }
 0x7c1   : > { %17597 = vmatpush3.bf16.msra.mxu0 %v17596_v37  ;;  %16359 = vmatprep.mubr.msk.f32.mxu0 %vm18316_vm0, %v18317_v8 }
 0x7c2   : > { %17598 = vmatprep.subr.bf16.mxu0 %v18315_v3 }
 0x7c5   : > { %17600 = vmatpush3.bf16.msra.mxu0 %v17599_v38 }
 0x7c6   : > { %17601 = vmatprep.subr.bf16.mxu0 %v18315_v3 }
 0x7c8   : > { %16360 = vmatmul.mubr.f32.vlgmr.msra.gmra.mrb[22].mxu0 %v6478_v26  ;;  %v5375_v26 = vand.u32 4294901760, %v4851_v4 }
 0x7c9   : > { %17603 = vmatpush3.bf16.msra.mxu0 %v19090_v27  ;;  %16370 = vmatprep.mubr.msk.f32.mxu0 %vm18316_vm0, %v18317_v8 }
 0x7ca   : > { %17604 = vmatprep.subr.bf16.mxu0 %v18315_v3  ;;  %v19178_v7 = vpack.c.bf16 %v5375_v26, %v5372_v10  ;;  %v19182_v30 = vsub.f32 %v4851_v4, %v5375_v26  ;;  %v17524_v4 = vpack.c.bf16 %v5446_v16, %v5439_v15  ;;  %v17527_v10 = vpack.c.bf16 %v5460_v33, %v5453_v40 }
 0x7cc   : > { %17486 = vmatpush3.bf16.msra.mxu1 %v19178_v7  ;;  %v5488_v48 = vand.u32 4294901760, %v19182_v30  ;;  %v17509_v62 = vpack.c.bf16 %v19182_v30, %v19180_v9 }
 0x7cd   : > { %17606 = vmatpush3.bf16.msra.mxu0 %v19095_v32  ;;  %17487 = vmatprep.subr.bf16.mxu1 %v18315_v3 }
 0x7ce   : > { %17607 = vmatprep.subr.bf16.mxu0 %v18315_v3  ;;  %v5489_v52 = vsub.f32 %v19182_v30, %v5488_v48 }
 0x7d0   : > { %16371 = vmatmul.mubr.f32.vlgmr.msra.gmra.mrb[22].mxu0 %v6479_v25  ;;  %v19173_v25 = vsub.f32 %v4848_v1, %v5366_v56  ;;  %v5490_v53 = vand.u32 4294901760, %v5489_v52  ;;  %v17503_v56 = vpack.c.bf16 %v19171_v44, %v19169_v13 }
 0x7d1   : > { %17609 = vmatpush3.bf16.msra.mxu0 %v17608_v39  ;;  %16381 = vmatprep.mubr.msk.f32.mxu0 %vm18316_vm0, %v18317_v8 }
 0x7d2   : > { %17610 = vmatprep.subr.bf16.mxu0 %v18315_v3  ;;  %v5467_v36 = vand.u32 4294901760, %v19173_v25  ;;  %v17497_v1 = vpack.c.bf16 %v5490_v53, %v5483_v2 }
 0x7d4   : > { %v5468_v38 = vsub.f32 %v19173_v25, %v5467_v36 }
 0x7d5   : > { %17612 = vmatpush3.bf16.msra.mxu0 %v17611_v49 }
 0x7d6   : > { %17613 = vmatprep.subr.bf16.mxu0 %v18315_v3  ;;  %v5469_v45 = vand.u32 4294901760, %v5468_v38 }
 0x7d8   : > { %16382 = vmatmul.mubr.f32.vlgmr.msra.gmra.mrb[22].mxu0 %v19081_v60 }
 0x7d9   : > { %17615 = vmatpush3.bf16.msra.mxu0 %v19090_v27  ;;  %16392 = vmatprep.mubr.msk.f32.mxu0 %vm18316_vm0, %v18317_v8  ;;  %v19175_v27 = vsub.f32 %v4849_v55, %v5369_v57  ;;  %v17500_v55 = vpack.c.bf16 %v19154_v59, %v19152_v0 }
 0x7da   : > { %17616 = vmatprep.subr.bf16.mxu0 %v18315_v3 }
 0x7db   : > { %v5474_v21 = vand.u32 4294901760, %v19175_v27  ;;  %v17506_v57 = vpack.c.bf16 %v19175_v27, %v19173_v25 }
 0x7dd   : > { %17618 = vmatpush3.bf16.msra.mxu0 %v19095_v32  ;;  %v5441_v32 = vand.u32 4294901760, %v5440_v17  ;;  %v5475_v39 = vsub.f32 %v19175_v27, %v5474_v21  ;;  %v17530_v26 = vpack.c.bf16 %v5474_v21, %v5467_v36  ;;  %v17533_v17 = vpack.c.bf16 %v5488_v48, %v5481_v46 }
 0x7de   : > { %16455 = vmatprep.subr.mxu0 %v18317_v8 }
 0x7df   : > { %v17488_v41 = vpack.c.bf16 %v5448_v24, %v5441_v32  ;;  %v5476_v28 = vand.u32 4294901760, %v5475_v39 }
 0x7e0   : > { %16393 = vmatmul.mubr.f32.vlgmr.msra.gmra.mrb[22].mxu0 %v19081_v60  ;;  %v5462_v60 = vand.u32 4294901760, %v5461_v34 }
 0x7e1   : > { %16457 = vmatprep.mubr.msk.f32.mxu0 %vm18316_vm0, %v18317_v8  ;;  %v17494_v49 = vpack.c.bf16 %v5476_v28, %v5469_v45 }
 0x7e2   : > { %v17491_v37 = vpack.c.bf16 %v5462_v60, %v5455_v35 }
 0x853   : > { %v5341_v32 = vpop.f32.mrb[18].mxu0 }
 0x854   : > { %v17984_v24 = vadd.f32 %v5341_v32, %v4856_v31  ;;  %v16148_v29 = vpop.f32.mrb[19].mxu0 }
 0x856   : > { %v5345_v0 = vmax.f32 %v17984_v24, 0.0 }
 0x858   : > { %v5351_v59 = vsel %vm970_vm3, %v5345_v0, 0 }
 0x859   : > { %v19215_v13 = vand.u32 4294901760, %v5351_v59 }
 0x85b   : > { %v5427_v44 = vsub.f32 %v5351_v59, %v19215_v13 }
 0x85d   : > { %v5428_v25 = vand.u32 4294901760, %v5427_v44 }
 0x85f   : > { %v5429_v27 = vsub.f32 %v5427_v44, %v5428_v25 }
 0x861   : > { %v5430_v9 = vand.u32 4294901760, %v5429_v27 }
 0x863   : > { %16166 = vmatmul.mubr.f32.vlgmr.msra.gmra.mrb[20].mxu1 %v5430_v9 }
 0x864   : > { %17489 = vmatpush3.bf16.msra.mxu1 %v17488_v41  ;;  %16184 = vmatprep.mubr.msk.f32.mxu1 %vm18316_vm0, %v18317_v8 }
 0x865   : > { %17490 = vmatprep.subr.bf16.mxu1 %v18315_v3 }
 0x868   : > { %17492 = vmatpush3.bf16.msra.mxu1 %v17491_v37 }
 0x869   : > { %17493 = vmatprep.subr.bf16.mxu1 %v18315_v3 }
 0x86c   : > { %17495 = vmatpush3.bf16.msra.mxu1 %v17494_v49 }
 0x86d   : > { %17496 = vmatprep.subr.bf16.mxu1 %v18315_v3 }
 0x870   : > { %17498 = vmatpush3.bf16.msra.mxu1 %v17497_v1 }
 0x871   : > { %17499 = vmatprep.subr.bf16.mxu1 %v18315_v3 }
 0x873   : > { %16185 = vmatmul.mubr.f32.vlgmr.msra.gmra.mrb[20].mxu1 %v19215_v13 }
 0x874   : > { %17501 = vmatpush3.bf16.msra.mxu1 %v17500_v55  ;;  %16203 = vmatprep.mubr.msk.f32.mxu1 %vm18316_vm0, %v18317_v8 }
 0x875   : > { %17502 = vmatprep.subr.bf16.mxu1 %v18315_v3 }
 0x878   : > { %17504 = vmatpush3.bf16.msra.mxu1 %v17503_v56 }
 0x879   : > { %17505 = vmatprep.subr.bf16.mxu1 %v18315_v3 }
 0x87c   : > { %17507 = vmatpush3.bf16.msra.mxu1 %v17506_v57 }
 0x87d   : > { %17508 = vmatprep.subr.bf16.mxu1 %v18315_v3 }
 0x880   : > { %17510 = vmatpush3.bf16.msra.mxu1 %v17509_v62 }
 0x881   : > { %17511 = vmatprep.subr.bf16.mxu1 %v18315_v3 }
 0x883   : > { %16204 = vmatmul.mubr.f32.vlgmr.msra.gmra.mrb[20].mxu1 %v5427_v44  ;;  %v6381_v63 = vpop.f32.mrb[20].mxu0 }
 0x884   : > { %v17986_v15 = vadd.f32 %v6381_v63, %v19011_v23  ;;  %17513 = vmatpush3.bf16.msra.mxu1 %v19127_v47  ;;  %v16328_v16 = vpop.f32.mrb[21].mxu0  ;;  %16222 = vmatprep.mubr.msk.f32.mxu1 %vm18316_vm0, %v18317_v8 }
 0x885   : > { %17514 = vmatprep.subr.bf16.mxu1 %v18315_v3 }
 0x886   : > { %7811 = vrot.lane.b32.xlu0 %v17986_v15, %s18320_s28  ;;  %v6894_v23 = vsel %vm2015_vm2, %v17986_v15, 0 }
 0x887   : > { %v6965_v30 = vand.u32 4294901760, %v6894_v23 }
 0x888   : > { %17516 = vmatpush3.bf16.msra.mxu1 %v19138_v54 }
 0x889   : > { %17517 = vmatprep.subr.bf16.mxu1 %v18315_v3  ;;  %v6966_v40 = vsub.f32 %v6894_v23, %v6965_v30 }
 0x88b   : > { %v6967_v33 = vand.u32 4294901760, %v6966_v40 }
 0x88c   : > { %17519 = vmatpush3.bf16.msra.mxu1 %v19157_v61 }
 0x88d   : > { %17520 = vmatprep.subr.bf16.mxu1 %v18315_v3 }
 0x890   : > { %17522 = vmatpush3.bf16.msra.mxu1 %v19178_v7 }
 0x891   : > { %17523 = vmatprep.subr.bf16.mxu1 %v18315_v3 }
 0x893   : > { %16223 = vmatmul.mubr.f32.vlgmr.msra.gmra.mrb[20].mxu1 %v5428_v25 }
 0x894   : > { %17525 = vmatpush3.bf16.msra.mxu1 %v17524_v4  ;;  %16241 = vmatprep.mubr.msk.f32.mxu1 %vm18316_vm0, %v18317_v8 }
 0x895   : > { %17526 = vmatprep.subr.bf16.mxu1 %v18315_v3 }
 0x898   : > { %17528 = vmatpush3.bf16.msra.mxu1 %v17527_v10 }
 0x899   : > { %17529 = vmatprep.subr.bf16.mxu1 %v18315_v3 }
 0x89c   : > { %17531 = vmatpush3.bf16.msra.mxu1 %v17530_v26 }
 0x89d   : > { %17532 = vmatprep.subr.bf16.mxu1 %v18315_v3 }
 0x8a0   : > { %17534 = vmatpush3.bf16.msra.mxu1 %v17533_v17 }
 0x8a1   : > { %17535 = vmatprep.subr.bf16.mxu1 %v18315_v3 }
 0x8a3   : > { %16242 = vmatmul.mubr.f32.vlgmr.msra.gmra.mrb[20].mxu1 %v19215_v13 }
 0x8a4   : > { %17537 = vmatpush3.bf16.msra.mxu1 %v19127_v47  ;;  %16260 = vmatprep.mubr.msk.f32.mxu1 %vm18316_vm0, %v18317_v8  ;;  %v6403_v47 = vpop.permute.xlu1 %6402 }
 0x8a5   : > { %17538 = vmatprep.subr.bf16.mxu1 %v18315_v3 }
 0x8a8   : > { %17540 = vmatpush3.bf16.msra.mxu1 %v19138_v54 }
 0x8a9   : > { %17541 = vmatprep.subr.bf16.mxu1 %v18315_v3 }
 0x8ac   : > { %17543 = vmatpush3.bf16.msra.mxu1 %v19157_v61 }
 0x8ad   : > { %17544 = vmatprep.subr.bf16.mxu1 %v18315_v3 }
 0x8b0   : > { %17546 = vmatpush3.bf16.msra.mxu1 %v19178_v7  ;;  %v6968_v7 = vsub.f32 %v6966_v40, %v6967_v33 }
 0x8b1   : > { %16395 = vmatprep.subr.mxu1 %v18317_v8 }
 0x8b2   : > { %v6969_v36 = vand.u32 4294901760, %v6968_v7 }
 0x8b3   : > { %16261 = vmatmul.mubr.f32.vlgmr.msra.gmra.mrb[20].mxu1 %v19215_v13  ;;  %v6889_v34 = vpop.f32.mrb[22].mxu0 }
 0x8b4   : > { %v19262_v41 = vadd.f32 %v6889_v34, %v6403_v47  ;;  %v16394_v54 = vpop.f32.mrb[23].mxu0  ;;  %16397 = vmatprep.mubr.msk.f32.mxu1 %vm18316_vm0, %v18317_v8 }
 0x8b6   : > { %7813 = vrot.lane.b32.xlu1 %v19262_v41, %s18320_s28  ;;  %v6897_v61 = vsel %vm2015_vm2, %v19262_v41, 0 }
 0x8b7   : > { %v6900_v35 = vand.u32 4294901760, %v6897_v61 }
 0x8b9   : > { %16396 = vmatpush3.xpose.msra.mxu1 %v6900_v35  ;;  %v6977_v60 = vsub.f32 %v6897_v61, %v6900_v35 }
 0x8ba   : > { %16400 = vmatprep.subr.mxu1 %v18317_v8 }
 0x8bb   : > { %v6978_v21 = vand.u32 4294901760, %v6977_v60 }
 0x8bc   : > { %16398 = vmatmul.mubr.f32.vlgmr.msra.gmra.mrb[22].mxu1 %v6969_v36 }
 0x8bd   : > { %v6979_v37 = vsub.f32 %v6977_v60, %v6978_v21  ;;  %16402 = vmatprep.mubr.msk.f32.mxu1 %vm18316_vm0, %v18317_v8 }
 0x8bf   : > { %v6980_v38 = vand.u32 4294901760, %v6979_v37 }
 0x8c1   : > { %16401 = vmatpush3.xpose.msra.mxu1 %v6980_v38 }
 0x8c2   : > { %16405 = vmatprep.subr.mxu1 %v18317_v8 }
 0x8c4   : > { %16403 = vmatmul.mubr.f32.vlgmr.msra.gmra.mrb[22].mxu1 %v6965_v30 }
 0x8c5   : > { %16406 = vmatpush3.xpose.msra.mxu1 %v6977_v60  ;;  %16407 = vmatprep.mubr.msk.f32.mxu1 %vm18316_vm0, %v18317_v8 }
 0x8c6   : > { %16410 = vmatprep.subr.mxu1 %v18317_v8 }
 0x8cc   : > { %16408 = vmatmul.mubr.f32.vlgmr.msra.gmra.mrb[22].mxu1 %v6966_v40 }
 0x8cd   : > { %16411 = vmatpush3.xpose.msra.mxu1 %v6900_v35  ;;  %16412 = vmatprep.mubr.msk.f32.mxu1 %vm18316_vm0, %v18317_v8 }
 0x8ce   : > { %16415 = vmatprep.subr.mxu1 %v18317_v8 }
 0x8d4   : > { %16413 = vmatmul.mubr.f32.vlgmr.msra.gmra.mrb[22].mxu1 %v6967_v33 }
 0x8d5   : > { %16416 = vmatpush3.xpose.msra.mxu1 %v6978_v21  ;;  %16417 = vmatprep.mubr.msk.f32.mxu1 %vm18316_vm0, %v18317_v8 }
 0x8d6   : > { %16420 = vmatprep.subr.mxu1 %v18317_v8 }
 0x8dc   : > { %16418 = vmatmul.mubr.f32.vlgmr.msra.gmra.mrb[22].mxu1 %v6965_v30 }
 0x8dd   : > { %16421 = vmatpush3.xpose.msra.mxu1 %v6900_v35  ;;  %16422 = vmatprep.mubr.msk.f32.mxu1 %vm18316_vm0, %v18317_v8 }
 0x8de   : > { %16425 = vmatprep.subr.mxu1 %v18317_v8 }
 0x8e4   : > { %16423 = vmatmul.mubr.f32.vlgmr.msra.gmra.mrb[22].mxu1 %v6965_v30 }
 0x8e5   : > { %16427 = vmatprep.mubr.msk.f32.mxu1 %vm18316_vm0, %v18317_v8 }
 0x8f8   : > { %v7812_v39 = vpop.permute.xlu0 %7811 }
 0x8f9   : > { %v7815_v45 = vsel %vm2015_vm2, %v7812_v39, 0 }
 0x8fa   : > { %v7885_v28 = vand.u32 4294901760, %v7815_v45 }
 0x8fc   : > { %v7886_v46 = vsub.f32 %v7815_v45, %v7885_v28 }
 0x8fe   : > { %v7887_v48 = vand.u32 4294901760, %v7886_v46 }
 0x900   : > { %v7888_v51 = vsub.f32 %v7886_v46, %v7887_v48 }
 0x902   : > { %v7889_v1 = vand.u32 4294901760, %v7888_v51 }
 0x928   : > { %v7814_v49 = vpop.permute.xlu1 %7813 }
 0x929   : > { %v7817_v52 = vsel %vm2015_vm2, %v7814_v49, 0 }
 0x92a   : > { %v7820_v2 = vand.u32 4294901760, %v7817_v52 }
 0x92c   : > { %v7897_v53 = vsub.f32 %v7817_v52, %v7820_v2  ;;  %16456 = vmatpush3.xpose.msra.mxu0 %v7820_v2 }
 0x92d   : > { %16460 = vmatprep.subr.mxu0 %v18317_v8 }
 0x92e   : > { %v7898_v55 = vand.u32 4294901760, %v7897_v53 }
 0x92f   : > { %16458 = vmatmul.mubr.f32.vlgmr.msra.gmra.mrb[24].mxu0 %v7889_v1 }
 0x930   : > { %v7899_v56 = vsub.f32 %v7897_v53, %v7898_v55  ;;  %16462 = vmatprep.mubr.msk.f32.mxu0 %vm18316_vm0, %v18317_v8 }
 0x932   : > { %v7900_v57 = vand.u32 4294901760, %v7899_v56 }
 0x934   : > { %16461 = vmatpush3.xpose.msra.mxu0 %v7900_v57 }
 0x935   : > { %16465 = vmatprep.subr.mxu0 %v18317_v8 }
 0x937   : > { %16463 = vmatmul.mubr.f32.vlgmr.msra.gmra.mrb[24].mxu0 %v7885_v28 }
 0x938   : > { %16466 = vmatpush3.xpose.msra.mxu0 %v7897_v53  ;;  %16467 = vmatprep.mubr.msk.f32.mxu0 %vm18316_vm0, %v18317_v8 }
 0x939   : > { %16470 = vmatprep.subr.mxu0 %v18317_v8 }
 0x93f   : > { %16468 = vmatmul.mubr.f32.vlgmr.msra.gmra.mrb[24].mxu0 %v7886_v46 }
 0x940   : > { %16471 = vmatpush3.xpose.msra.mxu0 %v7820_v2  ;;  %16472 = vmatprep.mubr.msk.f32.mxu0 %vm18316_vm0, %v18317_v8 }
 0x941   : > { %16475 = vmatprep.subr.mxu0 %v18317_v8 }
 0x947   : > { %16473 = vmatmul.mubr.f32.vlgmr.msra.gmra.mrb[24].mxu0 %v7887_v48 }
 0x948   : > { %16476 = vmatpush3.xpose.msra.mxu0 %v7898_v55  ;;  %16477 = vmatprep.mubr.msk.f32.mxu0 %vm18316_vm0, %v18317_v8 }
 0x949   : > { %16480 = vmatprep.subr.mxu0 %v18317_v8 }
 0x94f   : > { %16478 = vmatmul.mubr.f32.vlgmr.msra.gmra.mrb[24].mxu0 %v7885_v28 }
 0x950   : > { %16481 = vmatpush3.xpose.msra.mxu0 %v7820_v2  ;;  %16482 = vmatprep.mubr.msk.f32.mxu0 %vm18316_vm0, %v18317_v8 }
 0x951   : > { %17619 = vmatprep.subr.bf16.mxu0 %v18315_v3 }
 0x957   : > { %16483 = vmatmul.mubr.f32.vlgmr.msra.gmra.mrb[24].mxu0 %v7885_v28 }
 0x958   : > { %16519 = vmatprep.mubr.msk.f32.mxu0 %vm18316_vm0, %v18317_v8 }
 0x986   : > { %v19308_v62 = vpop.f32.mrb[20].mxu1 }
 0x987   : > { %v16262_v4 = vpop.f32.mrb[21].mxu1 }
 0x9b7   : > { %v7341_v10 = vpop.f32.mrb[22].mxu1 }
 0x9b8   : > { %v16424_v26 = vpop.f32.mrb[23].mxu1  ;;  %v7345_v17 = vsel %vm2466_vm5, %v7341_v10, -inf }
 0x9b9   : > { %7346 = vmax.xlane.f32.xlu0 %v7345_v17 }
 0xa2a   : > { %v8261_v31 = vpop.f32.mrb[24].mxu0 }
 0xa2b   : > { %v16484_v32 = vpop.f32.mrb[25].mxu0  ;;  %v8265_v24 = vsel %vm2466_vm5, %v8261_v31, -inf }
 0xa2c   : > { %8266 = vmax.xlane.f32.xlu1 %v8265_v24 }
 0xa46   : > { %v7347_v29 = vpop.xlane.xlu0 %7346 }
 0xa47   : > { %v7348_v0 = vsub.f32 %v7341_v10, %v7347_v29 }
 0xa49   : > { %v7349_v59 = vmul.f32 1.442695, %v7348_v0 }
 0xa4b   : > { %18280 = vpow2.f32 %v7349_v59 }
 0xa55   : > { %v18281_v13 = vpop.eup %18280 }
 0xa56   : > { %v7351_v44 = vsel %vm2466_vm5, %v18281_v13, 0.0 }
 0xa57   : > { %7352 = vadd.xlane.f32.xlu0 %v7351_v44 }
 0xa6d   : > { %7359 = vrot.lane.b32.xlu0 %v19262_v41, %s18319_s27 }
 0xa71   : > { %8731 = vrot.lane.b32.xlu0 %v18923_v18, %s18323_s19 }
 0xa75   : > { %9199 = vrot.lane.b32.xlu0 %v18914_v14, %s18323_s19 }
 0xab9   : > { %v8267_v25 = vpop.xlane.xlu1 %8266 }
 0xaba   : > { %v8268_v27 = vsub.f32 %v8261_v31, %v8267_v25 }
 0xabc   : > { %v8269_v9 = vmul.f32 1.442695, %v8268_v27 }
 0xabe   : > { %18282 = vpow2.f32 %v8269_v9 }
 0xac8   : > { %v18283_v63 = vpop.eup %18282 }
 0xac9   : > { %v8271_v15 = vsel %vm2466_vm5, %v18283_v63, 0.0 }
 0xaca   : > { %8272 = vadd.xlane.f32.xlu1 %v8271_v15 }
 0xadb   : > { %8279 = vrot.lane.b32.xlu1 %v19262_v41, %s18318_s24 }
 0xadf   : > { %8733 = vrot.lane.b32.xlu1 %v18928_v19, %s18323_s19 }
 0xae3   : > { %9201 = vrot.lane.b32.xlu1 %v18909_v11, %s18323_s19 }
 0xae4   : > { %v7353_v18 = vpop.xlane.xlu0 %7352 }
 0xae5   : > { %18284 = vrcp.f32 %v7353_v18 }
 0xae8   : > { %v7360_v14 = vpop.permute.xlu0 %7359 }
 0xae9   : > { %v7366_v16 = vand.u32 4294901760, %v7360_v14 }
 0xaeb   : > { %16426 = vmatpush3.msra.mxu1 %v7366_v16  ;;  %v7443_v34 = vsub.f32 %v7360_v14, %v7366_v16 }
 0xaec   : > { %16430 = vmatprep.subr.mxu1 %v18317_v8  ;;  %v8732_v26 = vpop.permute.xlu0 %8731 }
 0xaed   : > { %v7444_v19 = vand.u32 4294901760, %v7443_v34  ;;  %v8741_v31 = vand.u32 4294901760, %v8732_v26 }
 0xaef   : > { %v18285_v23 = vpop.eup %18284  ;;  %v7445_v11 = vsub.f32 %v7443_v34, %v7444_v19  ;;  %v19358_v29 = vsub.f32 %v8732_v26, %v8741_v31 }
 0xaf0   : > { %v7355_v30 = vmul.f32 %v18285_v23, %v7353_v18 }
 0xaf1   : > { %v7446_v36 = vand.u32 4294901760, %v7445_v11 }
 0xaf2   : > { %v7356_v40 = vsub.f32 2.0, %v7355_v30 }
 0xaf4   : > { %v7357_v47 = vmul.f32 %v18285_v23, %v7356_v40 }
 0xaf6   : > { %v7358_v33 = vmul.f32 %v18281_v13, %v7357_v47  ;;  %v8820_v13 = vand.u32 4294901760, %v19358_v29 }
 0xaf8   : > { %v7363_v41 = vsel %vm2466_vm5, %v7358_v33, 0  ;;  %v8821_v25 = vsub.f32 %v19358_v29, %v8820_v13 }
 0xaf9   : > { %v7431_v54 = vand.u32 4294901760, %v7363_v41 }
 0xafa   : > { %v8822_v9 = vand.u32 4294901760, %v8821_v25 }
 0xafb   : > { %v7432_v61 = vsub.f32 %v7363_v41, %v7431_v54 }
 0xafd   : > { %v7433_v7 = vand.u32 4294901760, %v7432_v61 }
 0xaff   : > { %v7434_v35 = vsub.f32 %v7432_v61, %v7433_v7 }
 0xb01   : > { %v7435_v60 = vand.u32 4294901760, %v7434_v35 }
 0xb03   : > { %16428 = vmatmul.mubr.f32.vlgmr.msra.gmra.mrb[24].mxu1 %v7435_v60 }
 0xb04   : > { %16431 = vmatpush3.msra.mxu1 %v7446_v36  ;;  %16432 = vmatprep.mubr.msk.f32.mxu1 %vm18316_vm0, %v18317_v8 }
 0xb05   : > { %16435 = vmatprep.subr.mxu1 %v18317_v8 }
 0xb0b   : > { %16433 = vmatmul.mubr.f32.vlgmr.msra.gmra.mrb[24].mxu1 %v7431_v54 }
 0xb0c   : > { %16436 = vmatpush3.msra.mxu1 %v7443_v34  ;;  %16437 = vmatprep.mubr.msk.f32.mxu1 %vm18316_vm0, %v18317_v8 }
 0xb0d   : > { %16440 = vmatprep.subr.mxu1 %v18317_v8 }
 0xb13   : > { %16438 = vmatmul.mubr.f32.vlgmr.msra.gmra.mrb[24].mxu1 %v7432_v61 }
 0xb14   : > { %16441 = vmatpush3.msra.mxu1 %v7366_v16  ;;  %16442 = vmatprep.mubr.msk.f32.mxu1 %vm18316_vm0, %v18317_v8 }
 0xb15   : > { %16445 = vmatprep.subr.mxu1 %v18317_v8 }
 0xb1b   : > { %16443 = vmatmul.mubr.f32.vlgmr.msra.gmra.mrb[24].mxu1 %v7433_v7 }
 0xb1c   : > { %16446 = vmatpush3.msra.mxu1 %v7444_v19  ;;  %16447 = vmatprep.mubr.msk.f32.mxu1 %vm18316_vm0, %v18317_v8 }
 0xb1d   : > { %16450 = vmatprep.subr.mxu1 %v18317_v8 }
 0xb23   : > { %16448 = vmatmul.mubr.f32.vlgmr.msra.gmra.mrb[24].mxu1 %v7431_v54 }
 0xb24   : > { %16451 = vmatpush3.msra.mxu1 %v7366_v16  ;;  %16452 = vmatprep.mubr.msk.f32.mxu1 %vm18316_vm0, %v18317_v8  ;;  %v9200_v16 = vpop.permute.xlu0 %9199 }
 0xb25   : > { %16485 = vmatprep.subr.mxu1 %v18317_v8  ;;  %v9209_v30 = vand.u32 4294901760, %v9200_v16 }
 0xb27   : > { %v19378_v47 = vsub.f32 %v9200_v16, %v9209_v30 }
 0xb29   : > { %v9288_v34 = vand.u32 4294901760, %v19378_v47 }
 0xb2b   : > { %16453 = vmatmul.mubr.f32.vlgmr.msra.gmra.mrb[24].mxu1 %v7431_v54  ;;  %v9289_v19 = vsub.f32 %v19378_v47, %v9288_v34 }
 0xb2c   : > { %16487 = vmatprep.mubr.msk.f32.mxu1 %vm18316_vm0, %v18317_v8 }
 0xb57   : > { %v8273_v21 = vpop.xlane.xlu1 %8272 }
 0xb58   : > { %18286 = vrcp.f32 %v8273_v21 }
 0xb5b   : > { %v8280_v37 = vpop.permute.xlu1 %8279 }
 0xb5c   : > { %v8286_v38 = vand.u32 4294901760, %v8280_v37 }
 0xb5e   : > { %16486 = vmatpush3.msra.mxu1 %v8286_v38  ;;  %v8363_v49 = vsub.f32 %v8280_v37, %v8286_v38 }
 0xb5f   : > { %16490 = vmatprep.subr.mxu1 %v18317_v8  ;;  %v8734_v10 = vpop.permute.xlu1 %8733 }
 0xb60   : > { %v8364_v2 = vand.u32 4294901760, %v8363_v49  ;;  %v8744_v17 = vand.u32 4294901760, %v8734_v10 }
 0xb62   : > { %v18287_v39 = vpop.eup %18286  ;;  %v8365_v55 = vsub.f32 %v8363_v49, %v8364_v2  ;;  %v19356_v32 = vsub.f32 %v8734_v10, %v8744_v17  ;;  %v17620_v24 = vpack.c.bf16 %v8744_v17, %v8741_v31 }
 0xb63   : > { %v8275_v45 = vmul.f32 %v18287_v39, %v8273_v21  ;;  %v9202_v14 = vpop.permute.xlu1 %9201  ;;  %v9290_v21 = vand.u32 4294901760, %v9289_v19 }
 0xb64   : > { %v8366_v4 = vand.u32 4294901760, %v8365_v55  ;;  %v17626_v0 = vpack.c.bf16 %v19356_v32, %v19358_v29  ;;  %17621 = vmatpush3.bf16.msra.mxu0 %v17620_v24  ;;  %v8827_v59 = vand.u32 4294901760, %v19356_v32  ;;  %v9212_v23 = vand.u32 4294901760, %v9202_v14  ;;  %v19425_v55 = vld [vmem:[%s20330_s9] sm:$0xff] }
 0xb65   : > { %v8276_v28 = vsub.f32 2.0, %v8275_v45  ;;  %17625 = vmatprep.subr.bf16.mxu0 %v18315_v3 }
 0xb66   : > { %v8828_v44 = vsub.f32 %v19356_v32, %v8827_v59  ;;  %v19376_v40 = vsub.f32 %v9202_v14, %v9212_v23 }
 0xb67   : > { %v8277_v46 = vmul.f32 %v18287_v39, %v8276_v28 }
 0xb68   : > { %v8829_v27 = vand.u32 4294901760, %v8828_v44  ;;  %v9295_v33 = vand.u32 4294901760, %v19376_v40 }
 0xb69   : > { %v8278_v48 = vmul.f32 %v18283_v63, %v8277_v46 }
 0xb6a   : > { %v17623_v63 = vpack.c.bf16 %v8829_v27, %v8822_v9  ;;  %v9296_v54 = vsub.f32 %v19376_v40, %v9295_v33 }
 0xb6b   : > { %v8283_v51 = vsel %vm2466_vm5, %v8278_v48, 0  ;;  %v17638_v48 = vpack.c.bf16 %v9212_v23, %v9209_v30 }
 0xb6c   : > { %v8351_v52 = vand.u32 4294901760, %v8283_v51  ;;  %v9297_v36 = vand.u32 4294901760, %v9296_v54 }
 0xb6e   : > { %v8352_v53 = vsub.f32 %v8283_v51, %v8351_v52  ;;  %v17641_v45 = vpack.c.bf16 %v9297_v36, %v9290_v21  ;;  %v17632_v51 = vpack.c.bf16 %v8827_v59, %v8820_v13  ;;  %v9670_v21 = vrot.slane %v19425_v55, %v18895_v50 }
 0xb70   : > { %v8353_v1 = vand.u32 4294901760, %v8352_v53 }
 0xb72   : > { %v8354_v56 = vsub.f32 %v8352_v53, %v8353_v1 }
 0xb74   : > { %v8355_v57 = vand.u32 4294901760, %v8354_v56  ;;  %v5349_v56 = vrot.slane %v19425_v55, %v18884_v12 }
 0xb76   : > { %16488 = vmatmul.mubr.f32.vlgmr.msra.gmra.mrb[26].mxu1 %v8355_v57  ;;  %v17985_v57 = vadd.f32 %v19308_v62, %v5349_v56 }
 0xb77   : > { %16491 = vmatpush3.msra.mxu1 %v8366_v4  ;;  %16492 = vmatprep.mubr.msk.f32.mxu1 %vm18316_vm0, %v18317_v8 }
 0xb78   : > { %16495 = vmatprep.subr.mxu1 %v18317_v8  ;;  %v14823_v4 = vmul.f32 -1.442695, %v17985_v57  ;;  %v9709_v57 = vld [vmem:[%s20331_s10] sm:$0xff] }
 0xb7a   : > { %18288 = vpow2.f32 %v14823_v4  ;;  %v9711_v4 = vld [vmem:[%s20331_s10 + $0x10] sm:$0xff] }
 0xb7e   : > { %16493 = vmatmul.mubr.f32.vlgmr.msra.gmra.mrb[26].mxu1 %v8351_v52 }
 0xb7f   : > { %16496 = vmatpush3.msra.mxu1 %v8363_v49  ;;  %16497 = vmatprep.mubr.msk.f32.mxu1 %vm18316_vm0, %v18317_v8 }
 0xb80   : > { %16500 = vmatprep.subr.mxu1 %v18317_v8 }
 0xb84   : > { %v18289_v25 = vpop.eup %18288 }
 0xb86   : > { %16498 = vmatmul.mubr.f32.vlgmr.msra.gmra.mrb[26].mxu1 %v8352_v53  ;;  %v17644_v53 = vpack.c.bf16 %v19376_v40, %v19378_v47 }
 0xb87   : > { %16501 = vmatpush3.msra.mxu1 %v8286_v38  ;;  %16502 = vmatprep.mubr.msk.f32.mxu1 %vm18316_vm0, %v18317_v8 }
 0xb88   : > { %16505 = vmatprep.subr.mxu1 %v18317_v8 }
 0xb8e   : > { %16503 = vmatmul.mubr.f32.vlgmr.msra.gmra.mrb[26].mxu1 %v8353_v1  ;;  %v17650_v1 = vpack.c.bf16 %v9295_v33, %v9288_v34 }
 0xb8f   : > { %16506 = vmatpush3.msra.mxu1 %v8364_v2  ;;  %16507 = vmatprep.mubr.msk.f32.mxu1 %vm18316_vm0, %v18317_v8 }
 0xb90   : > { %16510 = vmatprep.subr.mxu1 %v18317_v8 }
 0xb96   : > { %16508 = vmatmul.mubr.f32.vlgmr.msra.gmra.mrb[26].mxu1 %v8351_v52 }
 0xb97   : > { %16511 = vmatpush3.msra.mxu1 %v8286_v38  ;;  %16512 = vmatprep.mubr.msk.f32.mxu1 %vm18316_vm0, %v18317_v8 }
 0xb98   : > { %17622 = vmatprep.subr.bf16.mxu1 %v18315_v3 }
 0xb9e   : > { %16513 = vmatmul.mubr.f32.vlgmr.msra.gmra.mrb[26].mxu1 %v8351_v52 }
 0xb9f   : > { %16526 = vmatprep.mubr.msk.f32.mxu1 %vm18316_vm0, %v18317_v8  ;;  %17624 = vmatpush3.bf16.msra.mxu1 %v17623_v63 }
 0xba0   : > { %17628 = vmatprep.subr.bf16.mxu1 %v18315_v3 }
 0xbfe   : > { %v7807_v15 = vpop.f32.mrb[24].mxu1 }
 0xbff   : > { %v16454_v18 = vpop.f32.mrb[25].mxu1  ;;  %v9206_v35 = vsel %vm2015_vm2, %v7807_v15, 0 }
 0xc00   : > { %v9275_v37 = vand.u32 4294901760, %v9206_v35  ;;  %v5893_v18 = vadd.f32 1.0, %v18289_v25 }
 0xc02   : > { %v9276_v28 = vsub.f32 %v9206_v35, %v9275_v37  ;;  %18290 = vrcp.f32 %v5893_v18 }
 0xc04   : > { %v9277_v49 = vand.u32 4294901760, %v9276_v28 }
 0xc06   : > { %v9278_v52 = vsub.f32 %v9276_v28, %v9277_v49 }
 0xc08   : > { %v9279_v2 = vand.u32 4294901760, %v9278_v52 }
 0xc71   : > { %v8727_v41 = vpop.f32.mrb[26].mxu1 }
 0xc72   : > { %v8738_v61 = vsel %vm2015_vm2, %v8727_v41, 0  ;;  %v16514_v7 = vpop.f32.mrb[27].mxu1 }
 0xc73   : > { %v8807_v11 = vand.u32 4294901760, %v8738_v61 }
 0xc75   : > { %v8808_v60 = vsub.f32 %v8738_v61, %v8807_v11  ;;  %16527 = vmatmul.mubr.f32.vlgmr.msra.gmra.mrb[28].mxu1 %v8807_v11 }
 0xc76   : > { %17630 = vmatpush3.bf16.msra.mxu1 %v17620_v24  ;;  %16540 = vmatprep.mubr.msk.f32.mxu1 %vm18316_vm0, %v18317_v8 }
 0xc77   : > { %v8809_v38 = vand.u32 4294901760, %v8808_v60  ;;  %17634 = vmatprep.subr.bf16.mxu1 %v18315_v3 }
 0xc79   : > { %v8810_v39 = vsub.f32 %v8808_v60, %v8809_v38  ;;  %16541 = vmatmul.mubr.f32.vlgmr.msra.gmra.mrb[30].mxu1 %v8809_v38  ;;  %v18291_v38 = vpop.eup %18290 }
 0xc7a   : > { %17636 = vmatpush3.bf16.msra.mxu1 %v17620_v24  ;;  %16554 = vmatprep.mubr.msk.f32.mxu1 %vm18316_vm0, %v18317_v8 }
 0xc7b   : > { %v8811_v46 = vand.u32 4294901760, %v8810_v39  ;;  %17640 = vmatprep.subr.bf16.mxu1 %v18315_v3 }
 0xc7d   : > { %16520 = vmatmul.mubr.f32.vlgmr.msra.gmra.mrb[26].mxu0 %v8811_v46  ;;  %16555 = vmatmul.mubr.f32.vlgmr.msra.gmra.mrb[32].mxu1 %v8807_v11  ;;  %v9672_v46 = vmul.f32 %v18291_v38, %v18983_v20  ;;  %v9710_v20 = vld [vmem:[%s20331_s10 + $0x8] sm:$0xff] }
 0xc7e   : > { %17627 = vmatpush3.bf16.msra.mxu0 %v17626_v0  ;;  %17642 = vmatpush3.bf16.msra.mxu1 %v17641_v45 }
 0xc7f   : > { %16533 = vmatprep.mubr.msk.f32.mxu0 %vm18316_vm0, %v18317_v8  ;;  %17631 = vmatprep.subr.bf16.mxu0 %v18315_v3 }
 0xc80   : > { %16568 = vmatprep.mubr.msk.f32.mxu1 %vm18316_vm0, %v18317_v8  ;;  %17646 = vmatprep.subr.bf16.mxu1 %v18315_v3 }
 0xc81   : > { %16534 = vmatmul.mubr.f32.vlgmr.msra.gmra.mrb[28].mxu0 %v8808_v60  ;;  %16569 = vmatmul.mubr.f32.vlgmr.msra.gmra.mrb[34].mxu1 %v9275_v37 }
 0xc82   : > { %17633 = vmatpush3.bf16.msra.mxu0 %v17632_v51  ;;  %17648 = vmatpush3.bf16.msra.mxu1 %v17638_v48 }
 0xc83   : > { %16547 = vmatprep.mubr.msk.f32.mxu0 %vm18316_vm0, %v18317_v8  ;;  %17637 = vmatprep.subr.bf16.mxu0 %v18315_v3 }
 0xc84   : > { %16582 = vmatprep.mubr.msk.f32.mxu1 %vm18316_vm0, %v18317_v8  ;;  %17652 = vmatprep.subr.bf16.mxu1 %v18315_v3 }
 0xc85   : > { %16548 = vmatmul.mubr.f32.vlgmr.msra.gmra.mrb[30].mxu0 %v8807_v11  ;;  %16583 = vmatmul.mubr.f32.vlgmr.msra.gmra.mrb[36].mxu1 %v9277_v49 }
 0xc86   : > { %17639 = vmatpush3.bf16.msra.mxu0 %v17638_v48  ;;  %17654 = vmatpush3.bf16.msra.mxu1 %v17638_v48 }
 0xc87   : > { %16561 = vmatprep.mubr.msk.f32.mxu0 %vm18316_vm0, %v18317_v8  ;;  %17643 = vmatprep.subr.bf16.mxu0 %v18315_v3 }
 0xc88   : > { %16596 = vmatprep.mubr.msk.f32.mxu1 %vm18316_vm0, %v18317_v8  ;;  %17691 = vmatprep.subr.bf16.mxu1 %v18315_v3 }
 0xc89   : > { %16562 = vmatmul.mubr.f32.vlgmr.msra.gmra.mrb[32].mxu0 %v9279_v2  ;;  %16597 = vmatmul.mubr.f32.vlgmr.msra.gmra.mrb[38].mxu1 %v9275_v37 }
 0xc8a   : > { %17645 = vmatpush3.bf16.msra.mxu0 %v17644_v53  ;;  %16575 = vmatprep.mubr.msk.f32.mxu0 %vm18316_vm0, %v18317_v8 }
 0xc8b   : > { %17649 = vmatprep.subr.bf16.mxu0 %v18315_v3  ;;  %16697 = vmatprep.mubr.msk.f32.mxu1 %vm18316_vm0, %v18317_v8 }
 0xc8d   : > { %16576 = vmatmul.mubr.f32.vlgmr.msra.gmra.mrb[34].mxu0 %v9276_v28  ;;  %v9673_v28 = vsub.f32 1.0, %v18291_v38  ;;  %v9718_v38 = vld [vmem:[%s20332_s11 + $0x28] sm:$0xff] }
 0xc8e   : > { %17651 = vmatpush3.bf16.msra.mxu0 %v17650_v1  ;;  %16589 = vmatprep.mubr.msk.f32.mxu0 %vm18316_vm0, %v18317_v8 }
 0xc8f   : > { %17655 = vmatprep.subr.bf16.mxu0 %v18315_v3 }
 0xc91   : > { %16590 = vmatmul.mubr.f32.vlgmr.msra.gmra.mrb[36].mxu0 %v9275_v37 }
 0xc92   : > { %16607 = vmatprep.mubr.msk.f32.mxu0 %vm18316_vm0, %v18317_v8 }
 0xd48   : > { %v8894_v10 = vpop.f32.mrb[28].mxu1 }
 0xd49   : > { %v16528_v26 = vpop.f32.mrb[29].mxu1 }
 0xd4a   : > { %v9741_v26 = vand.u32 4294901760, %v9710_v20 }
 0xd4c   : > { %v9045_v17 = vpop.f32.mrb[30].mxu1 }
 0xd4d   : > { %v16542_v31 = vpop.f32.mrb[31].mxu1 }
 0xd4e   : > { %v9744_v31 = vand.u32 4294901760, %v9711_v4 }
 0xd50   : > { %v8813_v32 = vpop.f32.mrb[26].mxu0  ;;  %v9195_v24 = vpop.f32.mrb[32].mxu1 }
 0xd51   : > { %v8895_v29 = vadd.f32 %v8894_v10, %v8813_v32  ;;  %v16521_v0 = vpop.f32.mrb[27].mxu0  ;;  %v16556_v59 = vpop.f32.mrb[33].mxu1  ;;  %v9738_v10 = vand.u32 4294901760, %v9709_v57 }
 0xd52   : > { %v19455_v0 = vsub.f32 %v9710_v20, %v9741_v26  ;;  %v19457_v59 = vsub.f32 %v9711_v4, %v9744_v31 }
 0xd54   : > { %v8970_v13 = vpop.f32.mrb[28].mxu0  ;;  %v9362_v44 = vpop.f32.mrb[34].mxu1 }
 0xd55   : > { %v8971_v27 = vadd.f32 %v8970_v13, %v8895_v29  ;;  %v16535_v9 = vpop.f32.mrb[29].mxu0  ;;  %v16570_v63 = vpop.f32.mrb[35].mxu1  ;;  %v19453_v29 = vsub.f32 %v9709_v57, %v9738_v10 }
 0xd57   : > { %v9046_v15 = vadd.f32 %v9045_v17, %v8971_v27  ;;  %v9712_v17 = vld [vmem:[%s20331_s10 + $0x18] sm:$0xff]  ;;  %v9819_v25 = vand.u32 4294901760, %v19453_v29  ;;  %v9826_v27 = vand.u32 4294901760, %v19455_v0 }
 0xd58   : > { %v9122_v62 = vpop.f32.mrb[30].mxu0  ;;  %v9513_v14 = vpop.f32.mrb[36].mxu1  ;;  %v9747_v32 = vand.u32 4294901760, %v9712_v17 }
 0xd59   : > { %v9123_v16 = vadd.f32 %v9122_v62, %v9046_v15  ;;  %v16549_v23 = vpop.f32.mrb[31].mxu0  ;;  %v16584_v30 = vpop.f32.mrb[37].mxu1  ;;  %v9820_v9 = vsub.f32 %v19453_v29, %v9819_v25  ;;  %v9827_v63 = vsub.f32 %v19455_v0, %v9826_v27  ;;  %v9833_v62 = vand.u32 4294901760, %v19457_v59 }
 0xd5a   : > { %v19459_v13 = vsub.f32 %v9712_v17, %v9747_v32 }
 0xd5b   : > { %v9196_v40 = vadd.f32 %v9195_v24, %v9123_v16  ;;  %v19451_v24 = vpack.c.bf16 %v9741_v26, %v9738_v10  ;;  %v9821_v15 = vand.u32 4294901760, %v9820_v9  ;;  %v9828_v18 = vand.u32 4294901760, %v9827_v63 }
 0xd5c   : > { %v9281_v47 = vpop.f32.mrb[32].mxu0  ;;  %v9663_v33 = vpop.f32.mrb[38].mxu1  ;;  %v9834_v23 = vsub.f32 %v19457_v59, %v9833_v62 }
 0xd5d   : > { %v9282_v34 = vadd.f32 %v9281_v47, %v9196_v40  ;;  %v16563_v41 = vpop.f32.mrb[33].mxu0  ;;  %v16598_v54 = vpop.f32.mrb[39].mxu1  ;;  %17657 = vmatpush3.bf16.msra.mxu0 %v19451_v24  ;;  %v19473_v16 = vpack.c.bf16 %v9828_v18, %v9821_v15 }
 0xd5e   : > { %17658 = vmatprep.subr.bf16.mxu0 %v18315_v3  ;;  %v9835_v40 = vand.u32 4294901760, %v9834_v23  ;;  %v17671_v41 = vpack.c.bf16 %v19459_v13, %v19457_v59  ;;  %v19483_v54 = vpack.c.bf16 %v9826_v27, %v9819_v25  ;;  %v9726_v59 = vld [vmem:[%s20332_s11 + $0x68] sm:$0xff] }
 0xd5f   : > { %v9363_v19 = vadd.f32 %v9362_v44, %v9282_v34  ;;  %v19462_v44 = vpack.c.bf16 %v9747_v32, %v9744_v31  ;;  %v17668_v34 = vpack.c.bf16 %v19455_v0, %v19453_v29  ;;  %v9725_v0 = vld [vmem:[%s20332_s11 + $0x60] sm:$0xff] }
 0xd60   : > { %v9438_v61 = vpop.f32.mrb[34].mxu0 }
 0xd61   : > { %v9439_v7 = vadd.f32 %v9438_v61, %v9363_v19  ;;  %v16577_v11 = vpop.f32.mrb[35].mxu0  ;;  %17660 = vmatpush3.bf16.msra.mxu0 %v19462_v44  ;;  %v9713_v61 = vld [vmem:[%s20332_s11] sm:$0xff] }
 0xd62   : > { %17661 = vmatprep.subr.bf16.mxu0 %v18315_v3  ;;  %v9715_v11 = vld [vmem:[%s20332_s11 + $0x10] sm:$0xff] }
 0xd63   : > { %v9514_v35 = vadd.f32 %v9513_v14, %v9439_v7  ;;  %v9840_v14 = vand.u32 4294901760, %v19459_v13  ;;  %v9714_v7 = vld [vmem:[%s20332_s11 + $0x8] sm:$0xff] }
 0xd64   : > { %v9590_v60 = vpop.f32.mrb[36].mxu0 }
 0xd65   : > { %v9591_v36 = vadd.f32 %v9590_v60, %v9514_v35  ;;  %v16591_v37 = vpop.f32.mrb[37].mxu0  ;;  %v9841_v30 = vsub.f32 %v19459_v13, %v9840_v14  ;;  %v19485_v19 = vpack.c.bf16 %v9840_v14, %v9833_v62  ;;  %v10228_v35 = vand.u32 4294901760, %v9713_v61 }
 0xd66   : > { %v10231_v60 = vand.u32 4294901760, %v9714_v7  ;;  %v9717_v37 = vld [vmem:[%s20332_s11 + $0x20] sm:$0xff]  ;;  %v10264_v13 = vand.u32 4294901760, %v9725_v0 }
 0xd67   : > { %v9664_v39 = vadd.f32 %v9663_v33, %v9591_v36  ;;  %v9842_v47 = vand.u32 4294901760, %v9841_v30  ;;  %v9716_v36 = vld [vmem:[%s20332_s11 + $0x18] sm:$0xff] }
 0xd69   : > { %v9671_v45 = vadd.f32 %v9670_v21, %v9664_v39  ;;  %v19477_v33 = vpack.c.bf16 %v9842_v47, %v9835_v40  ;;  %v10234_v21 = vand.u32 4294901760, %v9715_v11  ;;  %v10237_v39 = vand.u32 4294901760, %v9716_v36 }
 0xd6b   : > { %v9674_v48 = vmul.f32 %v9673_v28, %v9671_v45  ;;  %v10240_v45 = vand.u32 4294901760, %v9717_v37  ;;  %v10243_v28 = vand.u32 4294901760, %v9718_v38  ;;  %v19525_v57 = vpack.c.bf16 %v10237_v39, %v10234_v21 }
 0xd6c   : > { %v19527_v20 = vsub.f32 %v9716_v36, %v10237_v39  ;;  %v9707_v39 = vrot.slane %v19425_v55, %v4833_v58  ;;  %v9723_v58 = vld [vmem:[%s20332_s11 + $0x50] sm:$0xff] }
 0xd6d   : > { %v9675_v49 = vadd.f32 %v9674_v48, %v9672_v46  ;;  %v9719_v46 = vld [vmem:[%s20332_s11 + $0x30] sm:$0xff]  ;;  %v9720_v48 = vld [vmem:[%s20332_s11 + $0x38] sm:$0xff]  ;;  %v19529_v4 = vsub.f32 %v9717_v37, %v10240_v45  ;;  %v19532_v10 = vsub.f32 %v9718_v38, %v10243_v28  ;;  %v19544_v15 = vpack.c.bf16 %v10243_v28, %v10240_v45 }
 0xd6e   : > { %v10246_v26 = vand.u32 4294901760, %v9719_v46  ;;  %v10249_v17 = vand.u32 4294901760, %v9720_v48 }
 0xd6f   : > { %v9676_v51 = vsel %vm476_vm1, %v9675_v49, 0.0 }
 0xd70   : > { %9677 = vadd.xlane.f32.xlu0 %v9676_v51  ;;  %v19514_v51 = vpack.c.bf16 %v10231_v60, %v10228_v35  ;;  %v19535_v25 = vsub.f32 %v9719_v46, %v10246_v26  ;;  %v19537_v27 = vsub.f32 %v9720_v48, %v10249_v17  ;;  %v19548_v18 = vpack.c.bf16 %v10249_v17, %v10246_v26 }
 0xd72   : > { %17693 = vmatpush3.bf16.msra.mxu1 %v19514_v51 }
 0xd73   : > { %17694 = vmatprep.subr.bf16.mxu1 %v18315_v3 }
 0xd76   : > { %17696 = vmatpush3.bf16.msra.mxu1 %v19525_v57 }
 0xd77   : > { %17697 = vmatprep.subr.bf16.mxu1 %v18315_v3 }
 0xd7a   : > { %17699 = vmatpush3.bf16.msra.mxu1 %v19544_v15 }
 0xd7b   : > { %17700 = vmatprep.subr.bf16.mxu1 %v18315_v3 }
 0xd7e   : > { %17702 = vmatpush3.bf16.msra.mxu1 %v19548_v18 }
 0xd7f   : > { %17703 = vmatprep.subr.bf16.mxu1 %v18315_v3 }
 0xdfd   : > { %v9678_v52 = vpop.xlane.xlu0 %9677 }
 0xdfe   : > { %v9679_v2 = vmul.f32 0.03125, %v9678_v52  ;;  %v19516_v52 = vsub.f32 %v9713_v61, %v10228_v35 }
 0xe00   : > { %v19434_v53 = vsub.f32 %v9675_v49, %v9679_v2  ;;  %v9721_v49 = vld [vmem:[%s20332_s11 + $0x40] sm:$0xff]  ;;  %v19518_v2 = vsub.f32 %v9714_v7, %v10231_v60  ;;  %v9701_v60 = vrot.slane %v19425_v55, %v4827_v6  ;;  %v9724_v55 = vld [vmem:[%s20332_s11 + $0x58] sm:$0xff] }
 0xe01   : > { %v10252_v31 = vand.u32 4294901760, %v9721_v49 }
 0xe02   : > { %v9681_v1 = vmul.f32 %v19434_v53, %v19434_v53  ;;  %v9702_v37 = vmul.f32 %v9701_v60, %v19434_v53  ;;  %v10258_v53 = vand.u32 4294901760, %v9723_v58  ;;  %v10328_v17 = vand.u32 4294901760, %v19518_v2 }
 0xe03   : > { %v19539_v9 = vsub.f32 %v9721_v49, %v10252_v31 }
 0xe04   : > { %v9682_v56 = vsel %vm476_vm1, %v9681_v1, 0.0  ;;  %v19520_v1 = vsub.f32 %v9715_v11, %v10234_v21 }
 0xe05   : > { %9683 = vadd.xlane.f32.xlu1 %v9682_v56  ;;  %v9722_v56 = vld [vmem:[%s20332_s11 + $0x48] sm:$0xff] }
 0xe06   : > { %v10255_v32 = vand.u32 4294901760, %v9722_v56  ;;  %v10335_v60 = vand.u32 4294901760, %v19520_v1 }
 0xe08   : > { %v19541_v63 = vsub.f32 %v9722_v56, %v10255_v32  ;;  %v19552_v62 = vpack.c.bf16 %v10255_v32, %v10252_v31 }
 0xe0a   : > { %17705 = vmatpush3.bf16.msra.mxu1 %v19552_v62 }
 0xe0b   : > { %17706 = vmatprep.subr.bf16.mxu1 %v18315_v3 }
 0xe92   : > { %v9684_v14 = vpop.xlane.xlu1 %9683 }
 0xe93   : > { %v9685_v23 = vmul.f32 0.032258064, %v9684_v14  ;;  %v10329_v14 = vsub.f32 %v19518_v2, %v10328_v17 }
 0xe95   : > { %18292 = vrsqrt.f32 %v9685_v23  ;;  %vm9688_vm8 = vcmp.eq.f32.partialorder %v9685_v23, inf  ;;  %v9691_v47 = vand.u32 2147483648, %v9685_v23  ;;  %vm9690_vm9 = vcmp.eq.f32.partialorder %v9685_v23, 0.0 }
 0xe9f   : > { %v18293_v30 = vpop.eup %18292 }
 0xea0   : > { %v9687_v40 = vmul.f32 %v18293_v30, %v9685_v23 }
 0xea2   : > { %v9689_v61 = vsel %vm9688_vm8, %v9685_v23, %v9687_v40  ;;  %v19640_v23 = vsub.f32 %v9723_v58, %v10258_v53  ;;  %v19644_v40 = vsub.f32 %v9725_v0, %v10264_v13  ;;  %vm10926_vm8 = vcmp.eq.s32.totalorder %v18732_v22, %v18497_v42 }
 0xea3   : > { %v9692_v7 = vsel %vm9690_vm9, %v9691_v47, %v9689_v61 }
 0xea4   : > { %v9693_v11 = vadd.f32 1e-06, %v9692_v7 }
 0xea6   : > { %18294 = vrcp.f32 %v9693_v11 }
 0xeb0   : > { %v18295_v35 = vpop.eup %18294 }
 0xeb1   : > { %v9695_v36 = vmul.f32 %v18295_v35, %v9693_v11 }
 0xeb3   : > { %v9696_v21 = vsub.f32 2.0, %v9695_v36  ;;  %v10342_v36 = vand.u32 4294901760, %v19527_v20 }
 0xeb5   : > { %v9697_v38 = vmul.f32 %v18295_v35, %v9696_v21  ;;  %v10330_v35 = vand.u32 4294901760, %v10329_v14 }
 0xeb7   : > { %v9703_v45 = vmul.f32 %v9702_v37, %v9697_v38  ;;  %v10336_v37 = vsub.f32 %v19520_v1, %v10335_v60  ;;  %v10343_v38 = vsub.f32 %v19527_v20, %v10342_v36 }
 0xeb9   : > { %v19564_v28 = vadd.f32 %v9707_v39, %v9703_v45  ;;  %v20346_v39 = vand.u32 4294901760, %v19529_v4  ;;  %v20345_v45 = vand.u32 4294901760, %v19532_v10 }
 0xebb   : > { %v9735_v46 = vsel %vm476_vm1, %v19564_v28, 0 }
 0xebc   : > { %v9806_v48 = vand.u32 4294901760, %v9735_v46 }
 0xebe   : > { %v9807_v49 = vsub.f32 %v9735_v46, %v9806_v48  ;;  %v10337_v46 = vand.u32 4294901760, %v10336_v37 }
 0xec0   : > { %v9808_v56 = vand.u32 4294901760, %v9807_v49 }
 0xec2   : > { %v9809_v26 = vsub.f32 %v9807_v49, %v9808_v56 }
 0xec4   : > { %v9810_v6 = vand.u32 4294901760, %v9809_v26 }
 0xec6   : > { %16608 = vmatmul.mubr.f32.vlgmr.msra.gmra.mrb[38].mxu0 %v9810_v6 }
 0xec7   : > { %17663 = vmatpush3.bf16.msra.mxu0 %v19473_v16  ;;  %16618 = vmatprep.mubr.msk.f32.mxu0 %vm18316_vm0, %v18317_v8 }
 0xec8   : > { %17664 = vmatprep.subr.bf16.mxu0 %v18315_v3 }
 0xecb   : > { %17666 = vmatpush3.bf16.msra.mxu0 %v19477_v33  ;;  %v9727_v33 = vld [vmem:[%s20332_s11 + $0x70] sm:$0xff] }
 0xecc   : > { %17667 = vmatprep.subr.bf16.mxu0 %v18315_v3 }
 0xece   : > { %16619 = vmatmul.mubr.f32.vlgmr.msra.gmra.mrb[38].mxu0 %v9806_v48 }
 0xecf   : > { %17669 = vmatpush3.bf16.msra.mxu0 %v17668_v34  ;;  %16629 = vmatprep.mubr.msk.f32.mxu0 %vm18316_vm0, %v18317_v8  ;;  %v9728_v34 = vld [vmem:[%s20332_s11 + $0x78] sm:$0xff] }
 0xed0   : > { %17670 = vmatprep.subr.bf16.mxu0 %v18315_v3 }
 0xed3   : > { %17672 = vmatpush3.bf16.msra.mxu0 %v17671_v41  ;;  %v10270_v41 = vand.u32 4294901760, %v9727_v33 }
 0xed4   : > { %17673 = vmatprep.subr.bf16.mxu0 %v18315_v3 }
 0xed5   : > { %v19649_v61 = vsub.f32 %v9727_v33, %v10270_v41  ;;  %v20342_v33 = vand.u32 4294901760, %v19539_v9 }
 0xed6   : > { %16630 = vmatmul.mubr.f32.vlgmr.msra.gmra.mrb[38].mxu0 %v9807_v49  ;;  %v10350_v49 = vsub.f32 %v19529_v4, %v20346_v39 }
 0xed7   : > { %17675 = vmatpush3.bf16.msra.mxu0 %v19451_v24  ;;  %16640 = vmatprep.mubr.msk.f32.mxu0 %vm18316_vm0, %v18317_v8 }
 0xed8   : > { %17676 = vmatprep.subr.bf16.mxu0 %v18315_v3  ;;  %v10351_v6 = vand.u32 4294901760, %v10350_v49 }
 0xedb   : > { %17678 = vmatpush3.bf16.msra.mxu0 %v19462_v44 }
 0xedc   : > { %17679 = vmatprep.subr.bf16.mxu0 %v18315_v3 }
 0xede   : > { %16641 = vmatmul.mubr.f32.vlgmr.msra.gmra.mrb[38].mxu0 %v9808_v56  ;;  %v10357_v56 = vsub.f32 %v19532_v10, %v20345_v45 }
 0xedf   : > { %17681 = vmatpush3.bf16.msra.mxu0 %v19483_v54  ;;  %16651 = vmatprep.mubr.msk.f32.mxu0 %vm18316_vm0, %v18317_v8  ;;  %v10273_v54 = vand.u32 4294901760, %v9728_v34 }
 0xee0   : > { %17682 = vmatprep.subr.bf16.mxu0 %v18315_v3  ;;  %v10358_v58 = vand.u32 4294901760, %v10357_v56 }
 0xee1   : > { %v19632_v31 = vpack.c.bf16 %v10273_v54, %v10270_v41  ;;  %v19651_v7 = vsub.f32 %v9728_v34, %v10273_v54  ;;  %v20341_v34 = vand.u32 4294901760, %v19541_v63  ;;  %v10378_v54 = vsub.f32 %v19539_v9, %v20342_v33 }
 0xee3   : > { %17684 = vmatpush3.bf16.msra.mxu0 %v19485_v19  ;;  %v10321_v19 = vand.u32 4294901760, %v19516_v52  ;;  %v10379_v14 = vand.u32 4294901760, %v10378_v54 }
 0xee4   : > { %17685 = vmatprep.subr.bf16.mxu0 %v18315_v3 }
 0xee5   : > { %v10322_v32 = vsub.f32 %v19516_v52, %v10321_v19 }
 0xee6   : > { %16652 = vmatmul.mubr.f32.vlgmr.msra.gmra.mrb[38].mxu0 %v9806_v48 }
 0xee7   : > { %17687 = vmatpush3.bf16.msra.mxu0 %v19451_v24  ;;  %16662 = vmatprep.mubr.msk.f32.mxu0 %vm18316_vm0, %v18317_v8  ;;  %v10261_v24 = vand.u32 4294901760, %v9724_v55  ;;  %v10323_v11 = vand.u32 4294901760, %v10322_v32  ;;  %v10385_v32 = vsub.f32 %v19541_v63, %v20341_v34 }
 0xee8   : > { %17688 = vmatprep.subr.bf16.mxu0 %v18315_v3 }
 0xee9   : > { %v19610_v29 = vpack.c.bf16 %v10261_v24, %v10258_v53  ;;  %v19642_v30 = vsub.f32 %v9724_v55, %v10261_v24  ;;  %v19656_v21 = vpack.c.bf16 %v10330_v35, %v10323_v11  ;;  %v20344_v55 = vand.u32 4294901760, %v19535_v25 }
 0xeea   : > { %v20343_v53 = vand.u32 4294901760, %v19537_v27  ;;  %v17722_v24 = vpack.c.bf16 %v10358_v58, %v10351_v6  ;;  %v10386_v11 = vand.u32 4294901760, %v10385_v32  ;;  %v20340_v35 = vand.u32 4294901760, %v19640_v23 }
 0xeeb   : > { %17690 = vmatpush3.bf16.msra.mxu0 %v19462_v44  ;;  %17708 = vmatpush3.bf16.msra.mxu1 %v19610_v29  ;;  %v10267_v44 = vand.u32 4294901760, %v9726_v59  ;;  %v10364_v0 = vsub.f32 %v19535_v25, %v20344_v55  ;;  %v20339_v37 = vand.u32 4294901760, %v19642_v30  ;;  %v20335_v6 = vand.u32 4294901760, %v19644_v40 }
 0xeec   : > { %16875 = vmatprep.subr.mxu0 %v18317_v8  ;;  %17709 = vmatprep.subr.bf16.mxu1 %v18315_v3  ;;  %v20336_v32 = vand.u32 4294901760, %v19649_v61 }
 0xeed   : > { %v19620_v16 = vpack.c.bf16 %v10267_v44, %v10264_v13  ;;  %v19646_v47 = vsub.f32 %v9726_v59, %v10267_v44  ;;  %v10371_v59 = vsub.f32 %v19537_v27, %v20343_v53  ;;  %v10365_v13 = vand.u32 4294901760, %v10364_v0 }
 0xeee   : > { %16663 = vmatmul.mubr.f32.vlgmr.msra.gmra.mrb[38].mxu0 %v9806_v48  ;;  %v10344_v48 = vand.u32 4294901760, %v10343_v38  ;;  %v17728_v38 = vpack.c.bf16 %v10386_v11, %v10379_v14  ;;  %v20337_v14 = vand.u32 4294901760, %v19651_v7 }
 0xeef   : > { %16877 = vmatprep.mubr.msk.f32.mxu0 %vm18316_vm0, %v18317_v8  ;;  %17711 = vmatpush3.bf16.msra.mxu1 %v19620_v16  ;;  %v10372_v44 = vand.u32 4294901760, %v10371_v59  ;;  %v20338_v58 = vand.u32 4294901760, %v19646_v47  ;;  %v10406_v59 = vsub.f32 %v19644_v40, %v20335_v6 }
 0xef0   : > { %17712 = vmatprep.subr.bf16.mxu1 %v18315_v3  ;;  %v17719_v26 = vpack.c.bf16 %v10344_v48, %v10337_v46  ;;  %v10392_v46 = vsub.f32 %v19640_v23, %v20340_v35  ;;  %v10399_v48 = vsub.f32 %v19642_v30, %v20339_v37 }
 0xef1   : > { %v17725_v41 = vpack.c.bf16 %v10372_v44, %v10365_v13  ;;  %v10413_v13 = vsub.f32 %v19646_v47, %v20338_v58  ;;  %v10407_v44 = vand.u32 4294901760, %v10406_v59  ;;  %v17740_v59 = vpack.c.bf16 %v19518_v2, %v19516_v52 }
 0xef2   : > { %v10393_v49 = vand.u32 4294901760, %v10392_v46  ;;  %v10400_v56 = vand.u32 4294901760, %v10399_v48  ;;  %v10420_v46 = vsub.f32 %v19649_v61, %v20336_v32  ;;  %v10427_v48 = vsub.f32 %v19651_v7, %v20337_v14 }
 0xef3   : > { %17714 = vmatpush3.bf16.msra.mxu1 %v19632_v31  ;;  %v10414_v54 = vand.u32 4294901760, %v10413_v13  ;;  %v17743_v13 = vpack.c.bf16 %v19527_v20, %v19520_v1  ;;  %v17752_v32 = vpack.c.bf16 %v19541_v63, %v19539_v9  ;;  %v20347_v52 = vand.u32 4294901760, %v19529_v4 }
 0xef4   : > { %17715 = vmatprep.subr.bf16.mxu1 %v18315_v3  ;;  %v17731_v0 = vpack.c.bf16 %v10400_v56, %v10393_v49  ;;  %v10421_v49 = vand.u32 4294901760, %v10420_v46  ;;  %v10428_v56 = vand.u32 4294901760, %v10427_v48  ;;  %v17755_v46 = vpack.c.bf16 %v19642_v30, %v19640_v23 }
 0xef5   : > { %v17734_v11 = vpack.c.bf16 %v10414_v54, %v10407_v44  ;;  %v17746_v44 = vpack.c.bf16 %v19532_v10, %v19529_v4  ;;  %v17749_v54 = vpack.c.bf16 %v19537_v27, %v19535_v25  ;;  %v17758_v48 = vpack.c.bf16 %v19646_v47, %v19644_v40 }
 0xef6   : > { %v17737_v6 = vpack.c.bf16 %v10428_v56, %v10421_v49  ;;  %v17761_v49 = vpack.c.bf16 %v19651_v7, %v19649_v61  ;;  %v19731_v56 = vld [vmem:[%s20333_s12] sm:$0xff]  ;;  %v20348_v2 = vand.u32 4294901760, %v19532_v10  ;;  %v20350_v1 = vand.u32 4294901760, %v19537_v27 }
 0xef7   : > { %v9733_v14 = vrot.slane %v19731_v56, %v18619_v5  ;;  %v17788_v5 = vpack.c.bf16 %v10328_v17, %v10321_v19  ;;  %v20349_v17 = vand.u32 4294901760, %v19535_v25  ;;  %v20353_v4 = vand.u32 4294901760, %v19640_v23 }
 0xef8   : > { %v17794_v19 = vpack.c.bf16 %v20348_v2, %v20347_v52  ;;  %v20354_v10 = vand.u32 4294901760, %v19642_v30  ;;  %v20355_v25 = vand.u32 4294901760, %v19644_v40  ;;  %v20356_v27 = vand.u32 4294901760, %v19646_v47 }
 0xef9   : > { %v17797_v20 = vpack.c.bf16 %v20350_v1, %v20349_v17  ;;  %v10917_v17 = vrot.slane %v19731_v56, %v18895_v50 }
 0xfc1   : > { %v10218_v58 = vpop.f32.mrb[38].mxu0 }
 0xfc2   : > { %v17988_v37 = vadd.f32 %v10218_v58, %v9733_v14  ;;  %v16664_v35 = vpop.f32.mrb[39].mxu0 }
 0xfc4   : > { %v10222_v34 = vmax.f32 %v17988_v37, 0.0 }
 0xfc6   : > { %v19735_v33 = vand.u32 4294901760, %v10222_v34 }
 0xfc8   : > { %v10309_v53 = vsub.f32 %v10222_v34, %v19735_v33 }
 0xfca   : > { %v10310_v55 = vand.u32 4294901760, %v10309_v53 }
 0xfcc   : > { %v10311_v45 = vsub.f32 %v10309_v53, %v10310_v55 }
 0xfce   : > { %v10312_v39 = vand.u32 4294901760, %v10311_v45  ;;  %v17803_v45 = vpack.c.bf16 %v20354_v10, %v20353_v4 }
 0xfd0   : > { %16698 = vmatmul.mubr.f32.vlgmr.msra.gmra.mrb[40].mxu1 %v10312_v39 }
 0xfd1   : > { %17717 = vmatpush3.bf16.msra.mxu1 %v19656_v21  ;;  %16732 = vmatprep.mubr.msk.f32.mxu1 %vm18316_vm0, %v18317_v8  ;;  %v17791_v21 = vpack.c.bf16 %v10342_v36, %v10335_v60  ;;  %v20351_v60 = vand.u32 4294901760, %v19539_v9  ;;  %v20352_v36 = vand.u32 4294901760, %v19541_v63  ;;  %v20357_v9 = vand.u32 4294901760, %v19649_v61 }
 0xfd2   : > { %17718 = vmatprep.subr.bf16.mxu1 %v18315_v3  ;;  %v20358_v63 = vand.u32 4294901760, %v19651_v7 }
 0xfd3   : > { %v17800_v39 = vpack.c.bf16 %v20352_v36, %v20351_v60 }
 0xfd5   : > { %17720 = vmatpush3.bf16.msra.mxu1 %v17719_v26  ;;  %v17806_v26 = vpack.c.bf16 %v20356_v27, %v20355_v25 }
 0xfd6   : > { %17721 = vmatprep.subr.bf16.mxu1 %v18315_v3 }
 0xfd9   : > { %17723 = vmatpush3.bf16.msra.mxu1 %v17722_v24 }
 0xfda   : > { %17724 = vmatprep.subr.bf16.mxu1 %v18315_v3 }
 0xfdd   : > { %17726 = vmatpush3.bf16.msra.mxu1 %v17725_v41 }
 0xfde   : > { %17727 = vmatprep.subr.bf16.mxu1 %v18315_v3 }
 0xfe1   : > { %17729 = vmatpush3.bf16.msra.mxu1 %v17728_v38  ;;  %v19850_v38 = vmul.u32 4, %v18497_v42 }
 0xfe2   : > { %17730 = vmatprep.subr.bf16.mxu1 %v18315_v3 }
 0xfe3   : > { %vm10923_vm12 = vcmp.eq.s32.totalorder %v18732_v22, %v19850_v38 }
 0xfe5   : > { %17732 = vmatpush3.bf16.msra.mxu1 %v17731_v0  ;;  %v13790_v0 = vadd.s32 3, %v19850_v38 }
 0xfe6   : > { %17733 = vmatprep.subr.bf16.mxu1 %v18315_v3 }
 0xfe7   : > { %vm13791_vm13 = vcmp.eq.s32.totalorder %v18732_v22, %v13790_v0 }
 0xfe9   : > { %17735 = vmatpush3.bf16.msra.mxu1 %v17734_v11 }
 0xfea   : > { %17736 = vmatprep.subr.bf16.mxu1 %v18315_v3 }
 0xfed   : > { %17738 = vmatpush3.bf16.msra.mxu1 %v17737_v6 }
 0xfee   : > { %17739 = vmatprep.subr.bf16.mxu1 %v18315_v3 }
 0xff0   : > { %16733 = vmatmul.mubr.f32.vlgmr.msra.gmra.mrb[40].mxu1 %v19735_v33 }
 0xff1   : > { %17741 = vmatpush3.bf16.msra.mxu1 %v17740_v59  ;;  %16767 = vmatprep.mubr.msk.f32.mxu1 %vm18316_vm0, %v18317_v8  ;;  %v19857_v59 = vsel %vm10923_vm12, 1.0, %v18317_v8 }
 0xff2   : > { %17742 = vmatprep.subr.bf16.mxu1 %v18315_v3 }
 0xff5   : > { %17744 = vmatpush3.bf16.msra.mxu1 %v17743_v13  ;;  %v19860_v13 = vsel %vm13791_vm13, 1.0, %v18317_v8 }
 0xff6   : > { %17745 = vmatprep.subr.bf16.mxu1 %v18315_v3 }
 0xff9   : > { %17747 = vmatpush3.bf16.msra.mxu1 %v17746_v44  ;;  %v10939_v44 = vsel %vm2466_vm5, %v19857_v59, 0 }
 0xffa   : > { %17748 = vmatprep.subr.bf16.mxu1 %v18315_v3 }
 0xffd   : > { %17750 = vmatpush3.bf16.msra.mxu1 %v17749_v54  ;;  %v13811_v54 = vsel %vm2466_vm5, %v19860_v13, 0 }
 0xffe   : > { %17751 = vmatprep.subr.bf16.mxu1 %v18315_v3 }
0x1001   : > { %17753 = vmatpush3.bf16.msra.mxu1 %v17752_v32 }
0x1002   : > { %17754 = vmatprep.subr.bf16.mxu1 %v18315_v3 }
0x1005   : > { %17756 = vmatpush3.bf16.msra.mxu1 %v17755_v46  ;;  %v11008_v46 = vsub.f32 %v10939_v44, %v10939_v44 }
0x1006   : > { %17757 = vmatprep.subr.bf16.mxu1 %v18315_v3 }
0x1007   : > { %v11009_v52 = vand.u32 4294901760, %v11008_v46 }
0x1009   : > { %17759 = vmatpush3.bf16.msra.mxu1 %v17758_v48  ;;  %v13880_v48 = vsub.f32 %v13811_v54, %v13811_v54  ;;  %v11010_v60 = vsub.f32 %v11008_v46, %v11009_v52 }
0x100a   : > { %17760 = vmatprep.subr.bf16.mxu1 %v18315_v3 }
0x100b   : > { %v13881_v2 = vand.u32 4294901760, %v13880_v48  ;;  %v11011_v10 = vand.u32 4294901760, %v11010_v60 }
0x100d   : > { %17762 = vmatpush3.bf16.msra.mxu1 %v17761_v49  ;;  %v13882_v36 = vsub.f32 %v13880_v48, %v13881_v2 }
0x100e   : > { %17763 = vmatprep.subr.bf16.mxu1 %v18315_v3 }
0x1010   : > { %16768 = vmatmul.mubr.f32.vlgmr.msra.gmra.mrb[40].mxu1 %v10309_v53 }
0x1011   : > { %17765 = vmatpush3.bf16.msra.mxu1 %v19514_v51  ;;  %16802 = vmatprep.mubr.msk.f32.mxu1 %vm18316_vm0, %v18317_v8 }
0x1012   : > { %17766 = vmatprep.subr.bf16.mxu1 %v18315_v3 }
0x1015   : > { %17768 = vmatpush3.bf16.msra.mxu1 %v19525_v57 }
0x1016   : > { %17769 = vmatprep.subr.bf16.mxu1 %v18315_v3 }
0x1019   : > { %17771 = vmatpush3.bf16.msra.mxu1 %v19544_v15 }
0x101a   : > { %17772 = vmatprep.subr.bf16.mxu1 %v18315_v3 }
0x101d   : > { %17774 = vmatpush3.bf16.msra.mxu1 %v19548_v18 }
0x101e   : > { %17775 = vmatprep.subr.bf16.mxu1 %v18315_v3 }
0x1021   : > { %17777 = vmatpush3.bf16.msra.mxu1 %v19552_v62 }
0x1022   : > { %17778 = vmatprep.subr.bf16.mxu1 %v18315_v3 }
0x1025   : > { %17780 = vmatpush3.bf16.msra.mxu1 %v19610_v29 }
0x1026   : > { %17781 = vmatprep.subr.bf16.mxu1 %v18315_v3 }
0x1029   : > { %17783 = vmatpush3.bf16.msra.mxu1 %v19620_v16 }
0x102a   : > { %17784 = vmatprep.subr.bf16.mxu1 %v18315_v3 }
0x102d   : > { %17786 = vmatpush3.bf16.msra.mxu1 %v19632_v31 }
0x102e   : > { %17787 = vmatprep.subr.bf16.mxu1 %v18315_v3 }
0x1030   : > { %16803 = vmatmul.mubr.f32.vlgmr.msra.gmra.mrb[40].mxu1 %v10310_v55  ;;  %v17809_v55 = vpack.c.bf16 %v20358_v63, %v20357_v9 }
0x1031   : > { %17789 = vmatpush3.bf16.msra.mxu1 %v17788_v5  ;;  %16837 = vmatprep.mubr.msk.f32.mxu1 %vm18316_vm0, %v18317_v8  ;;  %v10911_v5 = vrot.slane %v19731_v56, %v18884_v12 }
0x1032   : > { %17790 = vmatprep.subr.bf16.mxu1 %v18315_v3 }
0x1035   : > { %17792 = vmatpush3.bf16.msra.mxu1 %v17791_v21 }
0x1036   : > { %17793 = vmatprep.subr.bf16.mxu1 %v18315_v3 }
0x1039   : > { %17795 = vmatpush3.bf16.msra.mxu1 %v17794_v19 }
0x103a   : > { %17796 = vmatprep.subr.bf16.mxu1 %v18315_v3 }
0x103d   : > { %17798 = vmatpush3.bf16.msra.mxu1 %v17797_v20 }
0x103e   : > { %17799 = vmatprep.subr.bf16.mxu1 %v18315_v3 }
0x1041   : > { %17801 = vmatpush3.bf16.msra.mxu1 %v17800_v39 }
0x1042   : > { %17802 = vmatprep.subr.bf16.mxu1 %v18315_v3 }
0x1045   : > { %17804 = vmatpush3.bf16.msra.mxu1 %v17803_v45  ;;  %v13883_v45 = vand.u32 4294901760, %v13882_v36 }
0x1046   : > { %17805 = vmatprep.subr.bf16.mxu1 %v18315_v3 }
0x1049   : > { %17807 = vmatpush3.bf16.msra.mxu1 %v17806_v26  ;;  %v11387_v26 = vadd.s32 1, %v19850_v38 }
0x104a   : > { %17808 = vmatprep.subr.bf16.mxu1 %v18315_v3 }
0x104b   : > { %vm11388_vm14 = vcmp.eq.s32.totalorder %v18732_v22, %v11387_v26 }
0x104c   : > { %v14833_v9 = vsel %vm11388_vm14, 1.0, %v18317_v8 }
0x104d   : > { %17810 = vmatpush3.bf16.msra.mxu1 %v17809_v55  ;;  %v11408_v63 = vsel %vm2466_vm5, %v14833_v9, 0 }
0x104e   : > { %17811 = vmatprep.subr.bf16.mxu1 %v18315_v3  ;;  %v11477_v55 = vsub.f32 %v11408_v63, %v11408_v63 }
0x1050   : > { %16838 = vmatmul.mubr.f32.vlgmr.msra.gmra.mrb[40].mxu1 %v19735_v33 }
0x1051   : > { %17813 = vmatpush3.bf16.msra.mxu1 %v19514_v51  ;;  %16872 = vmatprep.mubr.msk.f32.mxu1 %vm18316_vm0, %v18317_v8  ;;  %v10226_v51 = vrot.slane %v19731_v56, %v18500_v43 }
0x1052   : > { %17814 = vmatprep.subr.bf16.mxu1 %v18315_v3 }
0x1055   : > { %17816 = vmatpush3.bf16.msra.mxu1 %v19525_v57 }
0x1056   : > { %17817 = vmatprep.subr.bf16.mxu1 %v18315_v3 }
0x1059   : > { %17819 = vmatpush3.bf16.msra.mxu1 %v19544_v15 }
0x105a   : > { %17820 = vmatprep.subr.bf16.mxu1 %v18315_v3 }
0x105d   : > { %17822 = vmatpush3.bf16.msra.mxu1 %v19548_v18 }
0x105e   : > { %17823 = vmatprep.subr.bf16.mxu1 %v18315_v3 }
0x1061   : > { %17825 = vmatpush3.bf16.msra.mxu1 %v19552_v62 }
0x1062   : > { %17826 = vmatprep.subr.bf16.mxu1 %v18315_v3 }
0x1065   : > { %17828 = vmatpush3.bf16.msra.mxu1 %v19610_v29 }
0x1066   : > { %17829 = vmatprep.subr.bf16.mxu1 %v18315_v3 }
0x1069   : > { %17831 = vmatpush3.bf16.msra.mxu1 %v19620_v16 }
0x106a   : > { %17832 = vmatprep.subr.bf16.mxu1 %v18315_v3 }
0x106d   : > { %17834 = vmatpush3.bf16.msra.mxu1 %v19632_v31 }
0x106e   : > { %17163 = vmatprep.subr.mxu1 %v18317_v8 }
0x1070   : > { %16873 = vmatmul.mubr.f32.vlgmr.msra.gmra.mrb[40].mxu1 %v19735_v33 }
0x1071   : > { %17165 = vmatprep.mubr.msk.f32.mxu1 %vm18316_vm0, %v18317_v8 }
0x1143   : > { %v10864_v57 = vpop.f32.mrb[40].mxu1 }
0x1144   : > { %v17989_v15 = vadd.f32 %v10864_v57, %v10226_v51  ;;  %v16874_v18 = vpop.f32.mrb[41].mxu1  ;;  %v11478_v51 = vand.u32 4294901760, %v11477_v55 }
0x1145   : > { %v19971_v18 = vadd.s32 8, %v18497_v42 }
0x1146   : > { %v14824_v62 = vmul.f32 -1.442695, %v17989_v15  ;;  %v11479_v57 = vsub.f32 %v11477_v55, %v11478_v51 }
0x1147   : > { %vm10927_vm9 = vcmp.eq.s32.totalorder %v18732_v22, %v19971_v18 }
0x1148   : > { %18296 = vpow2.f32 %v14824_v62  ;;  %v11391_v62 = vadd.s32 32, %v18497_v42  ;;  %vm20074_vm12 = vmpackc.low %vm10927_vm9, %vm10926_vm8 }
0x114a   : > { %vm11395_vm15 = vcmp.eq.s32.totalorder %v18732_v22, %v11391_v62 }
0x1152   : > { %v18297_v29 = vpop.eup %18296 }
0x1153   : > { %v10871_v16 = vadd.f32 1.0, %v18297_v29  ;;  %v11392_v29 = vadd.s32 32, %v19971_v18 }
0x1155   : > { %18298 = vrcp.f32 %v10871_v16  ;;  %vm11396_vm2 = vcmp.eq.s32.totalorder %v18732_v22, %v11392_v29  ;;  %v19978_v16 = vadd.s32 16, %v18497_v42 }
0x1156   : > { %vm19987_vm3 = vmpackc.low %vm11396_vm2, %vm11395_vm15 }
0x115f   : > { %v18299_v23 = vpop.eup %18298 }
0x1160   : > { %v10875_v31 = vsub.f32 1.0, %v18299_v23  ;;  %v10874_v47 = vmul.f32 %v18299_v23, %v19564_v28  ;;  %v19981_v23 = vadd.s32 24, %v18497_v42 }
0x1162   : > { %10877 = vrot.lane.b32.xlu0 %v10875_v31, %s18323_s19  ;;  %v14834_v31 = vsel %vm11395_vm15, 1.0, %v18317_v8 }
0x11d4   : > { %v10878_v30 = vpop.permute.xlu0 %10877 }
0x11d5   : > { %v10880_v40 = vmul.f32 %v17989_v15, %v10878_v30  ;;  %v11480_v15 = vand.u32 4294901760, %v11479_v57  ;;  %v14835_v30 = vsel %vm11396_vm2, 1.0, %v18317_v8 }
0x11d7   : > { %10882 = vrot.lane.b32.xlu1 %v10880_v40, %s18319_s27  ;;  %v11940_v40 = vsub.f32 %v14834_v31, %v14834_v31  ;;  %s14821_s27 = sshll.u32 %s20376_s26, 1 }
0x11d8   : > { %s452_s22 = scalar_lea.vmem %s20334_s13, %s14821_s27 }
0x1249   : > { %v10883_v61 = vpop.permute.xlu1 %10882 }
0x124a   : > { %v10885_v43 = vadd.f32 %v10883_v61, %v10874_v47  ;;  %v11947_v47 = vsub.f32 %v14835_v30, %v14835_v30  ;;  %v11393_v61 = vadd.s32 32, %v19978_v16 }
0x124c   : > { %v10886_v7 = vsel %vm476_vm1, %v10885_v43, 0.0  ;;  %vm11397_vm4 = vcmp.eq.s32.totalorder %v18732_v22, %v11393_v61 }
0x124d   : > { %10887 = vadd.xlane.f32.xlu0 %v10886_v7 }
0x12da   : > { %v10888_v53 = vpop.xlane.xlu0 %10887 }
0x12db   : > { %v10889_v24 = vmul.f32 0.03125, %v10888_v53  ;;  %v18324_v53 = vmov 1.0|1.0  }
0x12dd   : > { %v10890_v33 = vsub.f32 %v10885_v43, %v10889_v24  ;;  %v11394_v43 = vadd.s32 32, %v19981_v23  ;;  %v11941_v24 = vand.u32 4294901760, %v11940_v40 }
0x12df   : > { %v10891_v34 = vmul.f32 %v10890_v33, %v10890_v33  ;;  %v10912_v1 = vmul.f32 %v10911_v5, %v10890_v33  ;;  %vm11398_vm6 = vcmp.eq.s32.totalorder %v18732_v22, %v11394_v43  ;;  %v11948_v33 = vand.u32 4294901760, %v11947_v47 }
0x12e0   : > { %vm19999_vm7 = vmpackc.low %vm11398_vm6, %vm11397_vm4 }
0x12e1   : > { %v10892_v41 = vsel %vm476_vm1, %v10891_v34, 0.0  ;;  %v14836_v34 = vsel %vm11397_vm4, 1.0, %v18317_v8 }
0x12e2   : > { %10893 = vadd.xlane.f32.xlu1 %v10892_v41  ;;  %v14837_v41 = vsel %vm11398_vm6, 1.0, %v18317_v8 }
0x136f   : > { %v10894_v35 = vpop.xlane.xlu1 %10893 }
0x1370   : > { %v10895_v37 = vmul.f32 0.032258064, %v10894_v35  ;;  %v11954_v35 = vsub.f32 %v14836_v34, %v14836_v34 }
0x1372   : > { %18300 = vrsqrt.f32 %v10895_v37  ;;  %vm10898_vm10 = vcmp.eq.f32.partialorder %v10895_v37, inf  ;;  %v10901_v58 = vand.u32 2147483648, %v10895_v37  ;;  %vm10900_vm11 = vcmp.eq.f32.partialorder %v10895_v37, 0.0 }
0x137c   : > { %v18301_v6 = vpop.eup %18300 }
0x137d   : > { %v10897_v28 = vmul.f32 %v18301_v6, %v10895_v37  ;;  %v11942_v6 = vsub.f32 %v11940_v40, %v11941_v24 }
0x137f   : > { %v10899_v32 = vsel %vm10898_vm10, %v10895_v37, %v10897_v28  ;;  %v11961_v37 = vsub.f32 %v14837_v41, %v14837_v41  ;;  %v11949_v28 = vsub.f32 %v11947_v47, %v11948_v33  ;;  %v11943_v0 = vand.u32 4294901760, %v11942_v6 }
0x1380   : > { %v10902_v14 = vsel %vm10900_vm11, %v10901_v58, %v10899_v32  ;;  %vm10928_vm10 = vcmp.eq.s32.totalorder %v18732_v22, %v19978_v16  ;;  %vm10929_vm11 = vcmp.eq.s32.totalorder %v18732_v22, %v19981_v23 }
0x1381   : > { %v10903_v11 = vadd.f32 1e-06, %v10902_v14  ;;  %v11950_v32 = vand.u32 4294901760, %v11949_v28  ;;  %v11955_v14 = vand.u32 4294901760, %v11954_v35  ;;  %v17851_v5 = vpack.c.bf16 %v11961_v37, %v11954_v35  ;;  %vm20090_vm13 = vmpackc.low %vm10929_vm11, %vm10928_vm10 }
0x1382   : > { %v14829_v57 = vsel %vm10929_vm11, 1.0, %v18317_v8 }
0x1383   : > { %18302 = vrcp.f32 %v10903_v11  ;;  %v12449_v62 = vsub.f32 %v14829_v57, %v14829_v57 }
0x1385   : > { %v12450_v43 = vand.u32 4294901760, %v12449_v62 }
0x138d   : > { %v18303_v49 = vpop.eup %18302 }
0x138e   : > { %v10905_v21 = vmul.f32 %v18303_v49, %v10903_v11  ;;  %v11962_v11 = vand.u32 4294901760, %v11961_v37 }
0x1390   : > { %v10906_v19 = vsub.f32 2.0, %v10905_v21  ;;  %v11963_v44 = vsub.f32 %v11961_v37, %v11962_v11  ;;  %v17860_v21 = vpack.c.bf16 %v11948_v33, %v11941_v24 }
0x1392   : > { %v10907_v20 = vmul.f32 %v18303_v49, %v10906_v19  ;;  %v17848_v49 = vpack.c.bf16 %v11947_v47, %v11940_v40 }
0x1394   : > { %v10913_v39 = vmul.f32 %v10912_v1, %v10907_v20 }
0x1396   : > { %v10918_v4 = vadd.f32 %v10917_v17, %v10913_v39 }
0x1398   : > { %v19870_v25 = vand.u32 4294901760, %v10918_v4 }
0x139a   : > { %16876 = vmatpush3.msra.mxu0 %v19870_v25  ;;  %17164 = vmatpush3.msra.mxu1 %v19870_v25  ;;  %v19875_v12 = vsub.f32 %v10918_v4, %v19870_v25 }
0x139b   : > { %16878 = vmatmul.mubr.f32.vlgmr.msra.gmra.mrb[40].mxu0 %v11011_v10  ;;  %17166 = vmatmul.mubr.f32.vlgmr.msra.gmra.mrb[42].mxu1 %v13883_v45  ;;  %v14826_v45 = vsel %vm10926_vm8, 1.0, %v18317_v8 }
0x139c   : > { %16880 = vmatprep.subr.mxu0 %v18317_v8  ;;  %17168 = vmatprep.subr.mxu1 %v18317_v8  ;;  %v19880_v50 = vand.u32 4294901760, %v19875_v12 }
0x139d   : > { %16882 = vmatprep.mubr.msk.f32.mxu0 %vm18316_vm0, %v18317_v8  ;;  %17170 = vmatprep.mubr.msk.f32.mxu1 %vm18316_vm0, %v18317_v8 }
0x139e   : > { %v11021_v56 = vsub.f32 %v19875_v12, %v19880_v50 }
0x13a0   : > { %v19888_v27 = vand.u32 4294901760, %v11021_v56  ;;  %v14827_v56 = vsel %vm10927_vm9, 1.0, %v18317_v8 }
0x13a1   : > { %v12435_v63 = vsub.f32 %v14827_v56, %v14827_v56 }
0x13a2   : > { %16881 = vmatpush3.msra.mxu0 %v19888_v27  ;;  %17169 = vmatpush3.msra.mxu1 %v19888_v27 }
0x13a3   : > { %16883 = vmatmul.mubr.msk.f32.vlgmr.msra.gmra.mrb[40].mxu0 %vm2466_vm5, %v19857_v59  ;;  %16885 = vmatprep.subr.mxu0 %v18317_v8  ;;  %v12436_v31 = vand.u32 4294901760, %v12435_v63 }
0x13a4   : > { %17171 = vmatmul.mubr.msk.f32.vlgmr.msra.gmra.mrb[42].mxu1 %vm2466_vm5, %v19860_v13  ;;  %17173 = vmatprep.subr.mxu1 %v18317_v8 }
0x13a5   : > { %16886 = vmatpush3.msra.mxu0 %v19875_v12  ;;  %17174 = vmatpush3.msra.mxu1 %v19875_v12  ;;  %v12437_v47 = vsub.f32 %v12435_v63, %v12436_v31 }
0x13a6   : > { %16887 = vmatprep.mubr.msk.f32.mxu0 %vm18316_vm0, %v18317_v8  ;;  %16890 = vmatprep.subr.mxu0 %v18317_v8 }
0x13a7   : > { %17175 = vmatprep.mubr.msk.f32.mxu1 %vm18316_vm0, %v18317_v8  ;;  %17178 = vmatprep.subr.mxu1 %v18317_v8  ;;  %v12438_v34 = vand.u32 4294901760, %v12437_v47 }
0x13ab   : > { %16888 = vmatmul.mubr.f32.vlgmr.msra.gmra.mrb[40].mxu0 %v11008_v46  ;;  %v11964_v46 = vand.u32 4294901760, %v11963_v44 }
0x13ac   : > { %16891 = vmatpush3.msra.mxu0 %v19870_v25  ;;  %17176 = vmatmul.mubr.f32.vlgmr.msra.gmra.mrb[42].mxu1 %v13880_v48 }
0x13ad   : > { %17179 = vmatpush3.msra.mxu1 %v19870_v25  ;;  %16892 = vmatprep.mubr.msk.f32.mxu0 %vm18316_vm0, %v18317_v8 }
0x13ae   : > { %16895 = vmatprep.subr.mxu0 %v18317_v8  ;;  %17180 = vmatprep.mubr.msk.f32.mxu1 %vm18316_vm0, %v18317_v8 }
0x13af   : > { %17183 = vmatprep.subr.mxu1 %v18317_v8 }
0x13b3   : > { %16893 = vmatmul.mubr.f32.vlgmr.msra.gmra.mrb[40].mxu0 %v11009_v52  ;;  %v17863_v52 = vpack.c.bf16 %v11962_v11, %v11955_v14 }
0x13b4   : > { %16896 = vmatpush3.msra.mxu0 %v19880_v50  ;;  %17181 = vmatmul.mubr.f32.vlgmr.msra.gmra.mrb[42].mxu1 %v13881_v2 }
0x13b5   : > { %17184 = vmatpush3.msra.mxu1 %v19880_v50  ;;  %16897 = vmatprep.mubr.msk.f32.mxu0 %vm18316_vm0, %v18317_v8 }
0x13b6   : > { %16900 = vmatprep.subr.mxu0 %v18317_v8  ;;  %17185 = vmatprep.mubr.msk.f32.mxu1 %vm18316_vm0, %v18317_v8 }
0x13b7   : > { %17188 = vmatprep.subr.mxu1 %v18317_v8 }
0x13bb   : > { %16898 = vmatmul.mubr.msk.f32.vlgmr.msra.gmra.mrb[40].mxu0 %vm2466_vm5, %v19857_v59 }
0x13bc   : > { %16901 = vmatpush3.msra.mxu0 %v19870_v25  ;;  %17186 = vmatmul.mubr.msk.f32.vlgmr.msra.gmra.mrb[42].mxu1 %vm2466_vm5, %v19860_v13 }
0x13bd   : > { %17189 = vmatpush3.msra.mxu1 %v19870_v25  ;;  %16902 = vmatprep.mubr.msk.f32.mxu0 %vm18316_vm0, %v18317_v8 }
0x13be   : > { %16905 = vmatprep.subr.mxu0 %v18317_v8  ;;  %17190 = vmatprep.mubr.msk.f32.mxu1 %vm18316_vm0, %v18317_v8 }
0x13c3   : > { %16903 = vmatmul.mubr.msk.f32.vlgmr.msra.gmra.mrb[40].mxu0 %vm2466_vm5, %v19857_v59  ;;  %v17842_v59 = vpack.c.bf16 %v11950_v32, %v11943_v0 }
0x13c4   : > { %16906 = vmatpush3.msra.mxu0 %v19870_v25  ;;  %16907 = vmatprep.mubr.msk.f32.mxu0 %vm18316_vm0, %v18317_v8 }
0x13c5   : > { %16910 = vmatprep.subr.mxu0 %v18317_v8  ;;  %17191 = vmatmul.mubr.msk.f32.vlgmr.msra.gmra.mrb[42].mxu1 %vm2466_vm5, %v19860_v13  ;;  %v11956_v13 = vsub.f32 %v11954_v35, %v11955_v14  ;;  %v12451_v35 = vsub.f32 %v12449_v62, %v12450_v43 }
0x13c7   : > { %16908 = vmatmul.mubr.f32.vlgmr.msra.gmra.mrb[42].mxu0 %v11480_v15  ;;  %v11957_v54 = vand.u32 4294901760, %v11956_v13  ;;  %v12452_v0 = vand.u32 4294901760, %v12451_v35  ;;  %v12832_v13 = vadd.s32 2, %v19850_v38 }
0x13c8   : > { %16911 = vmatpush3.msra.mxu0 %v19888_v27  ;;  %16912 = vmatprep.mubr.msk.f32.mxu0 %vm18316_vm0, %v18317_v8 }
0x13c9   : > { %16915 = vmatprep.subr.mxu0 %v18317_v8  ;;  %v17845_v48 = vpack.c.bf16 %v11964_v46, %v11957_v54  ;;  %vm12833_vm14 = vcmp.eq.s32.totalorder %v18732_v22, %v12832_v13 }
0x13ca   : > { %v14865_v38 = vsel %vm12833_vm14, 1.0, %v18317_v8 }
0x13cb   : > { %v12853_v46 = vsel %vm2466_vm5, %v14865_v38, 0 }
0x13cf   : > { %16913 = vmatmul.mubr.msk.f32.vlgmr.msra.gmra.mrb[42].mxu0 %vm2466_vm5, %v14833_v9 }
0x13d0   : > { %16916 = vmatpush3.msra.mxu0 %v19875_v12  ;;  %16917 = vmatprep.mubr.msk.f32.mxu0 %vm18316_vm0, %v18317_v8 }
0x13d1   : > { %16920 = vmatprep.subr.mxu0 %v18317_v8 }
0x13d7   : > { %16918 = vmatmul.mubr.f32.vlgmr.msra.gmra.mrb[42].mxu0 %v11477_v55 }
0x13d8   : > { %16921 = vmatpush3.msra.mxu0 %v19870_v25  ;;  %16922 = vmatprep.mubr.msk.f32.mxu0 %vm18316_vm0, %v18317_v8 }
0x13d9   : > { %16925 = vmatprep.subr.mxu0 %v18317_v8 }
0x13df   : > { %16923 = vmatmul.mubr.f32.vlgmr.msra.gmra.mrb[42].mxu0 %v11478_v51  ;;  %v14828_v51 = vsel %vm10928_vm10, 1.0, %v18317_v8 }
0x13e0   : > { %16926 = vmatpush3.msra.mxu0 %v19880_v50  ;;  %16927 = vmatprep.mubr.msk.f32.mxu0 %vm18316_vm0, %v18317_v8  ;;  %v12442_v15 = vsub.f32 %v14828_v51, %v14828_v51 }
0x13e1   : > { %16930 = vmatprep.subr.mxu0 %v18317_v8 }
0x13e2   : > { %v12443_v61 = vand.u32 4294901760, %v12442_v15 }
0x13e4   : > { %v12444_v41 = vsub.f32 %v12442_v15, %v12443_v61  ;;  %v17899_v54 = vpack.c.bf16 %v12450_v43, %v12443_v61 }
0x13e6   : > { %v12445_v58 = vand.u32 4294901760, %v12444_v41 }
0x13e7   : > { %16928 = vmatmul.mubr.msk.f32.vlgmr.msra.gmra.mrb[42].mxu0 %vm2466_vm5, %v14833_v9 }
0x13e8   : > { %16931 = vmatpush3.msra.mxu0 %v19870_v25  ;;  %16932 = vmatprep.mubr.msk.f32.mxu0 %vm18316_vm0, %v18317_v8  ;;  %v17881_v14 = vpack.c.bf16 %v12452_v0, %v12445_v58  ;;  %v13794_v0 = vadd.s32 96, %v18497_v42 }
0x13e9   : > { %17835 = vmatprep.subr.bf16.mxu0 %v18315_v3 }
0x13ef   : > { %16933 = vmatmul.mubr.msk.f32.vlgmr.msra.gmra.mrb[42].mxu0 %vm2466_vm5, %v14833_v9  ;;  %v12428_v9 = vsub.f32 %v14826_v45, %v14826_v45 }
0x13f0   : > { %16943 = vmatprep.mubr.msk.f32.mxu0 %vm18316_vm0, %v18317_v8  ;;  %17837 = vmatpush3.bf16.msk.msra.mxu0 %vm19987_vm3, %v18324_v53 }
0x13f1   : > { %17838 = vmatprep.subr.bf16.mxu0 %v18315_v3  ;;  %v12429_v29 = vand.u32 4294901760, %v12428_v9  ;;  %v17884_v11 = vpack.c.bf16 %v12435_v63, %v12428_v9 }
0x13f3   : > { %v12430_v40 = vsub.f32 %v12428_v9, %v12429_v29  ;;  %v17896_v44 = vpack.c.bf16 %v12436_v31, %v12429_v29 }
0x13f4   : > { %17840 = vmatpush3.bf16.msk.msra.mxu0 %vm19999_vm7, %v18324_v53 }
0x13f5   : > { %17841 = vmatprep.subr.bf16.mxu0 %v18315_v3  ;;  %v12431_v33 = vand.u32 4294901760, %v12430_v40 }
0x13f7   : > { %v17878_v28 = vpack.c.bf16 %v12438_v34, %v12431_v33 }
0x1496   : > { %v11383_v2 = vpop.f32.mrb[40].mxu0 }
0x1497   : > { %v16904_v19 = vpop.f32.mrb[41].mxu0  ;;  %v12345_v26 = vsel %vm476_vm1, %v11383_v2, 0 }
0x1498   : > { %v20046_v55 = vand.u32 4294901760, %v12345_v26  ;;  %v12838_v19 = vadd.s32 64, %v19978_v16 }
0x149a   : > { %v12417_v30 = vsub.f32 %v12345_v26, %v20046_v55 }
0x149c   : > { %v12418_v7 = vand.u32 4294901760, %v12417_v30 }
0x149e   : > { %v12419_v37 = vsub.f32 %v12417_v30, %v12418_v7 }
0x14a0   : > { %v12420_v32 = vand.u32 4294901760, %v12419_v37 }
0x14c2   : > { %v11852_v17 = vpop.f32.mrb[42].mxu0 }
0x14c3   : > { %v11857_v1 = vsel %vm476_vm1, %v11852_v17, 0  ;;  %v16934_v20 = vpop.f32.mrb[43].mxu0  ;;  %v12839_v17 = vadd.s32 64, %v19981_v23 }
0x14c4   : > { %v11928_v60 = vand.u32 4294901760, %v11857_v1  ;;  %v20178_v20 = vpop.f32.mrb[42].mxu1 }
0x14c5   : > { %vm12843_vm4 = vcmp.eq.s32.totalorder %v18732_v22, %v12839_v17 }
0x14c6   : > { %v11929_v36 = vsub.f32 %v11857_v1, %v11928_v60 }
0x14c8   : > { %v11930_v39 = vand.u32 4294901760, %v11929_v36 }
0x14ca   : > { %v11931_v4 = vsub.f32 %v11929_v36, %v11930_v39 }
0x14cc   : > { %v11932_v10 = vand.u32 4294901760, %v11931_v4  ;;  %v14869_v4 = vsel %vm12843_vm4, 1.0, %v18317_v8 }
0x14cd   : > { %v13406_v56 = vsub.f32 %v14869_v4, %v14869_v4 }
0x14ce   : > { %16944 = vmatmul.mubr.f32.vlgmr.msra.gmra.mrb[44].mxu0 %v11932_v10 }
0x14cf   : > { %17843 = vmatpush3.bf16.msra.mxu0 %v17842_v59  ;;  %16954 = vmatprep.mubr.msk.f32.mxu0 %vm18316_vm0, %v18317_v8  ;;  %v17887_v59 = vpack.c.bf16 %v12449_v62, %v12442_v15  ;;  %v13407_v57 = vand.u32 4294901760, %v13406_v56 }
0x14d0   : > { %17844 = vmatprep.subr.bf16.mxu0 %v18315_v3 }
0x14d1   : > { %v13408_v29 = vsub.f32 %v13406_v56, %v13407_v57 }
0x14d3   : > { %17846 = vmatpush3.bf16.msra.mxu0 %v17845_v48  ;;  %v12922_v48 = vsub.f32 %v12853_v46, %v12853_v46  ;;  %v13409_v40 = vand.u32 4294901760, %v13408_v29 }
0x14d4   : > { %17847 = vmatprep.subr.bf16.mxu0 %v18315_v3 }
0x14d6   : > { %16955 = vmatmul.mubr.f32.vlgmr.msra.gmra.mrb[44].mxu0 %v11928_v60 }
0x14d7   : > { %17849 = vmatpush3.bf16.msra.mxu0 %v17848_v49  ;;  %16965 = vmatprep.mubr.msk.f32.mxu0 %vm18316_vm0, %v18317_v8  ;;  %v12923_v49 = vand.u32 4294901760, %v12922_v48 }
0x14d8   : > { %17850 = vmatprep.subr.bf16.mxu0 %v18315_v3 }
0x14db   : > { %17852 = vmatpush3.bf16.msra.mxu0 %v17851_v5  ;;  %v12924_v5 = vsub.f32 %v12922_v48, %v12923_v49 }
0x14dc   : > { %17853 = vmatprep.subr.bf16.mxu0 %v18315_v3 }
0x14de   : > { %16966 = vmatmul.mubr.f32.vlgmr.msra.gmra.mrb[44].mxu0 %v11929_v36  ;;  %v17192_v36 = vpop.f32.mrb[43].mxu1 }
0x14df   : > { %17855 = vmatpush3.bf16.msk.msra.mxu0 %vm19987_vm3, %v18324_v53  ;;  %16976 = vmatprep.mubr.msk.f32.mxu0 %vm18316_vm0, %v18317_v8 }
0x14e0   : > { %17856 = vmatprep.subr.bf16.mxu0 %v18315_v3 }
0x14e3   : > { %17858 = vmatpush3.bf16.msk.msra.mxu0 %vm19999_vm7, %v18324_v53 }
0x14e4   : > { %17859 = vmatprep.subr.bf16.mxu0 %v18315_v3 }
0x14e6   : > { %16977 = vmatmul.mubr.f32.vlgmr.msra.gmra.mrb[44].mxu0 %v11930_v39 }
0x14e7   : > { %17861 = vmatpush3.bf16.msra.mxu0 %v17860_v21  ;;  %16987 = vmatprep.mubr.msk.f32.mxu0 %vm18316_vm0, %v18317_v8  ;;  %v12925_v21 = vand.u32 4294901760, %v12924_v5 }
0x14e8   : > { %17862 = vmatprep.subr.bf16.mxu0 %v18315_v3 }
0x14eb   : > { %17864 = vmatpush3.bf16.msra.mxu0 %v17863_v52 }
0x14ec   : > { %17865 = vmatprep.subr.bf16.mxu0 %v18315_v3 }
0x14ee   : > { %16988 = vmatmul.mubr.f32.vlgmr.msra.gmra.mrb[44].mxu0 %v11928_v60 }
0x14ef   : > { %17867 = vmatpush3.bf16.msk.msra.mxu0 %vm19987_vm3, %v18324_v53  ;;  %16998 = vmatprep.mubr.msk.f32.mxu0 %vm18316_vm0, %v18317_v8  ;;  %vm12842_vm3 = vcmp.eq.s32.totalorder %v18732_v22, %v12838_v19 }
0x14f0   : > { %17868 = vmatprep.subr.bf16.mxu0 %v18315_v3  ;;  %v14868_v39 = vsel %vm12842_vm3, 1.0, %v18317_v8  ;;  %vm20188_vm6 = vmpackc.low %vm12843_vm4, %vm12842_vm3 }
0x14f1   : > { %v13399_v45 = vsub.f32 %v14868_v39, %v14868_v39 }
0x14f3   : > { %17870 = vmatpush3.bf16.msk.msra.mxu0 %vm19999_vm7, %v18324_v53  ;;  %v13400_v51 = vand.u32 4294901760, %v13399_v45  ;;  %v17923_v43 = vpack.c.bf16 %v13406_v56, %v13399_v45  ;;  %vm13798_vm7 = vcmp.eq.s32.totalorder %v18732_v22, %v13794_v0 }
0x14f4   : > { %17871 = vmatprep.subr.bf16.mxu0 %v18315_v3 }
0x14f5   : > { %v13401_v62 = vsub.f32 %v13399_v45, %v13400_v51  ;;  %v17935_v24 = vpack.c.bf16 %v13407_v57, %v13400_v51 }
0x14f6   : > { %16999 = vmatmul.mubr.f32.vlgmr.msra.gmra.mrb[44].mxu0 %v11928_v60 }
0x14f7   : > { %17873 = vmatpush3.bf16.msk.msra.mxu0 %vm20074_vm12, %v18324_v53  ;;  %17009 = vmatprep.mubr.msk.f32.mxu0 %vm18316_vm0, %v18317_v8 }
0x14f8   : > { %17874 = vmatprep.subr.bf16.mxu0 %v18315_v3 }
0x14fb   : > { %17876 = vmatpush3.bf16.msk.msra.mxu0 %vm20090_vm13, %v18324_v53 }
0x14fc   : > { %17877 = vmatprep.subr.bf16.mxu0 %v18315_v3 }
0x14fe   : > { %17010 = vmatmul.mubr.f32.vlgmr.msra.gmra.mrb[44].mxu0 %v12420_v32  ;;  %v13795_v32 = vadd.s32 96, %v19971_v18 }
0x14ff   : > { %17879 = vmatpush3.bf16.msra.mxu0 %v17878_v28  ;;  %17020 = vmatprep.mubr.msk.f32.mxu0 %vm18316_vm0, %v18317_v8 }
0x1500   : > { %17880 = vmatprep.subr.bf16.mxu0 %v18315_v3  ;;  %vm13799_vm8 = vcmp.eq.s32.totalorder %v18732_v22, %v13795_v32 }
0x1503   : > { %17882 = vmatpush3.bf16.msra.mxu0 %v17881_v14  ;;  %v13796_v14 = vadd.s32 96, %v19978_v16  ;;  %v14260_v16 = vsel %vm476_vm1, %v20178_v20, 0 }
0x1504   : > { %17883 = vmatprep.subr.bf16.mxu0 %v18315_v3  ;;  %v20234_v13 = vand.u32 4294901760, %v14260_v16 }
0x1505   : > { %vm13800_vm9 = vcmp.eq.s32.totalorder %v18732_v22, %v13796_v14 }
0x1506   : > { %17021 = vmatmul.mubr.f32.vlgmr.msra.gmra.mrb[44].mxu0 %v20046_v55  ;;  %v14332_v5 = vsub.f32 %v14260_v16, %v20234_v13 }
0x1507   : > { %17885 = vmatpush3.bf16.msra.mxu0 %v17884_v11  ;;  %17031 = vmatprep.mubr.msk.f32.mxu0 %vm18316_vm0, %v18317_v8  ;;  %v13797_v11 = vadd.s32 96, %v19981_v23 }
0x1508   : > { %17886 = vmatprep.subr.bf16.mxu0 %v18315_v3 }
0x1509   : > { %vm13801_vm10 = vcmp.eq.s32.totalorder %v18732_v22, %v13797_v11 }
0x150a   : > { %vm20272_vm11 = vmpackc.low %vm13801_vm10, %vm13800_vm9 }
0x150b   : > { %17888 = vmatpush3.bf16.msra.mxu0 %v17887_v59 }
0x150c   : > { %17889 = vmatprep.subr.bf16.mxu0 %v18315_v3 }
0x150e   : > { %17032 = vmatmul.mubr.f32.vlgmr.msra.gmra.mrb[44].mxu0 %v12417_v30  ;;  %v13402_v30 = vand.u32 4294901760, %v13401_v62 }
0x150f   : > { %17891 = vmatpush3.bf16.msk.msra.mxu0 %vm20074_vm12, %v18324_v53  ;;  %17042 = vmatprep.mubr.msk.f32.mxu0 %vm18316_vm0, %v18317_v8 }
0x1510   : > { %17892 = vmatprep.subr.bf16.mxu0 %v18315_v3  ;;  %v17917_v47 = vpack.c.bf16 %v13409_v40, %v13402_v30 }
0x1513   : > { %17894 = vmatpush3.bf16.msk.msra.mxu0 %vm20090_vm13, %v18324_v53 }
0x1514   : > { %17895 = vmatprep.subr.bf16.mxu0 %v18315_v3 }
0x1516   : > { %17043 = vmatmul.mubr.f32.vlgmr.msra.gmra.mrb[44].mxu0 %v12418_v7 }
0x1517   : > { %17897 = vmatpush3.bf16.msra.mxu0 %v17896_v44  ;;  %17053 = vmatprep.mubr.msk.f32.mxu0 %vm18316_vm0, %v18317_v8  ;;  %v14888_v44 = vsel %vm13800_vm9, 1.0, %v18317_v8 }
0x1518   : > { %17898 = vmatprep.subr.bf16.mxu0 %v18315_v3 }
0x151b   : > { %17900 = vmatpush3.bf16.msra.mxu0 %v17899_v54  ;;  %v14357_v54 = vsub.f32 %v14888_v44, %v14888_v44 }
0x151c   : > { %17901 = vmatprep.subr.bf16.mxu0 %v18315_v3 }
0x151e   : > { %17054 = vmatmul.mubr.f32.vlgmr.msra.gmra.mrb[44].mxu0 %v20046_v55 }
0x151f   : > { %17903 = vmatpush3.bf16.msk.msra.mxu0 %vm20074_vm12, %v18324_v53  ;;  %17064 = vmatprep.mubr.msk.f32.mxu0 %vm18316_vm0, %v18317_v8 }
0x1520   : > { %17904 = vmatprep.subr.bf16.mxu0 %v18315_v3 }
0x1523   : > { %17906 = vmatpush3.bf16.msk.msra.mxu0 %vm20090_vm13, %v18324_v53 }
0x1524   : > { %17067 = vmatprep.subr.mxu0 %v18317_v8 }
0x1526   : > { %17065 = vmatmul.mubr.f32.vlgmr.msra.gmra.mrb[44].mxu0 %v20046_v55 }
0x1527   : > { %17068 = vmatpush3.msra.mxu0 %v19870_v25  ;;  %17069 = vmatprep.mubr.msk.f32.mxu0 %vm18316_vm0, %v18317_v8 }
0x1528   : > { %17072 = vmatprep.subr.mxu0 %v18317_v8 }
0x152a   : > { %17070 = vmatmul.mubr.f32.vlgmr.msra.gmra.mrb[46].mxu0 %v12925_v21 }
0x152b   : > { %17073 = vmatpush3.msra.mxu0 %v19888_v27  ;;  %17074 = vmatprep.mubr.msk.f32.mxu0 %vm18316_vm0, %v18317_v8 }
0x152c   : > { %17077 = vmatprep.subr.mxu0 %v18317_v8 }
0x1532   : > { %17075 = vmatmul.mubr.msk.f32.vlgmr.msra.gmra.mrb[46].mxu0 %vm2466_vm5, %v14865_v38 }
0x1533   : > { %17078 = vmatpush3.msra.mxu0 %v19875_v12  ;;  %17079 = vmatprep.mubr.msk.f32.mxu0 %vm18316_vm0, %v18317_v8  ;;  %v12836_v12 = vadd.s32 64, %v18497_v42  ;;  %v14886_v42 = vsel %vm13798_vm7, 1.0, %v18317_v8 }
0x1534   : > { %17082 = vmatprep.subr.mxu0 %v18317_v8  ;;  %v14343_v23 = vsub.f32 %v14886_v42, %v14886_v42 }
0x1535   : > { %vm12840_vm15 = vcmp.eq.s32.totalorder %v18732_v22, %v12836_v12 }
0x153a   : > { %17080 = vmatmul.mubr.f32.vlgmr.msra.gmra.mrb[46].mxu0 %v12922_v48  ;;  %v14344_v48 = vand.u32 4294901760, %v14343_v23 }
0x153b   : > { %17083 = vmatpush3.msra.mxu0 %v19870_v25  ;;  %17084 = vmatprep.mubr.msk.f32.mxu0 %vm18316_vm0, %v18317_v8 }
0x153c   : > { %17087 = vmatprep.subr.mxu0 %v18317_v8  ;;  %v14345_v21 = vsub.f32 %v14343_v23, %v14344_v48 }
0x1542   : > { %17085 = vmatmul.mubr.f32.vlgmr.msra.gmra.mrb[46].mxu0 %v12923_v49 }
0x1543   : > { %17088 = vmatpush3.msra.mxu0 %v19880_v50  ;;  %17089 = vmatprep.mubr.msk.f32.mxu0 %vm18316_vm0, %v18317_v8  ;;  %v12837_v50 = vadd.s32 64, %v19971_v18  ;;  %v14887_v18 = vsel %vm13799_vm8, 1.0, %v18317_v8 }
0x1544   : > { %17092 = vmatprep.subr.mxu0 %v18317_v8  ;;  %v14350_v59 = vsub.f32 %v14887_v18, %v14887_v18 }
0x1545   : > { %vm12841_vm2 = vcmp.eq.s32.totalorder %v18732_v22, %v12837_v50  ;;  %v14358_v50 = vand.u32 4294901760, %v14357_v54 }
0x1546   : > { %v14867_v27 = vsel %vm12841_vm2, 1.0, %v18317_v8  ;;  %v14351_v49 = vand.u32 4294901760, %v14350_v59  ;;  %v17956_v22 = vpack.c.bf16 %v14350_v59, %v14343_v23 }
0x1547   : > { %v13392_v2 = vsub.f32 %v14867_v27, %v14867_v27  ;;  %v14333_v27 = vand.u32 4294901760, %v14332_v5  ;;  %v14359_v17 = vsub.f32 %v14357_v54, %v14358_v50 }
0x1548   : > { %v14352_v12 = vsub.f32 %v14350_v59, %v14351_v49 }
0x1549   : > { %v13393_v10 = vand.u32 4294901760, %v13392_v2  ;;  %v14334_v20 = vsub.f32 %v14332_v5, %v14333_v27  ;;  %v14360_v39 = vand.u32 4294901760, %v14359_v17 }
0x154a   : > { %17090 = vmatmul.mubr.msk.f32.vlgmr.msra.gmra.mrb[46].mxu0 %vm2466_vm5, %v14865_v38  ;;  %v14353_v19 = vand.u32 4294901760, %v14352_v12 }
0x154b   : > { %17093 = vmatpush3.msra.mxu0 %v19870_v25  ;;  %17094 = vmatprep.mubr.msk.f32.mxu0 %vm18316_vm0, %v18317_v8  ;;  %v14866_v25 = vsel %vm12840_vm15, 1.0, %v18317_v8  ;;  %v13394_v63 = vsub.f32 %v13392_v2, %v13393_v10 }
0x154c   : > { %17907 = vmatprep.subr.bf16.mxu0 %v18315_v3  ;;  %v13385_v52 = vsub.f32 %v14866_v25, %v14866_v25 }
0x154d   : > { %v13395_v15 = vand.u32 4294901760, %v13394_v63 }
0x154e   : > { %v13386_v60 = vand.u32 4294901760, %v13385_v52  ;;  %v17920_v61 = vpack.c.bf16 %v13392_v2, %v13385_v52  ;;  %v14346_v2 = vand.u32 4294901760, %v14345_v21 }
0x1550   : > { %v13387_v26 = vsub.f32 %v13385_v52, %v13386_v60  ;;  %v17932_v7 = vpack.c.bf16 %v13393_v10, %v13386_v60  ;;  %v17950_v36 = vpack.c.bf16 %v14353_v19, %v14346_v2  ;;  %v14335_v10 = vand.u32 4294901760, %v14334_v20 }
0x1552   : > { %17095 = vmatmul.mubr.msk.f32.vlgmr.msra.gmra.mrb[46].mxu0 %vm2466_vm5, %v14865_v38  ;;  %vm20174_vm5 = vmpackc.low %vm12841_vm2, %vm12840_vm15  ;;  %v13388_v55 = vand.u32 4294901760, %v13387_v26  ;;  %v14889_v38 = vsel %vm13801_vm10, 1.0, %v18317_v8  ;;  %v17968_v26 = vpack.c.bf16 %v14351_v49, %v14344_v48 }
0x1553   : > { %17105 = vmatprep.mubr.msk.f32.mxu0 %vm18316_vm0, %v18317_v8  ;;  %17909 = vmatpush3.bf16.msk.msra.mxu0 %vm20174_vm5, %v18324_v53  ;;  %v14364_v46 = vsub.f32 %v14889_v38, %v14889_v38 }
0x1554   : > { %17910 = vmatprep.subr.bf16.mxu0 %v18315_v3  ;;  %v17914_v31 = vpack.c.bf16 %v13395_v15, %v13388_v55 }
0x1555   : > { %v14365_v25 = vand.u32 4294901760, %v14364_v46  ;;  %v17959_v56 = vpack.c.bf16 %v14364_v46, %v14357_v54 }
0x1557   : > { %17912 = vmatpush3.bf16.msk.msra.mxu0 %vm20188_vm6, %v18324_v53  ;;  %v14366_v1 = vsub.f32 %v14364_v46, %v14365_v25  ;;  %v17971_v9 = vpack.c.bf16 %v14365_v25, %v14358_v50 }
0x1558   : > { %17913 = vmatprep.subr.bf16.mxu0 %v18315_v3 }
0x1559   : > { %v14367_v4 = vand.u32 4294901760, %v14366_v1 }
0x155b   : > { %v17953_v45 = vpack.c.bf16 %v14367_v4, %v14360_v39 }
0x1625   : > { %v13297_v33 = vpop.f32.mrb[46].mxu0 }
0x1626   : > { %v13302_v34 = vsel %vm476_vm1, %v13297_v33, 0  ;;  %v17096_v41 = vpop.f32.mrb[47].mxu0  ;;  %vm20258_vm1 = vmpackc.low %vm13799_vm8, %vm13798_vm7 }
0x1627   : > { %v13373_v35 = vand.u32 4294901760, %v13302_v34 }
0x1629   : > { %v13374_v37 = vsub.f32 %v13302_v34, %v13373_v35 }
0x162b   : > { %v13375_v6 = vand.u32 4294901760, %v13374_v37 }
0x162d   : > { %v13376_v28 = vsub.f32 %v13374_v37, %v13375_v6 }
0x162f   : > { %v13377_v58 = vand.u32 4294901760, %v13376_v28 }
0x1631   : > { %17106 = vmatmul.mubr.f32.vlgmr.msra.gmra.mrb[44].mxu0 %v13377_v58 }
0x1632   : > { %17915 = vmatpush3.bf16.msra.mxu0 %v17914_v31  ;;  %17116 = vmatprep.mubr.msk.f32.mxu0 %vm18316_vm0, %v18317_v8 }
0x1633   : > { %17916 = vmatprep.subr.bf16.mxu0 %v18315_v3 }
0x1636   : > { %17918 = vmatpush3.bf16.msra.mxu0 %v17917_v47 }
0x1637   : > { %17919 = vmatprep.subr.bf16.mxu0 %v18315_v3 }
0x1639   : > { %17117 = vmatmul.mubr.f32.vlgmr.msra.gmra.mrb[44].mxu0 %v13373_v35 }
0x163a   : > { %17921 = vmatpush3.bf16.msra.mxu0 %v17920_v61  ;;  %17127 = vmatprep.mubr.msk.f32.mxu0 %vm18316_vm0, %v18317_v8 }
0x163b   : > { %17922 = vmatprep.subr.bf16.mxu0 %v18315_v3 }
0x163e   : > { %17924 = vmatpush3.bf16.msra.mxu0 %v17923_v43 }
0x163f   : > { %17925 = vmatprep.subr.bf16.mxu0 %v18315_v3 }
0x1641   : > { %17128 = vmatmul.mubr.f32.vlgmr.msra.gmra.mrb[44].mxu0 %v13374_v37 }
0x1642   : > { %17927 = vmatpush3.bf16.msk.msra.mxu0 %vm20174_vm5, %v18324_v53  ;;  %17138 = vmatprep.mubr.msk.f32.mxu0 %vm18316_vm0, %v18317_v8 }
0x1643   : > { %17928 = vmatprep.subr.bf16.mxu0 %v18315_v3 }
0x1646   : > { %17930 = vmatpush3.bf16.msk.msra.mxu0 %vm20188_vm6, %v18324_v53 }
0x1647   : > { %17931 = vmatprep.subr.bf16.mxu0 %v18315_v3 }
0x1649   : > { %17139 = vmatmul.mubr.f32.vlgmr.msra.gmra.mrb[44].mxu0 %v13375_v6 }
0x164a   : > { %17933 = vmatpush3.bf16.msra.mxu0 %v17932_v7  ;;  %17149 = vmatprep.mubr.msk.f32.mxu0 %vm18316_vm0, %v18317_v8 }
0x164b   : > { %17934 = vmatprep.subr.bf16.mxu0 %v18315_v3 }
0x164e   : > { %17936 = vmatpush3.bf16.msra.mxu0 %v17935_v24 }
0x164f   : > { %17937 = vmatprep.subr.bf16.mxu0 %v18315_v3 }
0x1651   : > { %17150 = vmatmul.mubr.f32.vlgmr.msra.gmra.mrb[44].mxu0 %v13373_v35 }
0x1652   : > { %17939 = vmatpush3.bf16.msk.msra.mxu0 %vm20174_vm5, %v18324_v53  ;;  %17160 = vmatprep.mubr.msk.f32.mxu0 %vm18316_vm0, %v18317_v8 }
0x1653   : > { %17940 = vmatprep.subr.bf16.mxu0 %v18315_v3 }
0x1656   : > { %17942 = vmatpush3.bf16.msk.msra.mxu0 %vm20188_vm6, %v18324_v53 }
0x1657   : > { %17943 = vmatprep.subr.bf16.mxu0 %v18315_v3 }
0x1659   : > { %17161 = vmatmul.mubr.f32.vlgmr.msra.gmra.mrb[44].mxu0 %v13373_v35 }
0x165a   : > { %17945 = vmatpush3.bf16.msk.msra.mxu0 %vm20258_vm1, %v18324_v53  ;;  %17201 = vmatprep.mubr.msk.f32.mxu0 %vm18316_vm0, %v18317_v8 }
0x165b   : > { %17946 = vmatprep.subr.bf16.mxu0 %v18315_v3 }
0x165e   : > { %17948 = vmatpush3.bf16.msk.msra.mxu0 %vm20272_vm11, %v18324_v53 }
0x165f   : > { %17949 = vmatprep.subr.bf16.mxu0 %v18315_v3 }
0x1661   : > { %17202 = vmatmul.mubr.f32.vlgmr.msra.gmra.mrb[44].mxu0 %v14335_v10 }
0x1662   : > { %17951 = vmatpush3.bf16.msra.mxu0 %v17950_v36  ;;  %17212 = vmatprep.mubr.msk.f32.mxu0 %vm18316_vm0, %v18317_v8 }
0x1663   : > { %17952 = vmatprep.subr.bf16.mxu0 %v18315_v3 }
0x1666   : > { %17954 = vmatpush3.bf16.msra.mxu0 %v17953_v45 }
0x1667   : > { %17955 = vmatprep.subr.bf16.mxu0 %v18315_v3 }
0x1669   : > { %17213 = vmatmul.mubr.f32.vlgmr.msra.gmra.mrb[44].mxu0 %v20234_v13 }
0x166a   : > { %17957 = vmatpush3.bf16.msra.mxu0 %v17956_v22  ;;  %17223 = vmatprep.mubr.msk.f32.mxu0 %vm18316_vm0, %v18317_v8 }
0x166b   : > { %17958 = vmatprep.subr.bf16.mxu0 %v18315_v3 }
0x166e   : > { %17960 = vmatpush3.bf16.msra.mxu0 %v17959_v56 }
0x166f   : > { %17961 = vmatprep.subr.bf16.mxu0 %v18315_v3 }
0x1671   : > { %17224 = vmatmul.mubr.f32.vlgmr.msra.gmra.mrb[44].mxu0 %v14332_v5 }
0x1672   : > { %17963 = vmatpush3.bf16.msk.msra.mxu0 %vm20258_vm1, %v18324_v53  ;;  %17234 = vmatprep.mubr.msk.f32.mxu0 %vm18316_vm0, %v18317_v8 }
0x1673   : > { %17964 = vmatprep.subr.bf16.mxu0 %v18315_v3 }
0x1676   : > { %17966 = vmatpush3.bf16.msk.msra.mxu0 %vm20272_vm11, %v18324_v53 }
0x1677   : > { %17967 = vmatprep.subr.bf16.mxu0 %v18315_v3 }
0x1679   : > { %17235 = vmatmul.mubr.f32.vlgmr.msra.gmra.mrb[44].mxu0 %v14333_v27 }
0x167a   : > { %17969 = vmatpush3.bf16.msra.mxu0 %v17968_v26  ;;  %17245 = vmatprep.mubr.msk.f32.mxu0 %vm18316_vm0, %v18317_v8 }
0x167b   : > { %17970 = vmatprep.subr.bf16.mxu0 %v18315_v3 }
0x167e   : > { %17972 = vmatpush3.bf16.msra.mxu0 %v17971_v9 }
0x167f   : > { %17973 = vmatprep.subr.bf16.mxu0 %v18315_v3 }
0x1681   : > { %17246 = vmatmul.mubr.f32.vlgmr.msra.gmra.mrb[44].mxu0 %v20234_v13 }
0x1682   : > { %17975 = vmatpush3.bf16.msk.msra.mxu0 %vm20258_vm1, %v18324_v53  ;;  %17256 = vmatprep.mubr.msk.f32.mxu0 %vm18316_vm0, %v18317_v8 }
0x1683   : > { %17976 = vmatprep.subr.bf16.mxu0 %v18315_v3 }
0x1686   : > { %17978 = vmatpush3.bf16.msk.msra.mxu0 %vm20272_vm11, %v18324_v53 }
0x1689   : > { %17257 = vmatmul.mubr.f32.vlgmr.msra.gmra.mrb[44].mxu0 %v20234_v13 }
0x175c   : > { %v14743_v63 = vpop.f32.mrb[44].mxu0 }
0x175d   : > { %14748 = vst [vmem:[%s452_s22] sm:$0x3] %v14743_v63  ;;  %v17258_v55 = vpop.f32.mrb[45].mxu0 }
0x175e PF: > { %s23_s25 = sadd.s32 1, %s18313_s25  }
0x175f   : > { %p20_p4 = scmp.ge.s32.totalorder %s23_s25, 4  }
0x1761   :  { %22 = sbr.rel (!%p20_p4) target bundleno = 1 (0x1), region = 105 }

</bundles_post_ra>
